<compile_context>
chip_gen: v6e
topology: v6e:2x2x1
jax: 0.10.0
libtpu: 0.0.40
codegen_flags: <defaults>
</compile_context>

<pallas_src>
import functools
import math

import jax
import jax.numpy as jnp
from jax.experimental import pallas as pl
from jax.experimental.pallas import tpu as pltpu


# --------------------------------------------------------------------------- BlockSpec helpers

def _batched_spec(tail_shape):
    """Per-graph block: leading batch dim is the grid axis, squeezed inside the kernel."""
    zeros = (0,) * len(tail_shape)
    return pl.BlockSpec((None,) + tuple(tail_shape), lambda b: (b,) + zeros)


def _shared_spec(shape):
    """Batch-shared weights: full-array block, same block for every grid step."""
    zeros = (0,) * len(shape)
    return pl.BlockSpec(tuple(shape), lambda b: zeros)


def _vmem_spec():
    return pl.BlockSpec(memory_space=pltpu.MemorySpace.VMEM)


# --------------------------------------------------------------------------- fused modular-stage kernel

def _modular_kernel(x_ref, aw_ref, au_ref, w1_ref, w2_ref, w3_ref,
                    cb_ref, pw_ref, pb_ref, out_ref, *, nhid, k1, k2, k3):
    """One modular graph per grid step: 3 x (GCNConv+ReLU -> SAG score -> top-k pool
    -> readout), with adjacency filtering P A P^T between levels, all in one kernel."""
    f32 = jnp.float32
    aw = aw_ref[...]                       # weighted adjacency   (N, N)
    au = au_ref[...]                       # unweighted adjacency (N, N)
    cb = cb_ref[...]                       # conv biases          (3, nhid)
    pw = pw_ref[...]                       # pool scorer weights  (nhid, 6)
    pb = pb_ref[...]                       # pool scorer biases   (1, 3)

    def gcn_relu(a_w, x, w, b_row):
        # out = relu( D^-1/2 (A+I) D^-1/2 (X W) + b ),  D = diag(rowsum(A) + 1)
        # computed as d*(A @ (d*XW)) + (d*d)*XW : no (N,N) identity materialized.
        d = jax.lax.rsqrt(jnp.sum(a_w, axis=1, keepdims=True) + 1.0)
        xw = jnp.dot(x, w, preferred_element_type=f32)
        agg = d * jnp.dot(a_w, d * xw, preferred_element_type=f32) + (d * d) * xw
        return jnp.maximum(agg + b_row, 0.0)

    def sag_score(a_u, h, w_rel, w_root, b):
        # GraphConv(nhid->1) on the unweighted adjacency, then tanh.
        # Reassociated: A_u @ (h @ w_rel) — drops the (N, nhid) aggregate intermediate.
        hw = jnp.dot(h, w_rel, preferred_element_type=f32)                  # (n, 1)
        return jnp.tanh(jnp.dot(a_u, hw, preferred_element_type=f32)
                        + jnp.dot(h, w_root, preferred_element_type=f32) + b)

    def topk_p(s, k):
        # s: (n, 1) tanh scores.  Returns the one-hot selection matrix P (k, n).
        # tanh is monotone, so the selected set matches top-k on the raw score.
        n = s.shape[0]
        sub = jax.lax.broadcasted_iota(jnp.int32, (n, 1), 0)                # (n, 1)
        lane = jax.lax.broadcasted_iota(jnp.int32, (1, n), 1)               # (1, n)
        masked = s
        rows = []
        for _ in range(k):                                                   # k is static & small
            m = jnp.max(masked, axis=0, keepdims=True)                       # (1, 1)
            idx = jnp.min(jnp.where(masked >= m, sub, n),
                          axis=0, keepdims=True)                             # (1, 1) first argmax
            rows.append((lane == idx).astype(f32))                           # (1, n)
            masked = jnp.where(sub == idx, -2.0, masked)                     # tanh > -1 > -2
        return jnp.concatenate(rows, axis=0)                                 # (k, n)

    def filter_adj(p, a):
        # P A P^T without an explicit transpose: contract last dims (q @ k.T pattern).
        pa = jnp.dot(p, a, preferred_element_type=f32)                       # (k, n)
        return jax.lax.dot_general(pa, p, (((1,), (1,)), ((), ())),
                                   preferred_element_type=f32)               # (k, k)

    ro = []

    def readout(xp):
        ro.append(jnp.max(xp, axis=0, keepdims=True))
        ro.append(jnp.mean(xp, axis=0, keepdims=True))

    # -- level 1
    h1 = gcn_relu(aw, x_ref[...], w1_ref[...], cb[0:1, :])
    s1 = sag_score(au, h1, pw[:, 0:1], pw[:, 1:2], pb[:, 0:1])
    p1 = topk_p(s1, k1)
    xp1 = jnp.dot(p1, h1 * s1, preferred_element_type=f32)                   # x[perm]*tanh(score)
    readout(xp1)
    aw1 = filter_adj(p1, aw)
    au1 = filter_adj(p1, au)

    # -- level 2
    h2 = gcn_relu(aw1, xp1, w2_ref[...], cb[1:2, :])
    s2 = sag_score(au1, h2, pw[:, 2:3], pw[:, 3:4], pb[:, 1:2])
    p2 = topk_p(s2, k2)
    xp2 = jnp.dot(p2, h2 * s2, preferred_element_type=f32)
    readout(xp2)
    aw2 = filter_adj(p2, aw1)
    au2 = filter_adj(p2, au1)

    # -- level 3 (no adjacency filtering needed after the last pool)
    h3 = gcn_relu(aw2, xp2, w3_ref[...], cb[2:3, :])
    s3 = sag_score(au2, h3, pw[:, 4:5], pw[:, 5:6], pb[:, 2:3])
    p3 = topk_p(s3, k3)
    xp3 = jnp.dot(p3, h3 * s3, preferred_element_type=f32)
    readout(xp3)

    # single lane-concatenated store: [max1|mean1|max2|mean2|max3|mean3]  (1, 6*nhid)
    out_ref[...] = jnp.concatenate(ro, axis=1)


def modular_stage(x, a_w, a_u, params, ratio):
    """All three (GCNConv -> SAGPool -> readout) levels for all M graphs: one kernel."""
    mb, n0, f = x.shape
    nh = params["conv1_w"].shape[1]
    k1 = int(math.ceil(ratio * n0))
    k2 = int(math.ceil(ratio * k1))
    k3 = int(math.ceil(ratio * k2))

    cb = jnp.stack([params["conv1_b"], params["conv2_b"], params["conv3_b"]])       # (3, nh)
    pw = jnp.concatenate([params["pool1"]["w_rel"], params["pool1"]["w_root"],
                          params["pool2"]["w_rel"], params["pool2"]["w_root"],
                          params["pool3"]["w_rel"], params["pool3"]["w_root"]],
                         axis=1)                                                     # (nh, 6)
    pb = jnp.concatenate([params["pool1"]["b_rel"], params["pool2"]["b_rel"],
                          params["pool3"]["b_rel"]]).reshape(1, 3)                   # (1, 3)

    out = pl.pallas_call(
        functools.partial(_modular_kernel, nhid=nh, k1=k1, k2=k2, k3=k3),
        grid=(mb,),
        in_specs=[
            _batched_spec((n0, f)), _batched_spec((n0, n0)), _batched_spec((n0, n0)),
            _shared_spec((f, nh)), _shared_spec((nh, nh)), _shared_spec((nh, nh)),
            _shared_spec((3, nh)), _shared_spec((nh, 6)), _shared_spec((1, 3)),
        ],
        out_specs=_batched_spec((1, 6 * nh)),
        out_shape=jax.ShapeDtypeStruct((mb, 1, 6 * nh), jnp.float32),
        compiler_params=pltpu.CompilerParams(dimension_semantics=("parallel",)),
    )(x, a_w, a_u, params["conv1_w"], params["conv2_w"], params["conv3_w"], cb, pw, pb)
    return out.reshape(mb, 6 * nh)


# --------------------------------------------------------------------------- fused DDI head kernel

def _ddi_kernel(feat_ref, attr_ref, nnw_ref, nnb_ref,
                src_ref, tgt_ref, asrc_ref, atgt_ref,
                root_w_ref, root_b_ref, lin1_w_ref, lin1_b_ref,
                lin2_w_ref, lin2_b_ref,
                loss_ref, score_ref, posx_ref, *, e_pos, e_neg, n_nodes, n_chan):
    """Fused NNConv(aggr='add') + ReLU, feature split, lin1/lin2, pair scores, and the
    BCEWithLogits losses.  NNConv message uses the channel-sum form
        msg = sum_c attr[:, c] * (xs @ W_c) + xs @ B
    so no (E, E*Fout) intermediate is ever materialized."""
    f32 = jnp.float32
    feat = feat_ref[...]                                                     # (M, Fin)
    attr = attr_ref[...]                                                     # (Ep, C)
    src = src_ref[...]                                                       # (Ep, 1) int32
    tgt = tgt_ref[...]                                                       # (1, Ep) int32
    asrc = asrc_ref[...]                                                     # (Ea, 1) int32
    atgt = atgt_ref[...]                                                     # (Ea, 1) int32

    node_lane = jax.lax.broadcasted_iota(jnp.int32, (1, n_nodes), 1)         # (1, M)
    node_sub = jax.lax.broadcasted_iota(jnp.int32, (n_nodes, 1), 0)          # (M, 1)

    # gather source-node features for the message edges (one-hot built in-kernel)
    gsrc = (src == node_lane).astype(f32)                                    # (Ep, M)
    xs = jnp.dot(gsrc, feat, preferred_element_type=f32)                     # (Ep, Fin)

    # NNConv message, channel-sum form: C+1 small lane-dense matmuls.
    msg = jnp.dot(xs, nnb_ref[...], preferred_element_type=f32)              # (Ep, Fout)
    for c in range(n_chan):                                                  # static, small
        msg = msg + attr[:, c:c + 1] * jnp.dot(xs, nnw_ref[c],
                                               preferred_element_type=f32)

    # scatter-add messages onto target nodes
    scat = (node_sub == tgt).astype(f32)                                     # (M, Ep)
    agg = jnp.dot(scat, msg, preferred_element_type=f32)                     # (M, Fout)

    x_ddi = jnp.maximum(jnp.dot(feat, root_w_ref[...], preferred_element_type=f32)
                        + agg + root_b_ref[...], 0.0)                        # (M, Fout)

    # feature split for pos+neg edges stacked -> one pass each through lin1 / lin2
    gsrc_all = (asrc == node_lane).astype(f32)                               # (Ea, M)
    gtgt_all = (atgt == node_lane).astype(f32)                               # (Ea, M)
    src_feat = jnp.dot(gsrc_all, x_ddi, preferred_element_type=f32)          # (Ea, Fout)
    tgt_feat = jnp.dot(gtgt_all, x_ddi, preferred_element_type=f32)
    fx = jnp.dot(src_feat, lin1_w_ref[...], preferred_element_type=f32) + lin1_b_ref[...]
    fy = jnp.dot(tgt_feat, lin2_w_ref[...], preferred_element_type=f32) + lin2_b_ref[...]

    scores = jnp.sum(fx * fy, axis=1, keepdims=True)                         # (Ea, 1)
    score_ref[...] = scores
    posx_ref[...] = fx[:e_pos, :]

    # BCEWithLogits(pos, 1) + BCEWithLogits(neg, 0), mean-reduced (stable softplus)
    def sp(v):
        return jnp.maximum(v, 0.0) + jnp.log(1.0 + jnp.exp(-jnp.abs(v)))

    row = jax.lax.broadcasted_iota(jnp.int32, scores.shape, 0)
    is_pos = row < e_pos
    loss_pos = jnp.sum(jnp.where(is_pos, sp(-scores), 0.0), axis=0, keepdims=True) / e_pos
    loss_neg = jnp.sum(jnp.where(is_pos, 0.0, sp(scores)), axis=0, keepdims=True) / e_neg
    loss_ref[...] = loss_pos + loss_neg


def _ddi_head(feat, attr, nnw3, nnb2, src, tgt_row, src_all, tgt_all,
              root_w, root_b, lin1_w, lin1_b, lin2_w, lin2_b, *, e_pos, e_neg):
    m, _ = feat.shape
    fout = root_w.shape[1]
    c = attr.shape[1]
    e_all = src_all.shape[0]
    return pl.pallas_call(
        functools.partial(_ddi_kernel, e_pos=e_pos, e_neg=e_neg,
                          n_nodes=m, n_chan=c),
        in_specs=[_vmem_spec()] * 14,
        out_specs=[_vmem_spec()] * 3,
        out_shape=[jax.ShapeDtypeStruct((1, 1), jnp.float32),
                   jax.ShapeDtypeStruct((e_all, 1), jnp.float32),
                   jax.ShapeDtypeStruct((e_pos, fout), jnp.float32)],
    )(feat, attr, nnw3, nnb2, src, tgt_row, src_all, tgt_all,
      root_w, root_b, lin1_w, lin1_b, lin2_w, lin2_b)


# --------------------------------------------------------------------------- model glue

def net_se_graph_forward(params, modular_data, ddi_edge_index, neg_edge_index,
                         ddi_edge_attr, neg_edge_attr, *, pooling_ratio):
    # TODO(synk): all modular graphs are assumed to have the same node count so they can
    #             be batched on one grid axis; ragged graphs would need padding + masks.
    x_b = jnp.stack([d[0] for d in modular_data])
    aw_b = jnp.stack([d[1] for d in modular_data])
    au_b = jnp.stack([d[2] for d in modular_data])

    modular_feature = modular_stage(x_b, aw_b, au_b, params, pooling_ratio)   # (M, 6*nhid)
    # TODO(synk): nn.Dropout -> identity (eval mode); stochastic masking omitted.

    mn, fin = modular_feature.shape
    fout = params["conv4_root"].shape[1]
    c = ddi_edge_attr.shape[1]
    e_pos = ddi_edge_index.shape[1]
    e_neg = neg_edge_index.shape[1]

    # edge-network weights in channel-sum layout: W_c = nn_w[c].reshape(Fin, Fout)
    nnw3 = params["nn_w"].reshape(c, fin, fout)
    nnb2 = params["nn_b"].reshape(fin, fout)

    src = ddi_edge_index[0].astype(jnp.int32).reshape(e_pos, 1)
    tgt_row = ddi_edge_index[1].astype(jnp.int32).reshape(1, e_pos)
    src_all = jnp.concatenate([ddi_edge_index[0], neg_edge_index[0]]
                              ).astype(jnp.int32).reshape(e_pos + e_neg, 1)
    tgt_all = jnp.concatenate([ddi_edge_index[1], neg_edge_index[1]]
                              ).astype(jnp.int32).reshape(e_pos + e_neg, 1)

    loss, scores, pos_feat_x = _ddi_head(
        modular_feature, ddi_edge_attr, nnw3, nnb2, src, tgt_row, src_all, tgt_all,
        params["conv4_root"], params["conv4_b"].reshape(1, -1),
        params["lin1_w"], params["lin1_b"].reshape(1, -1),
        params["lin2_w"], params["lin2_b"].reshape(1, -1),
        e_pos=e_pos, e_neg=e_neg)

    # TODO(synk): lin3(pos/neg edge attrs) is dead code in the reference forward; removed.
    norm_pos = scores[:e_pos, 0]
    norm_neg = scores[e_pos:, 0]
    return loss[0, 0], norm_pos, norm_neg, pos_feat_x


# --------------------------------------------------------------------------- params

def init_params(key, num_features, num_edge_features, nhid, ddi_nhid):
    keys = iter(jax.random.split(key, 40))

    def nrm(shape):
        return 0.1 * jax.random.normal(next(keys), shape, dtype=jnp.float32)

    def pool_p():
        return {"w_rel": nrm((nhid, 1)), "w_root": nrm((nhid, 1)), "b_rel": nrm((1,))}

    fin4 = 6 * nhid   # see TODO(synk) at top of file
    return {
        "conv1_w": nrm((num_features, nhid)), "conv1_b": nrm((nhid,)),
        "conv2_w": nrm((nhid, nhid)),         "conv2_b": nrm((nhid,)),
        "conv3_w": nrm((nhid, nhid)),         "conv3_b": nrm((nhid,)),
        "pool1": pool_p(), "pool2": pool_p(), "pool3": pool_p(),
        "nn_w": nrm((num_edge_features, fin4 * ddi_nhid)),
        "nn_b": nrm((fin4 * ddi_nhid,)),
        "conv4_root": nrm((fin4, ddi_nhid)), "conv4_b": nrm((ddi_nhid,)),
        "lin1_w": nrm((ddi_nhid, ddi_nhid)), "lin1_b": nrm((ddi_nhid,)),
        "lin2_w": nrm((ddi_nhid, ddi_nhid)), "lin2_b": nrm((ddi_nhid,)),
        # lin3 exists in the reference module but its output is unused in the forward.
        "lin3_w": nrm((num_edge_features, ddi_nhid)), "lin3_b": nrm((ddi_nhid,)),
    }


# --------------------------------------------------------------------------- main

if __name__ == "__main__":
    NUM_FEATURES = 8
    NUM_EDGE_FEATURES = 6
    NHID = 8
    DDI_NHID = 16
    POOLING_RATIO = 0.5
    M = 4           # modular (molecular) graphs == nodes of the DDI graph
    N_NODES = 12    # nodes per modular graph
    E_POS = 6
    E_NEG = 6

    key = jax.random.PRNGKey(0)
    key, pkey = jax.random.split(key)
    params = init_params(pkey, NUM_FEATURES, NUM_EDGE_FEATURES, NHID, DDI_NHID)

    modular_data = []
    for _ in range(M):
        key, k1, k2, k3 = jax.random.split(key, 4)
        x = jax.random.normal(k1, (N_NODES, NUM_FEATURES), dtype=jnp.float32)
        upper = jnp.triu((jax.random.uniform(k2, (N_NODES, N_NODES)) < 0.3)
                         .astype(jnp.float32), k=1)
        a_u = upper + upper.T                                     # unweighted, symmetric
        w_up = jnp.triu(jax.random.uniform(k3, (N_NODES, N_NODES),
                                           minval=0.5, maxval=1.5), k=1)
        a_w = a_u * (w_up + w_up.T)                               # weighted, symmetric
        modular_data.append((x, a_w, a_u))

    key, k4, k5, k6, k7 = jax.random.split(key, 5)
    ddi_edge_index = jax.random.randint(k4, (2, E_POS), 0, M)
    neg_edge_index = jax.random.randint(k5, (2, E_NEG), 0, M)
    ddi_edge_attr = jax.random.normal(k6, (E_POS, NUM_EDGE_FEATURES), dtype=jnp.float32)
    neg_edge_attr = jax.random.normal(k7, (E_NEG, NUM_EDGE_FEATURES), dtype=jnp.float32)

    fwd = jax.jit(functools.partial(net_se_graph_forward, pooling_ratio=POOLING_RATIO))
    out = fwd(params, modular_data, ddi_edge_index, neg_edge_index,
              ddi_edge_attr, neg_edge_attr)
    jax.block_until_ready(out)
    print("KERNEL_OK")
</pallas_src>

<mosaic_0001>
module attributes {stable_mosaic.version = 11 : i64} {
  func.func @_ddi_kernel(%arg0: memref<4x48xf32, #tpu.memory_space<vmem>>, %arg1: memref<6x6xf32, #tpu.memory_space<vmem>>, %arg2: memref<6x48x16xf32, #tpu.memory_space<vmem>>, %arg3: memref<48x16xf32, #tpu.memory_space<vmem>>, %arg4: memref<6x1xi32, #tpu.memory_space<vmem>>, %arg5: memref<1x6xi32, #tpu.memory_space<vmem>>, %arg6: memref<12x1xi32, #tpu.memory_space<vmem>>, %arg7: memref<12x1xi32, #tpu.memory_space<vmem>>, %arg8: memref<48x16xf32, #tpu.memory_space<vmem>>, %arg9: memref<1x16xf32, #tpu.memory_space<vmem>>, %arg10: memref<16x16xf32, #tpu.memory_space<vmem>>, %arg11: memref<1x16xf32, #tpu.memory_space<vmem>>, %arg12: memref<16x16xf32, #tpu.memory_space<vmem>>, %arg13: memref<1x16xf32, #tpu.memory_space<vmem>>, %arg14: memref<1x1xf32, #tpu.memory_space<vmem>>, %arg15: memref<12x1xf32, #tpu.memory_space<vmem>>, %arg16: memref<6x16xf32, #tpu.memory_space<vmem>>) attributes {dimension_semantics = [], scalar_prefetch = 0 : i64, scratch_operands = 0 : i64, tpu.core_type = #tpu.core_type<tc>} {
    %c0 = arith.constant 0 : index
    %c0_0 = arith.constant 0 : index
    %0 = vector.load %arg0[%c0, %c0_0] : memref<4x48xf32, #tpu.memory_space<vmem>>, vector<4x48xf32>
    %c0_1 = arith.constant 0 : index
    %c0_2 = arith.constant 0 : index
    %1 = vector.load %arg1[%c0_1, %c0_2] : memref<6x6xf32, #tpu.memory_space<vmem>>, vector<6x6xf32>
    %c0_3 = arith.constant 0 : index
    %c0_4 = arith.constant 0 : index
    %2 = vector.load %arg4[%c0_3, %c0_4] : memref<6x1xi32, #tpu.memory_space<vmem>>, vector<6x1xi32>
    %c0_5 = arith.constant 0 : index
    %c0_6 = arith.constant 0 : index
    %3 = vector.load %arg5[%c0_5, %c0_6] : memref<1x6xi32, #tpu.memory_space<vmem>>, vector<1x6xi32>
    %c0_7 = arith.constant 0 : index
    %c0_8 = arith.constant 0 : index
    %4 = vector.load %arg6[%c0_7, %c0_8] : memref<12x1xi32, #tpu.memory_space<vmem>>, vector<12x1xi32>
    %c0_9 = arith.constant 0 : index
    %c0_10 = arith.constant 0 : index
    %5 = vector.load %arg7[%c0_9, %c0_10] : memref<12x1xi32, #tpu.memory_space<vmem>>, vector<12x1xi32>
    %6 = tpu.iota {dimensions = array<i32: 1>} : vector<1x4xi32>
    %7 = tpu.iota {dimensions = array<i32: 0>} : vector<4x1xi32>
    %8 = vector.broadcast %2 : vector<6x1xi32> to vector<6x4xi32>
    %9 = vector.broadcast %6 : vector<1x4xi32> to vector<6x4xi32>
    %10 = arith.cmpi eq, %8, %9 : vector<6x4xi32>
    %11 = arith.extui %10 : vector<6x4xi1> to vector<6x4xi32>
    %12 = arith.sitofp %11 : vector<6x4xi32> to vector<6x4xf32>
    %cst = arith.constant dense<0.000000e+00> : vector<6x48xf32>
    %13 = tpu.matmul %12, %0, %cst {dimension_numbers = #tpu.dot_dimension_numbers<[1], [0], [0], [1], [0, 0, 1, 1], [], []>} : vector<6x4xf32>, vector<4x48xf32>, vector<6x48xf32> -> vector<6x48xf32>
    %c0_11 = arith.constant 0 : index
    %c0_12 = arith.constant 0 : index
    %14 = vector.load %arg3[%c0_11, %c0_12] : memref<48x16xf32, #tpu.memory_space<vmem>>, vector<48x16xf32>
    %cst_13 = arith.constant dense<0.000000e+00> : vector<6x16xf32>
    %15 = tpu.matmul %13, %14, %cst_13 {dimension_numbers = #tpu.dot_dimension_numbers<[1], [0], [0], [1], [0, 0, 1, 1], [], []>} : vector<6x48xf32>, vector<48x16xf32>, vector<6x16xf32> -> vector<6x16xf32>
    %16 = vector.extract_strided_slice %1 {offsets = [0, 0], sizes = [6, 1], strides = [1, 1]} : vector<6x6xf32> to vector<6x1xf32>
    %c0_14 = arith.constant 0 : index
    %c0_15 = arith.constant 0 : index
    %c0_16 = arith.constant 0 : index
    %17 = vector.load %arg2[%c0_14, %c0_15, %c0_16] : memref<6x48x16xf32, #tpu.memory_space<vmem>>, vector<1x48x16xf32>
    %18 = vector.shape_cast %17 : vector<1x48x16xf32> to vector<48x16xf32>
    %cst_17 = arith.constant dense<0.000000e+00> : vector<6x16xf32>
    %19 = tpu.matmul %13, %18, %cst_17 {dimension_numbers = #tpu.dot_dimension_numbers<[1], [0], [0], [1], [0, 0, 1, 1], [], []>} : vector<6x48xf32>, vector<48x16xf32>, vector<6x16xf32> -> vector<6x16xf32>
    %20 = vector.broadcast %16 : vector<6x1xf32> to vector<6x16xf32>
    %21 = arith.mulf %20, %19 : vector<6x16xf32>
    %22 = arith.addf %15, %21 : vector<6x16xf32>
    %23 = vector.extract_strided_slice %1 {offsets = [0, 1], sizes = [6, 1], strides = [1, 1]} : vector<6x6xf32> to vector<6x1xf32>
    %c1 = arith.constant 1 : index
    %c0_18 = arith.constant 0 : index
    %c0_19 = arith.constant 0 : index
    %24 = vector.load %arg2[%c1, %c0_18, %c0_19] : memref<6x48x16xf32, #tpu.memory_space<vmem>>, vector<1x48x16xf32>
    %25 = vector.shape_cast %24 : vector<1x48x16xf32> to vector<48x16xf32>
    %cst_20 = arith.constant dense<0.000000e+00> : vector<6x16xf32>
    %26 = tpu.matmul %13, %25, %cst_20 {dimension_numbers = #tpu.dot_dimension_numbers<[1], [0], [0], [1], [0, 0, 1, 1], [], []>} : vector<6x48xf32>, vector<48x16xf32>, vector<6x16xf32> -> vector<6x16xf32>
    %27 = vector.broadcast %23 : vector<6x1xf32> to vector<6x16xf32>
    %28 = arith.mulf %27, %26 : vector<6x16xf32>
    %29 = arith.addf %22, %28 : vector<6x16xf32>
    %30 = vector.extract_strided_slice %1 {offsets = [0, 2], sizes = [6, 1], strides = [1, 1]} : vector<6x6xf32> to vector<6x1xf32>
    %c2 = arith.constant 2 : index
    %c0_21 = arith.constant 0 : index
    %c0_22 = arith.constant 0 : index
    %31 = vector.load %arg2[%c2, %c0_21, %c0_22] : memref<6x48x16xf32, #tpu.memory_space<vmem>>, vector<1x48x16xf32>
    %32 = vector.shape_cast %31 : vector<1x48x16xf32> to vector<48x16xf32>
    %cst_23 = arith.constant dense<0.000000e+00> : vector<6x16xf32>
    %33 = tpu.matmul %13, %32, %cst_23 {dimension_numbers = #tpu.dot_dimension_numbers<[1], [0], [0], [1], [0, 0, 1, 1], [], []>} : vector<6x48xf32>, vector<48x16xf32>, vector<6x16xf32> -> vector<6x16xf32>
    %34 = vector.broadcast %30 : vector<6x1xf32> to vector<6x16xf32>
    %35 = arith.mulf %34, %33 : vector<6x16xf32>
    %36 = arith.addf %29, %35 : vector<6x16xf32>
    %37 = vector.extract_strided_slice %1 {offsets = [0, 3], sizes = [6, 1], strides = [1, 1]} : vector<6x6xf32> to vector<6x1xf32>
    %c3 = arith.constant 3 : index
    %c0_24 = arith.constant 0 : index
    %c0_25 = arith.constant 0 : index
    %38 = vector.load %arg2[%c3, %c0_24, %c0_25] : memref<6x48x16xf32, #tpu.memory_space<vmem>>, vector<1x48x16xf32>
    %39 = vector.shape_cast %38 : vector<1x48x16xf32> to vector<48x16xf32>
    %cst_26 = arith.constant dense<0.000000e+00> : vector<6x16xf32>
    %40 = tpu.matmul %13, %39, %cst_26 {dimension_numbers = #tpu.dot_dimension_numbers<[1], [0], [0], [1], [0, 0, 1, 1], [], []>} : vector<6x48xf32>, vector<48x16xf32>, vector<6x16xf32> -> vector<6x16xf32>
    %41 = vector.broadcast %37 : vector<6x1xf32> to vector<6x16xf32>
    %42 = arith.mulf %41, %40 : vector<6x16xf32>
    %43 = arith.addf %36, %42 : vector<6x16xf32>
    %44 = vector.extract_strided_slice %1 {offsets = [0, 4], sizes = [6, 1], strides = [1, 1]} : vector<6x6xf32> to vector<6x1xf32>
    %c4 = arith.constant 4 : index
    %c0_27 = arith.constant 0 : index
    %c0_28 = arith.constant 0 : index
    %45 = vector.load %arg2[%c4, %c0_27, %c0_28] : memref<6x48x16xf32, #tpu.memory_space<vmem>>, vector<1x48x16xf32>
    %46 = vector.shape_cast %45 : vector<1x48x16xf32> to vector<48x16xf32>
    %cst_29 = arith.constant dense<0.000000e+00> : vector<6x16xf32>
    %47 = tpu.matmul %13, %46, %cst_29 {dimension_numbers = #tpu.dot_dimension_numbers<[1], [0], [0], [1], [0, 0, 1, 1], [], []>} : vector<6x48xf32>, vector<48x16xf32>, vector<6x16xf32> -> vector<6x16xf32>
    %48 = vector.broadcast %44 : vector<6x1xf32> to vector<6x16xf32>
    %49 = arith.mulf %48, %47 : vector<6x16xf32>
    %50 = arith.addf %43, %49 : vector<6x16xf32>
    %51 = vector.extract_strided_slice %1 {offsets = [0, 5], sizes = [6, 1], strides = [1, 1]} : vector<6x6xf32> to vector<6x1xf32>
    %c5 = arith.constant 5 : index
    %c0_30 = arith.constant 0 : index
    %c0_31 = arith.constant 0 : index
    %52 = vector.load %arg2[%c5, %c0_30, %c0_31] : memref<6x48x16xf32, #tpu.memory_space<vmem>>, vector<1x48x16xf32>
    %53 = vector.shape_cast %52 : vector<1x48x16xf32> to vector<48x16xf32>
    %cst_32 = arith.constant dense<0.000000e+00> : vector<6x16xf32>
    %54 = tpu.matmul %13, %53, %cst_32 {dimension_numbers = #tpu.dot_dimension_numbers<[1], [0], [0], [1], [0, 0, 1, 1], [], []>} : vector<6x48xf32>, vector<48x16xf32>, vector<6x16xf32> -> vector<6x16xf32>
    %55 = vector.broadcast %51 : vector<6x1xf32> to vector<6x16xf32>
    %56 = arith.mulf %55, %54 : vector<6x16xf32>
    %57 = arith.addf %50, %56 : vector<6x16xf32>
    %58 = vector.broadcast %7 : vector<4x1xi32> to vector<4x6xi32>
    %59 = vector.broadcast %3 : vector<1x6xi32> to vector<4x6xi32>
    %60 = arith.cmpi eq, %58, %59 : vector<4x6xi32>
    %61 = arith.extui %60 : vector<4x6xi1> to vector<4x6xi32>
    %62 = arith.sitofp %61 : vector<4x6xi32> to vector<4x6xf32>
    %cst_33 = arith.constant dense<0.000000e+00> : vector<4x16xf32>
    %63 = tpu.matmul %62, %57, %cst_33 {dimension_numbers = #tpu.dot_dimension_numbers<[1], [0], [0], [1], [0, 0, 1, 1], [], []>} : vector<4x6xf32>, vector<6x16xf32>, vector<4x16xf32> -> vector<4x16xf32>
    %c0_34 = arith.constant 0 : index
    %c0_35 = arith.constant 0 : index
    %64 = vector.load %arg8[%c0_34, %c0_35] : memref<48x16xf32, #tpu.memory_space<vmem>>, vector<48x16xf32>
    %cst_36 = arith.constant dense<0.000000e+00> : vector<4x16xf32>
    %65 = tpu.matmul %0, %64, %cst_36 {dimension_numbers = #tpu.dot_dimension_numbers<[1], [0], [0], [1], [0, 0, 1, 1], [], []>} : vector<4x48xf32>, vector<48x16xf32>, vector<4x16xf32> -> vector<4x16xf32>
    %66 = arith.addf %65, %63 : vector<4x16xf32>
    %c0_37 = arith.constant 0 : index
    %c0_38 = arith.constant 0 : index
    %67 = vector.load %arg9[%c0_37, %c0_38] : memref<1x16xf32, #tpu.memory_space<vmem>>, vector<1x16xf32>
    %68 = vector.broadcast %67 : vector<1x16xf32> to vector<4x16xf32>
    %69 = arith.addf %66, %68 : vector<4x16xf32>
    %cst_39 = arith.constant 0.000000e+00 : f32
    %70 = vector.broadcast %cst_39 : f32 to vector<4x16xf32>
    %71 = arith.maximumf %69, %70 : vector<4x16xf32>
    %72 = vector.broadcast %4 : vector<12x1xi32> to vector<12x4xi32>
    %73 = vector.broadcast %6 : vector<1x4xi32> to vector<12x4xi32>
    %74 = arith.cmpi eq, %72, %73 : vector<12x4xi32>
    %75 = arith.extui %74 : vector<12x4xi1> to vector<12x4xi32>
    %76 = arith.sitofp %75 : vector<12x4xi32> to vector<12x4xf32>
    %77 = vector.broadcast %5 : vector<12x1xi32> to vector<12x4xi32>
    %78 = vector.broadcast %6 : vector<1x4xi32> to vector<12x4xi32>
    %79 = arith.cmpi eq, %77, %78 : vector<12x4xi32>
    %80 = arith.extui %79 : vector<12x4xi1> to vector<12x4xi32>
    %81 = arith.sitofp %80 : vector<12x4xi32> to vector<12x4xf32>
    %cst_40 = arith.constant dense<0.000000e+00> : vector<12x16xf32>
    %82 = tpu.matmul %76, %71, %cst_40 {dimension_numbers = #tpu.dot_dimension_numbers<[1], [0], [0], [1], [0, 0, 1, 1], [], []>} : vector<12x4xf32>, vector<4x16xf32>, vector<12x16xf32> -> vector<12x16xf32>
    %cst_41 = arith.constant dense<0.000000e+00> : vector<12x16xf32>
    %83 = tpu.matmul %81, %71, %cst_41 {dimension_numbers = #tpu.dot_dimension_numbers<[1], [0], [0], [1], [0, 0, 1, 1], [], []>} : vector<12x4xf32>, vector<4x16xf32>, vector<12x16xf32> -> vector<12x16xf32>
    %c0_42 = arith.constant 0 : index
    %c0_43 = arith.constant 0 : index
    %84 = vector.load %arg10[%c0_42, %c0_43] : memref<16x16xf32, #tpu.memory_space<vmem>>, vector<16x16xf32>
    %cst_44 = arith.constant dense<0.000000e+00> : vector<12x16xf32>
    %85 = tpu.matmul %82, %84, %cst_44 {dimension_numbers = #tpu.dot_dimension_numbers<[1], [0], [0], [1], [0, 0, 1, 1], [], []>} : vector<12x16xf32>, vector<16x16xf32>, vector<12x16xf32> -> vector<12x16xf32>
    %c0_45 = arith.constant 0 : index
    %c0_46 = arith.constant 0 : index
    %86 = vector.load %arg11[%c0_45, %c0_46] : memref<1x16xf32, #tpu.memory_space<vmem>>, vector<1x16xf32>
    %87 = vector.broadcast %86 : vector<1x16xf32> to vector<12x16xf32>
    %88 = arith.addf %85, %87 : vector<12x16xf32>
    %c0_47 = arith.constant 0 : index
    %c0_48 = arith.constant 0 : index
    %89 = vector.load %arg12[%c0_47, %c0_48] : memref<16x16xf32, #tpu.memory_space<vmem>>, vector<16x16xf32>
    %cst_49 = arith.constant dense<0.000000e+00> : vector<12x16xf32>
    %90 = tpu.matmul %83, %89, %cst_49 {dimension_numbers = #tpu.dot_dimension_numbers<[1], [0], [0], [1], [0, 0, 1, 1], [], []>} : vector<12x16xf32>, vector<16x16xf32>, vector<12x16xf32> -> vector<12x16xf32>
    %c0_50 = arith.constant 0 : index
    %c0_51 = arith.constant 0 : index
    %91 = vector.load %arg13[%c0_50, %c0_51] : memref<1x16xf32, #tpu.memory_space<vmem>>, vector<1x16xf32>
    %92 = vector.broadcast %91 : vector<1x16xf32> to vector<12x16xf32>
    %93 = arith.addf %90, %92 : vector<12x16xf32>
    %94 = arith.mulf %88, %93 : vector<12x16xf32>
    %cst_52 = arith.constant dense<0.000000e+00> : vector<12xf32>
    %95 = vector.multi_reduction <add>, %94, %cst_52 [1] : vector<12x16xf32> to vector<12xf32>
    %96 = vector.shape_cast %95 : vector<12xf32> to vector<12x1xf32>
    %c0_53 = arith.constant 0 : index
    %c0_54 = arith.constant 0 : index
    %97 = vector.load %arg15[%c0_53, %c0_54] : memref<12x1xf32, #tpu.memory_space<vmem>>, vector<12x1xf32>
    tpu.vector_store %arg15[%c0_53, %c0_54], %96 {strides = array<i32>} : memref<12x1xf32, #tpu.memory_space<vmem>>, vector<12x1xf32>,
    %98 = vector.extract_strided_slice %88 {offsets = [0, 0], sizes = [6, 16], strides = [1, 1]} : vector<12x16xf32> to vector<6x16xf32>
    %c0_55 = arith.constant 0 : index
    %c0_56 = arith.constant 0 : index
    %99 = vector.load %arg16[%c0_55, %c0_56] : memref<6x16xf32, #tpu.memory_space<vmem>>, vector<6x16xf32>
    tpu.vector_store %arg16[%c0_55, %c0_56], %98 {strides = array<i32>} : memref<6x16xf32, #tpu.memory_space<vmem>>, vector<6x16xf32>,
    %100 = tpu.iota {dimensions = array<i32: 0>} : vector<12x1xi32>
    %c6_i32 = arith.constant 6 : i32
    %101 = vector.broadcast %c6_i32 : i32 to vector<12x1xi32>
    %102 = arith.cmpi slt, %100, %101 : vector<12x1xi32>
    %cst_57 = arith.constant 0.000000e+00 : f32
    %103 = vector.broadcast %cst_57 : f32 to vector<12x1xf32>
    %104 = arith.subf %103, %96 : vector<12x1xf32>
    %cst_58 = arith.constant 0.000000e+00 : f32
    %105 = vector.broadcast %cst_58 : f32 to vector<12x1xf32>
    %106 = arith.maximumf %104, %105 : vector<12x1xf32>
    %107 = math.absf %104 : vector<12x1xf32>
    %cst_59 = arith.constant 0.000000e+00 : f32
    %108 = vector.broadcast %cst_59 : f32 to vector<12x1xf32>
    %109 = arith.subf %108, %107 : vector<12x1xf32>
    %110 = math.exp %109 : vector<12x1xf32>
    %cst_60 = arith.constant 1.000000e+00 : f32
    %111 = vector.broadcast %cst_60 : f32 to vector<12x1xf32>
    %112 = arith.addf %111, %110 : vector<12x1xf32>
    %113 = math.log %112 : vector<12x1xf32>
    %114 = arith.addf %106, %113 : vector<12x1xf32>
    %cst_61 = arith.constant 0.000000e+00 : f32
    %115 = vector.broadcast %cst_61 : f32 to vector<12x1xf32>
    %116 = arith.select %102, %114, %115 : vector<12x1xi1>, vector<12x1xf32>
    %cst_62 = arith.constant dense<0.000000e+00> : vector<1xf32>
    %117 = vector.multi_reduction <add>, %116, %cst_62 [0] : vector<12x1xf32> to vector<1xf32>
    %118 = vector.shape_cast %117 : vector<1xf32> to vector<1x1xf32>
    %cst_63 = arith.constant 6.000000e+00 : f32
    %119 = vector.broadcast %cst_63 : f32 to vector<1x1xf32>
    %120 = arith.divf %118, %119 : vector<1x1xf32>
    %cst_64 = arith.constant 0.000000e+00 : f32
    %121 = vector.broadcast %cst_64 : f32 to vector<12x1xf32>
    %122 = arith.maximumf %96, %121 : vector<12x1xf32>
    %123 = math.absf %96 : vector<12x1xf32>
    %cst_65 = arith.constant 0.000000e+00 : f32
    %124 = vector.broadcast %cst_65 : f32 to vector<12x1xf32>
    %125 = arith.subf %124, %123 : vector<12x1xf32>
    %126 = math.exp %125 : vector<12x1xf32>
    %cst_66 = arith.constant 1.000000e+00 : f32
    %127 = vector.broadcast %cst_66 : f32 to vector<12x1xf32>
    %128 = arith.addf %127, %126 : vector<12x1xf32>
    %129 = math.log %128 : vector<12x1xf32>
    %130 = arith.addf %122, %129 : vector<12x1xf32>
    %cst_67 = arith.constant 0.000000e+00 : f32
    %131 = vector.broadcast %cst_67 : f32 to vector<12x1xf32>
    %132 = arith.select %102, %131, %130 : vector<12x1xi1>, vector<12x1xf32>
    %cst_68 = arith.constant dense<0.000000e+00> : vector<1xf32>
    %133 = vector.multi_reduction <add>, %132, %cst_68 [0] : vector<12x1xf32> to vector<1xf32>
    %134 = vector.shape_cast %133 : vector<1xf32> to vector<1x1xf32>
    %cst_69 = arith.constant 6.000000e+00 : f32
    %135 = vector.broadcast %cst_69 : f32 to vector<1x1xf32>
    %136 = arith.divf %134, %135 : vector<1x1xf32>
    %137 = arith.addf %120, %136 : vector<1x1xf32>
    %c0_70 = arith.constant 0 : index
    %c0_71 = arith.constant 0 : index
    %138 = vector.load %arg14[%c0_70, %c0_71] : memref<1x1xf32, #tpu.memory_space<vmem>>, vector<1x1xf32>
    tpu.vector_store %arg14[%c0_70, %c0_71], %137 {strides = array<i32>} : memref<1x1xf32, #tpu.memory_space<vmem>>, vector<1x1xf32>,
    return
  }
}

module attributes {stable_mosaic.version = 11 : i64} {
  func.func @_modular_kernel(%arg0: i32, %arg1: memref<1x12x8xf32, #tpu.memory_space<vmem>>, %arg2: memref<1x12x12xf32, #tpu.memory_space<vmem>>, %arg3: memref<1x12x12xf32, #tpu.memory_space<vmem>>, %arg4: memref<8x8xf32, #tpu.memory_space<vmem>>, %arg5: memref<8x8xf32, #tpu.memory_space<vmem>>, %arg6: memref<8x8xf32, #tpu.memory_space<vmem>>, %arg7: memref<3x8xf32, #tpu.memory_space<vmem>>, %arg8: memref<8x6xf32, #tpu.memory_space<vmem>>, %arg9: memref<1x3xf32, #tpu.memory_space<vmem>>, %arg10: memref<1x1x48xf32, #tpu.memory_space<vmem>>) attributes {dimension_semantics = [#tpu.dimension_semantics<parallel>], iteration_bounds = array<i64: 4>, scalar_prefetch = 0 : i64, scratch_operands = 0 : i64, tpu.core_type = #tpu.core_type<tc>, window_params = [{transform_indices = @transform_0, window_bounds = array<i64: 1, 12, 8>}, {transform_indices = @transform_1, window_bounds = array<i64: 1, 12, 12>}, {transform_indices = @transform_2, window_bounds = array<i64: 1, 12, 12>}, {pipeline_mode = #tpu.pipeline_mode<synchronous>, transform_indices = @transform_3, window_bounds = array<i64: 8, 8>}, {pipeline_mode = #tpu.pipeline_mode<synchronous>, transform_indices = @transform_4, window_bounds = array<i64: 8, 8>}, {pipeline_mode = #tpu.pipeline_mode<synchronous>, transform_indices = @transform_5, window_bounds = array<i64: 8, 8>}, {pipeline_mode = #tpu.pipeline_mode<synchronous>, transform_indices = @transform_6, window_bounds = array<i64: 3, 8>}, {pipeline_mode = #tpu.pipeline_mode<synchronous>, transform_indices = @transform_7, window_bounds = array<i64: 8, 6>}, {pipeline_mode = #tpu.pipeline_mode<synchronous>, transform_indices = @transform_8, window_bounds = array<i64: 1, 3>}, {transform_indices = @transform_9, window_bounds = array<i64: 1, 1, 48>}]} {
    %c0 = arith.constant 0 : index
    %c0_0 = arith.constant 0 : index
    %c0_1 = arith.constant 0 : index
    %0 = vector.load %arg2[%c0, %c0_0, %c0_1] : memref<1x12x12xf32, #tpu.memory_space<vmem>>, vector<1x12x12xf32>
    %1 = vector.shape_cast %0 : vector<1x12x12xf32> to vector<12x12xf32>
    %c0_2 = arith.constant 0 : index
    %c0_3 = arith.constant 0 : index
    %c0_4 = arith.constant 0 : index
    %2 = vector.load %arg3[%c0_2, %c0_3, %c0_4] : memref<1x12x12xf32, #tpu.memory_space<vmem>>, vector<1x12x12xf32>
    %3 = vector.shape_cast %2 : vector<1x12x12xf32> to vector<12x12xf32>
    %c0_5 = arith.constant 0 : index
    %c0_6 = arith.constant 0 : index
    %4 = vector.load %arg7[%c0_5, %c0_6] : memref<3x8xf32, #tpu.memory_space<vmem>>, vector<3x8xf32>
    %c0_7 = arith.constant 0 : index
    %c0_8 = arith.constant 0 : index
    %5 = vector.load %arg8[%c0_7, %c0_8] : memref<8x6xf32, #tpu.memory_space<vmem>>, vector<8x6xf32>
    %c0_9 = arith.constant 0 : index
    %c0_10 = arith.constant 0 : index
    %6 = vector.load %arg9[%c0_9, %c0_10] : memref<1x3xf32, #tpu.memory_space<vmem>>, vector<1x3xf32>
    %c0_11 = arith.constant 0 : index
    %c0_12 = arith.constant 0 : index
    %c0_13 = arith.constant 0 : index
    %7 = vector.load %arg1[%c0_11, %c0_12, %c0_13] : memref<1x12x8xf32, #tpu.memory_space<vmem>>, vector<1x12x8xf32>
    %8 = vector.shape_cast %7 : vector<1x12x8xf32> to vector<12x8xf32>
    %c0_14 = arith.constant 0 : index
    %c0_15 = arith.constant 0 : index
    %9 = vector.load %arg4[%c0_14, %c0_15] : memref<8x8xf32, #tpu.memory_space<vmem>>, vector<8x8xf32>
    %10 = vector.extract_strided_slice %4 {offsets = [0, 0], sizes = [1, 8], strides = [1, 1]} : vector<3x8xf32> to vector<1x8xf32>
    %cst = arith.constant dense<0.000000e+00> : vector<12xf32>
    %11 = vector.multi_reduction <add>, %1, %cst [1] : vector<12x12xf32> to vector<12xf32>
    %12 = vector.shape_cast %11 : vector<12xf32> to vector<12x1xf32>
    %cst_16 = arith.constant 1.000000e+00 : f32
    %13 = vector.broadcast %cst_16 : f32 to vector<12x1xf32>
    %14 = arith.addf %12, %13 : vector<12x1xf32>
    %15 = math.rsqrt %14 : vector<12x1xf32>
    %cst_17 = arith.constant dense<0.000000e+00> : vector<12x8xf32>
    %16 = tpu.matmul %8, %9, %cst_17 {dimension_numbers = #tpu.dot_dimension_numbers<[1], [0], [0], [1], [0, 0, 1, 1], [], []>} : vector<12x8xf32>, vector<8x8xf32>, vector<12x8xf32> -> vector<12x8xf32>
    %17 = vector.broadcast %15 : vector<12x1xf32> to vector<12x8xf32>
    %18 = arith.mulf %17, %16 : vector<12x8xf32>
    %cst_18 = arith.constant dense<0.000000e+00> : vector<12x8xf32>
    %19 = tpu.matmul %1, %18, %cst_18 {dimension_numbers = #tpu.dot_dimension_numbers<[1], [0], [0], [1], [0, 0, 1, 1], [], []>} : vector<12x12xf32>, vector<12x8xf32>, vector<12x8xf32> -> vector<12x8xf32>
    %20 = vector.broadcast %15 : vector<12x1xf32> to vector<12x8xf32>
    %21 = arith.mulf %20, %19 : vector<12x8xf32>
    %22 = arith.mulf %15, %15 : vector<12x1xf32>
    %23 = vector.broadcast %22 : vector<12x1xf32> to vector<12x8xf32>
    %24 = arith.mulf %23, %16 : vector<12x8xf32>
    %25 = arith.addf %21, %24 : vector<12x8xf32>
    %26 = vector.broadcast %10 : vector<1x8xf32> to vector<12x8xf32>
    %27 = arith.addf %25, %26 : vector<12x8xf32>
    %cst_19 = arith.constant 0.000000e+00 : f32
    %28 = vector.broadcast %cst_19 : f32 to vector<12x8xf32>
    %29 = arith.maximumf %27, %28 : vector<12x8xf32>
    %30 = vector.extract_strided_slice %5 {offsets = [0, 0], sizes = [8, 1], strides = [1, 1]} : vector<8x6xf32> to vector<8x1xf32>
    %31 = vector.extract_strided_slice %5 {offsets = [0, 1], sizes = [8, 1], strides = [1, 1]} : vector<8x6xf32> to vector<8x1xf32>
    %32 = vector.extract_strided_slice %6 {offsets = [0, 0], sizes = [1, 1], strides = [1, 1]} : vector<1x3xf32> to vector<1x1xf32>
    %cst_20 = arith.constant dense<0.000000e+00> : vector<12x1xf32>
    %33 = tpu.matmul %29, %30, %cst_20 {dimension_numbers = #tpu.dot_dimension_numbers<[1], [0], [0], [1], [0, 0, 1, 1], [], []>} : vector<12x8xf32>, vector<8x1xf32>, vector<12x1xf32> -> vector<12x1xf32>
    %cst_21 = arith.constant dense<0.000000e+00> : vector<12x1xf32>
    %34 = tpu.matmul %3, %33, %cst_21 {dimension_numbers = #tpu.dot_dimension_numbers<[1], [0], [0], [1], [0, 0, 1, 1], [], []>} : vector<12x12xf32>, vector<12x1xf32>, vector<12x1xf32> -> vector<12x1xf32>
    %cst_22 = arith.constant dense<0.000000e+00> : vector<12x1xf32>
    %35 = tpu.matmul %29, %31, %cst_22 {dimension_numbers = #tpu.dot_dimension_numbers<[1], [0], [0], [1], [0, 0, 1, 1], [], []>} : vector<12x8xf32>, vector<8x1xf32>, vector<12x1xf32> -> vector<12x1xf32>
    %36 = arith.addf %34, %35 : vector<12x1xf32>
    %37 = vector.broadcast %32 : vector<1x1xf32> to vector<12x1xf32>
    %38 = arith.addf %36, %37 : vector<12x1xf32>
    %39 = math.tanh %38 : vector<12x1xf32>
    %40 = tpu.iota {dimensions = array<i32: 0>} : vector<12x1xi32>
    %41 = tpu.iota {dimensions = array<i32: 1>} : vector<1x12xi32>
    %cst_23 = arith.constant dense<0xFF800000> : vector<1xf32>
    %42 = vector.multi_reduction <maximumf>, %39, %cst_23 [0] : vector<12x1xf32> to vector<1xf32>
    %43 = vector.shape_cast %42 : vector<1xf32> to vector<1x1xf32>
    %44 = vector.broadcast %43 : vector<1x1xf32> to vector<12x1xf32>
    %45 = arith.cmpf oge, %39, %44 : vector<12x1xf32>
    %c12_i32 = arith.constant 12 : i32
    %46 = vector.broadcast %c12_i32 : i32 to vector<12x1xi32>
    %47 = arith.select %45, %40, %46 : vector<12x1xi1>, vector<12x1xi32>
    %cst_24 = arith.constant dense<2147483647> : vector<1xi32>
    %48 = vector.multi_reduction <minsi>, %47, %cst_24 [0] : vector<12x1xi32> to vector<1xi32>
    %49 = vector.shape_cast %48 : vector<1xi32> to vector<1x1xi32>
    %50 = vector.broadcast %49 : vector<1x1xi32> to vector<1x12xi32>
    %51 = arith.cmpi eq, %41, %50 : vector<1x12xi32>
    %52 = arith.extui %51 : vector<1x12xi1> to vector<1x12xi32>
    %53 = arith.sitofp %52 : vector<1x12xi32> to vector<1x12xf32>
    %54 = vector.broadcast %49 : vector<1x1xi32> to vector<12x1xi32>
    %55 = arith.cmpi eq, %40, %54 : vector<12x1xi32>
    %cst_25 = arith.constant -2.000000e+00 : f32
    %56 = vector.broadcast %cst_25 : f32 to vector<12x1xf32>
    %57 = arith.select %55, %56, %39 : vector<12x1xi1>, vector<12x1xf32>
    %cst_26 = arith.constant dense<0xFF800000> : vector<1xf32>
    %58 = vector.multi_reduction <maximumf>, %57, %cst_26 [0] : vector<12x1xf32> to vector<1xf32>
    %59 = vector.shape_cast %58 : vector<1xf32> to vector<1x1xf32>
    %60 = vector.broadcast %59 : vector<1x1xf32> to vector<12x1xf32>
    %61 = arith.cmpf oge, %57, %60 : vector<12x1xf32>
    %c12_i32_27 = arith.constant 12 : i32
    %62 = vector.broadcast %c12_i32_27 : i32 to vector<12x1xi32>
    %63 = arith.select %61, %40, %62 : vector<12x1xi1>, vector<12x1xi32>
    %cst_28 = arith.constant dense<2147483647> : vector<1xi32>
    %64 = vector.multi_reduction <minsi>, %63, %cst_28 [0] : vector<12x1xi32> to vector<1xi32>
    %65 = vector.shape_cast %64 : vector<1xi32> to vector<1x1xi32>
    %66 = vector.broadcast %65 : vector<1x1xi32> to vector<1x12xi32>
    %67 = arith.cmpi eq, %41, %66 : vector<1x12xi32>
    %68 = arith.extui %67 : vector<1x12xi1> to vector<1x12xi32>
    %69 = arith.sitofp %68 : vector<1x12xi32> to vector<1x12xf32>
    %70 = vector.broadcast %65 : vector<1x1xi32> to vector<12x1xi32>
    %71 = arith.cmpi eq, %40, %70 : vector<12x1xi32>
    %cst_29 = arith.constant -2.000000e+00 : f32
    %72 = vector.broadcast %cst_29 : f32 to vector<12x1xf32>
    %73 = arith.select %71, %72, %57 : vector<12x1xi1>, vector<12x1xf32>
    %cst_30 = arith.constant dense<0xFF800000> : vector<1xf32>
    %74 = vector.multi_reduction <maximumf>, %73, %cst_30 [0] : vector<12x1xf32> to vector<1xf32>
    %75 = vector.shape_cast %74 : vector<1xf32> to vector<1x1xf32>
    %76 = vector.broadcast %75 : vector<1x1xf32> to vector<12x1xf32>
    %77 = arith.cmpf oge, %73, %76 : vector<12x1xf32>
    %c12_i32_31 = arith.constant 12 : i32
    %78 = vector.broadcast %c12_i32_31 : i32 to vector<12x1xi32>
    %79 = arith.select %77, %40, %78 : vector<12x1xi1>, vector<12x1xi32>
    %cst_32 = arith.constant dense<2147483647> : vector<1xi32>
    %80 = vector.multi_reduction <minsi>, %79, %cst_32 [0] : vector<12x1xi32> to vector<1xi32>
    %81 = vector.shape_cast %80 : vector<1xi32> to vector<1x1xi32>
    %82 = vector.broadcast %81 : vector<1x1xi32> to vector<1x12xi32>
    %83 = arith.cmpi eq, %41, %82 : vector<1x12xi32>
    %84 = arith.extui %83 : vector<1x12xi1> to vector<1x12xi32>
    %85 = arith.sitofp %84 : vector<1x12xi32> to vector<1x12xf32>
    %86 = vector.broadcast %81 : vector<1x1xi32> to vector<12x1xi32>
    %87 = arith.cmpi eq, %40, %86 : vector<12x1xi32>
    %cst_33 = arith.constant -2.000000e+00 : f32
    %88 = vector.broadcast %cst_33 : f32 to vector<12x1xf32>
    %89 = arith.select %87, %88, %73 : vector<12x1xi1>, vector<12x1xf32>
    %cst_34 = arith.constant dense<0xFF800000> : vector<1xf32>
    %90 = vector.multi_reduction <maximumf>, %89, %cst_34 [0] : vector<12x1xf32> to vector<1xf32>
    %91 = vector.shape_cast %90 : vector<1xf32> to vector<1x1xf32>
    %92 = vector.broadcast %91 : vector<1x1xf32> to vector<12x1xf32>
    %93 = arith.cmpf oge, %89, %92 : vector<12x1xf32>
    %c12_i32_35 = arith.constant 12 : i32
    %94 = vector.broadcast %c12_i32_35 : i32 to vector<12x1xi32>
    %95 = arith.select %93, %40, %94 : vector<12x1xi1>, vector<12x1xi32>
    %cst_36 = arith.constant dense<2147483647> : vector<1xi32>
    %96 = vector.multi_reduction <minsi>, %95, %cst_36 [0] : vector<12x1xi32> to vector<1xi32>
    %97 = vector.shape_cast %96 : vector<1xi32> to vector<1x1xi32>
    %98 = vector.broadcast %97 : vector<1x1xi32> to vector<1x12xi32>
    %99 = arith.cmpi eq, %41, %98 : vector<1x12xi32>
    %100 = arith.extui %99 : vector<1x12xi1> to vector<1x12xi32>
    %101 = arith.sitofp %100 : vector<1x12xi32> to vector<1x12xf32>
    %102 = vector.broadcast %97 : vector<1x1xi32> to vector<12x1xi32>
    %103 = arith.cmpi eq, %40, %102 : vector<12x1xi32>
    %cst_37 = arith.constant -2.000000e+00 : f32
    %104 = vector.broadcast %cst_37 : f32 to vector<12x1xf32>
    %105 = arith.select %103, %104, %89 : vector<12x1xi1>, vector<12x1xf32>
    %cst_38 = arith.constant dense<0xFF800000> : vector<1xf32>
    %106 = vector.multi_reduction <maximumf>, %105, %cst_38 [0] : vector<12x1xf32> to vector<1xf32>
    %107 = vector.shape_cast %106 : vector<1xf32> to vector<1x1xf32>
    %108 = vector.broadcast %107 : vector<1x1xf32> to vector<12x1xf32>
    %109 = arith.cmpf oge, %105, %108 : vector<12x1xf32>
    %c12_i32_39 = arith.constant 12 : i32
    %110 = vector.broadcast %c12_i32_39 : i32 to vector<12x1xi32>
    %111 = arith.select %109, %40, %110 : vector<12x1xi1>, vector<12x1xi32>
    %cst_40 = arith.constant dense<2147483647> : vector<1xi32>
    %112 = vector.multi_reduction <minsi>, %111, %cst_40 [0] : vector<12x1xi32> to vector<1xi32>
    %113 = vector.shape_cast %112 : vector<1xi32> to vector<1x1xi32>
    %114 = vector.broadcast %113 : vector<1x1xi32> to vector<1x12xi32>
    %115 = arith.cmpi eq, %41, %114 : vector<1x12xi32>
    %116 = arith.extui %115 : vector<1x12xi1> to vector<1x12xi32>
    %117 = arith.sitofp %116 : vector<1x12xi32> to vector<1x12xf32>
    %118 = vector.broadcast %113 : vector<1x1xi32> to vector<12x1xi32>
    %119 = arith.cmpi eq, %40, %118 : vector<12x1xi32>
    %cst_41 = arith.constant -2.000000e+00 : f32
    %120 = vector.broadcast %cst_41 : f32 to vector<12x1xf32>
    %121 = arith.select %119, %120, %105 : vector<12x1xi1>, vector<12x1xf32>
    %cst_42 = arith.constant dense<0xFF800000> : vector<1xf32>
    %122 = vector.multi_reduction <maximumf>, %121, %cst_42 [0] : vector<12x1xf32> to vector<1xf32>
    %123 = vector.shape_cast %122 : vector<1xf32> to vector<1x1xf32>
    %124 = vector.broadcast %123 : vector<1x1xf32> to vector<12x1xf32>
    %125 = arith.cmpf oge, %121, %124 : vector<12x1xf32>
    %c12_i32_43 = arith.constant 12 : i32
    %126 = vector.broadcast %c12_i32_43 : i32 to vector<12x1xi32>
    %127 = arith.select %125, %40, %126 : vector<12x1xi1>, vector<12x1xi32>
    %cst_44 = arith.constant dense<2147483647> : vector<1xi32>
    %128 = vector.multi_reduction <minsi>, %127, %cst_44 [0] : vector<12x1xi32> to vector<1xi32>
    %129 = vector.shape_cast %128 : vector<1xi32> to vector<1x1xi32>
    %130 = vector.broadcast %129 : vector<1x1xi32> to vector<1x12xi32>
    %131 = arith.cmpi eq, %41, %130 : vector<1x12xi32>
    %132 = arith.extui %131 : vector<1x12xi1> to vector<1x12xi32>
    %133 = arith.sitofp %132 : vector<1x12xi32> to vector<1x12xf32>
    %134 = tpu.concatenate %53, %69, %85, %101, %117, %133 in 0 : vector<1x12xf32>, vector<1x12xf32>, vector<1x12xf32>, vector<1x12xf32>, vector<1x12xf32>, vector<1x12xf32> -> vector<6x12xf32>
    %135 = vector.broadcast %39 : vector<12x1xf32> to vector<12x8xf32>
    %136 = arith.mulf %29, %135 : vector<12x8xf32>
    %cst_45 = arith.constant dense<0.000000e+00> : vector<6x8xf32>
    %137 = tpu.matmul %134, %136, %cst_45 {dimension_numbers = #tpu.dot_dimension_numbers<[1], [0], [0], [1], [0, 0, 1, 1], [], []>} : vector<6x12xf32>, vector<12x8xf32>, vector<6x8xf32> -> vector<6x8xf32>
    %cst_46 = arith.constant dense<0xFF800000> : vector<8xf32>
    %138 = vector.multi_reduction <maximumf>, %137, %cst_46 [0] : vector<6x8xf32> to vector<8xf32>
    %139 = vector.shape_cast %138 : vector<8xf32> to vector<1x8xf32>
    %cst_47 = arith.constant dense<0.000000e+00> : vector<8xf32>
    %140 = vector.multi_reduction <add>, %137, %cst_47 [0] : vector<6x8xf32> to vector<8xf32>
    %141 = vector.shape_cast %140 : vector<8xf32> to vector<1x8xf32>
    %cst_48 = arith.constant 6.000000e+00 : f32
    %142 = vector.broadcast %cst_48 : f32 to vector<1x8xf32>
    %143 = arith.divf %141, %142 : vector<1x8xf32>
    %cst_49 = arith.constant dense<0.000000e+00> : vector<6x12xf32>
    %144 = tpu.matmul %134, %1, %cst_49 {dimension_numbers = #tpu.dot_dimension_numbers<[1], [0], [0], [1], [0, 0, 1, 1], [], []>} : vector<6x12xf32>, vector<12x12xf32>, vector<6x12xf32> -> vector<6x12xf32>
    %cst_50 = arith.constant dense<0.000000e+00> : vector<6x6xf32>
    %145 = tpu.matmul %144, %134, %cst_50 {dimension_numbers = #tpu.dot_dimension_numbers<[1], [1], [0], [0], [0, 0, 1, 0], [], []>} : vector<6x12xf32>, vector<6x12xf32>, vector<6x6xf32> -> vector<6x6xf32>
    %cst_51 = arith.constant dense<0.000000e+00> : vector<6x12xf32>
    %146 = tpu.matmul %134, %3, %cst_51 {dimension_numbers = #tpu.dot_dimension_numbers<[1], [0], [0], [1], [0, 0, 1, 1], [], []>} : vector<6x12xf32>, vector<12x12xf32>, vector<6x12xf32> -> vector<6x12xf32>
    %cst_52 = arith.constant dense<0.000000e+00> : vector<6x6xf32>
    %147 = tpu.matmul %146, %134, %cst_52 {dimension_numbers = #tpu.dot_dimension_numbers<[1], [1], [0], [0], [0, 0, 1, 0], [], []>} : vector<6x12xf32>, vector<6x12xf32>, vector<6x6xf32> -> vector<6x6xf32>
    %c0_53 = arith.constant 0 : index
    %c0_54 = arith.constant 0 : index
    %148 = vector.load %arg5[%c0_53, %c0_54] : memref<8x8xf32, #tpu.memory_space<vmem>>, vector<8x8xf32>
    %149 = vector.extract_strided_slice %4 {offsets = [1, 0], sizes = [1, 8], strides = [1, 1]} : vector<3x8xf32> to vector<1x8xf32>
    %cst_55 = arith.constant dense<0.000000e+00> : vector<6xf32>
    %150 = vector.multi_reduction <add>, %145, %cst_55 [1] : vector<6x6xf32> to vector<6xf32>
    %151 = vector.shape_cast %150 : vector<6xf32> to vector<6x1xf32>
    %cst_56 = arith.constant 1.000000e+00 : f32
    %152 = vector.broadcast %cst_56 : f32 to vector<6x1xf32>
    %153 = arith.addf %151, %152 : vector<6x1xf32>
    %154 = math.rsqrt %153 : vector<6x1xf32>
    %cst_57 = arith.constant dense<0.000000e+00> : vector<6x8xf32>
    %155 = tpu.matmul %137, %148, %cst_57 {dimension_numbers = #tpu.dot_dimension_numbers<[1], [0], [0], [1], [0, 0, 1, 1], [], []>} : vector<6x8xf32>, vector<8x8xf32>, vector<6x8xf32> -> vector<6x8xf32>
    %156 = vector.broadcast %154 : vector<6x1xf32> to vector<6x8xf32>
    %157 = arith.mulf %156, %155 : vector<6x8xf32>
    %cst_58 = arith.constant dense<0.000000e+00> : vector<6x8xf32>
    %158 = tpu.matmul %145, %157, %cst_58 {dimension_numbers = #tpu.dot_dimension_numbers<[1], [0], [0], [1], [0, 0, 1, 1], [], []>} : vector<6x6xf32>, vector<6x8xf32>, vector<6x8xf32> -> vector<6x8xf32>
    %159 = vector.broadcast %154 : vector<6x1xf32> to vector<6x8xf32>
    %160 = arith.mulf %159, %158 : vector<6x8xf32>
    %161 = arith.mulf %154, %154 : vector<6x1xf32>
    %162 = vector.broadcast %161 : vector<6x1xf32> to vector<6x8xf32>
    %163 = arith.mulf %162, %155 : vector<6x8xf32>
    %164 = arith.addf %160, %163 : vector<6x8xf32>
    %165 = vector.broadcast %149 : vector<1x8xf32> to vector<6x8xf32>
    %166 = arith.addf %164, %165 : vector<6x8xf32>
    %cst_59 = arith.constant 0.000000e+00 : f32
    %167 = vector.broadcast %cst_59 : f32 to vector<6x8xf32>
    %168 = arith.maximumf %166, %167 : vector<6x8xf32>
    %169 = vector.extract_strided_slice %5 {offsets = [0, 2], sizes = [8, 1], strides = [1, 1]} : vector<8x6xf32> to vector<8x1xf32>
    %170 = vector.extract_strided_slice %5 {offsets = [0, 3], sizes = [8, 1], strides = [1, 1]} : vector<8x6xf32> to vector<8x1xf32>
    %171 = vector.extract_strided_slice %6 {offsets = [0, 1], sizes = [1, 1], strides = [1, 1]} : vector<1x3xf32> to vector<1x1xf32>
    %cst_60 = arith.constant dense<0.000000e+00> : vector<6x1xf32>
    %172 = tpu.matmul %168, %169, %cst_60 {dimension_numbers = #tpu.dot_dimension_numbers<[1], [0], [0], [1], [0, 0, 1, 1], [], []>} : vector<6x8xf32>, vector<8x1xf32>, vector<6x1xf32> -> vector<6x1xf32>
    %cst_61 = arith.constant dense<0.000000e+00> : vector<6x1xf32>
    %173 = tpu.matmul %147, %172, %cst_61 {dimension_numbers = #tpu.dot_dimension_numbers<[1], [0], [0], [1], [0, 0, 1, 1], [], []>} : vector<6x6xf32>, vector<6x1xf32>, vector<6x1xf32> -> vector<6x1xf32>
    %cst_62 = arith.constant dense<0.000000e+00> : vector<6x1xf32>
    %174 = tpu.matmul %168, %170, %cst_62 {dimension_numbers = #tpu.dot_dimension_numbers<[1], [0], [0], [1], [0, 0, 1, 1], [], []>} : vector<6x8xf32>, vector<8x1xf32>, vector<6x1xf32> -> vector<6x1xf32>
    %175 = arith.addf %173, %174 : vector<6x1xf32>
    %176 = vector.broadcast %171 : vector<1x1xf32> to vector<6x1xf32>
    %177 = arith.addf %175, %176 : vector<6x1xf32>
    %178 = math.tanh %177 : vector<6x1xf32>
    %179 = tpu.iota {dimensions = array<i32: 0>} : vector<6x1xi32>
    %180 = tpu.iota {dimensions = array<i32: 1>} : vector<1x6xi32>
    %cst_63 = arith.constant dense<0xFF800000> : vector<1xf32>
    %181 = vector.multi_reduction <maximumf>, %178, %cst_63 [0] : vector<6x1xf32> to vector<1xf32>
    %182 = vector.shape_cast %181 : vector<1xf32> to vector<1x1xf32>
    %183 = vector.broadcast %182 : vector<1x1xf32> to vector<6x1xf32>
    %184 = arith.cmpf oge, %178, %183 : vector<6x1xf32>
    %c6_i32 = arith.constant 6 : i32
    %185 = vector.broadcast %c6_i32 : i32 to vector<6x1xi32>
    %186 = arith.select %184, %179, %185 : vector<6x1xi1>, vector<6x1xi32>
    %cst_64 = arith.constant dense<2147483647> : vector<1xi32>
    %187 = vector.multi_reduction <minsi>, %186, %cst_64 [0] : vector<6x1xi32> to vector<1xi32>
    %188 = vector.shape_cast %187 : vector<1xi32> to vector<1x1xi32>
    %189 = vector.broadcast %188 : vector<1x1xi32> to vector<1x6xi32>
    %190 = arith.cmpi eq, %180, %189 : vector<1x6xi32>
    %191 = arith.extui %190 : vector<1x6xi1> to vector<1x6xi32>
    %192 = arith.sitofp %191 : vector<1x6xi32> to vector<1x6xf32>
    %193 = vector.broadcast %188 : vector<1x1xi32> to vector<6x1xi32>
    %194 = arith.cmpi eq, %179, %193 : vector<6x1xi32>
    %cst_65 = arith.constant -2.000000e+00 : f32
    %195 = vector.broadcast %cst_65 : f32 to vector<6x1xf32>
    %196 = arith.select %194, %195, %178 : vector<6x1xi1>, vector<6x1xf32>
    %cst_66 = arith.constant dense<0xFF800000> : vector<1xf32>
    %197 = vector.multi_reduction <maximumf>, %196, %cst_66 [0] : vector<6x1xf32> to vector<1xf32>
    %198 = vector.shape_cast %197 : vector<1xf32> to vector<1x1xf32>
    %199 = vector.broadcast %198 : vector<1x1xf32> to vector<6x1xf32>
    %200 = arith.cmpf oge, %196, %199 : vector<6x1xf32>
    %c6_i32_67 = arith.constant 6 : i32
    %201 = vector.broadcast %c6_i32_67 : i32 to vector<6x1xi32>
    %202 = arith.select %200, %179, %201 : vector<6x1xi1>, vector<6x1xi32>
    %cst_68 = arith.constant dense<2147483647> : vector<1xi32>
    %203 = vector.multi_reduction <minsi>, %202, %cst_68 [0] : vector<6x1xi32> to vector<1xi32>
    %204 = vector.shape_cast %203 : vector<1xi32> to vector<1x1xi32>
    %205 = vector.broadcast %204 : vector<1x1xi32> to vector<1x6xi32>
    %206 = arith.cmpi eq, %180, %205 : vector<1x6xi32>
    %207 = arith.extui %206 : vector<1x6xi1> to vector<1x6xi32>
    %208 = arith.sitofp %207 : vector<1x6xi32> to vector<1x6xf32>
    %209 = vector.broadcast %204 : vector<1x1xi32> to vector<6x1xi32>
    %210 = arith.cmpi eq, %179, %209 : vector<6x1xi32>
    %cst_69 = arith.constant -2.000000e+00 : f32
    %211 = vector.broadcast %cst_69 : f32 to vector<6x1xf32>
    %212 = arith.select %210, %211, %196 : vector<6x1xi1>, vector<6x1xf32>
    %cst_70 = arith.constant dense<0xFF800000> : vector<1xf32>
    %213 = vector.multi_reduction <maximumf>, %212, %cst_70 [0] : vector<6x1xf32> to vector<1xf32>
    %214 = vector.shape_cast %213 : vector<1xf32> to vector<1x1xf32>
    %215 = vector.broadcast %214 : vector<1x1xf32> to vector<6x1xf32>
    %216 = arith.cmpf oge, %212, %215 : vector<6x1xf32>
    %c6_i32_71 = arith.constant 6 : i32
    %217 = vector.broadcast %c6_i32_71 : i32 to vector<6x1xi32>
    %218 = arith.select %216, %179, %217 : vector<6x1xi1>, vector<6x1xi32>
    %cst_72 = arith.constant dense<2147483647> : vector<1xi32>
    %219 = vector.multi_reduction <minsi>, %218, %cst_72 [0] : vector<6x1xi32> to vector<1xi32>
    %220 = vector.shape_cast %219 : vector<1xi32> to vector<1x1xi32>
    %221 = vector.broadcast %220 : vector<1x1xi32> to vector<1x6xi32>
    %222 = arith.cmpi eq, %180, %221 : vector<1x6xi32>
    %223 = arith.extui %222 : vector<1x6xi1> to vector<1x6xi32>
    %224 = arith.sitofp %223 : vector<1x6xi32> to vector<1x6xf32>
    %225 = tpu.concatenate %192, %208, %224 in 0 : vector<1x6xf32>, vector<1x6xf32>, vector<1x6xf32> -> vector<3x6xf32>
    %226 = vector.broadcast %178 : vector<6x1xf32> to vector<6x8xf32>
    %227 = arith.mulf %168, %226 : vector<6x8xf32>
    %cst_73 = arith.constant dense<0.000000e+00> : vector<3x8xf32>
    %228 = tpu.matmul %225, %227, %cst_73 {dimension_numbers = #tpu.dot_dimension_numbers<[1], [0], [0], [1], [0, 0, 1, 1], [], []>} : vector<3x6xf32>, vector<6x8xf32>, vector<3x8xf32> -> vector<3x8xf32>
    %cst_74 = arith.constant dense<0xFF800000> : vector<8xf32>
    %229 = vector.multi_reduction <maximumf>, %228, %cst_74 [0] : vector<3x8xf32> to vector<8xf32>
    %230 = vector.shape_cast %229 : vector<8xf32> to vector<1x8xf32>
    %cst_75 = arith.constant dense<0.000000e+00> : vector<8xf32>
    %231 = vector.multi_reduction <add>, %228, %cst_75 [0] : vector<3x8xf32> to vector<8xf32>
    %232 = vector.shape_cast %231 : vector<8xf32> to vector<1x8xf32>
    %cst_76 = arith.constant 3.000000e+00 : f32
    %233 = vector.broadcast %cst_76 : f32 to vector<1x8xf32>
    %234 = arith.divf %232, %233 : vector<1x8xf32>
    %cst_77 = arith.constant dense<0.000000e+00> : vector<3x6xf32>
    %235 = tpu.matmul %225, %145, %cst_77 {dimension_numbers = #tpu.dot_dimension_numbers<[1], [0], [0], [1], [0, 0, 1, 1], [], []>} : vector<3x6xf32>, vector<6x6xf32>, vector<3x6xf32> -> vector<3x6xf32>
    %cst_78 = arith.constant dense<0.000000e+00> : vector<3x3xf32>
    %236 = tpu.matmul %235, %225, %cst_78 {dimension_numbers = #tpu.dot_dimension_numbers<[1], [1], [0], [0], [0, 0, 1, 0], [], []>} : vector<3x6xf32>, vector<3x6xf32>, vector<3x3xf32> -> vector<3x3xf32>
    %cst_79 = arith.constant dense<0.000000e+00> : vector<3x6xf32>
    %237 = tpu.matmul %225, %147, %cst_79 {dimension_numbers = #tpu.dot_dimension_numbers<[1], [0], [0], [1], [0, 0, 1, 1], [], []>} : vector<3x6xf32>, vector<6x6xf32>, vector<3x6xf32> -> vector<3x6xf32>
    %cst_80 = arith.constant dense<0.000000e+00> : vector<3x3xf32>
    %238 = tpu.matmul %237, %225, %cst_80 {dimension_numbers = #tpu.dot_dimension_numbers<[1], [1], [0], [0], [0, 0, 1, 0], [], []>} : vector<3x6xf32>, vector<3x6xf32>, vector<3x3xf32> -> vector<3x3xf32>
    %c0_81 = arith.constant 0 : index
    %c0_82 = arith.constant 0 : index
    %239 = vector.load %arg6[%c0_81, %c0_82] : memref<8x8xf32, #tpu.memory_space<vmem>>, vector<8x8xf32>
    %240 = vector.extract_strided_slice %4 {offsets = [2, 0], sizes = [1, 8], strides = [1, 1]} : vector<3x8xf32> to vector<1x8xf32>
    %cst_83 = arith.constant dense<0.000000e+00> : vector<3xf32>
    %241 = vector.multi_reduction <add>, %236, %cst_83 [1] : vector<3x3xf32> to vector<3xf32>
    %242 = vector.shape_cast %241 : vector<3xf32> to vector<3x1xf32>
    %cst_84 = arith.constant 1.000000e+00 : f32
    %243 = vector.broadcast %cst_84 : f32 to vector<3x1xf32>
    %244 = arith.addf %242, %243 : vector<3x1xf32>
    %245 = math.rsqrt %244 : vector<3x1xf32>
    %cst_85 = arith.constant dense<0.000000e+00> : vector<3x8xf32>
    %246 = tpu.matmul %228, %239, %cst_85 {dimension_numbers = #tpu.dot_dimension_numbers<[1], [0], [0], [1], [0, 0, 1, 1], [], []>} : vector<3x8xf32>, vector<8x8xf32>, vector<3x8xf32> -> vector<3x8xf32>
    %247 = vector.broadcast %245 : vector<3x1xf32> to vector<3x8xf32>
    %248 = arith.mulf %247, %246 : vector<3x8xf32>
    %cst_86 = arith.constant dense<0.000000e+00> : vector<3x8xf32>
    %249 = tpu.matmul %236, %248, %cst_86 {dimension_numbers = #tpu.dot_dimension_numbers<[1], [0], [0], [1], [0, 0, 1, 1], [], []>} : vector<3x3xf32>, vector<3x8xf32>, vector<3x8xf32> -> vector<3x8xf32>
    %250 = vector.broadcast %245 : vector<3x1xf32> to vector<3x8xf32>
    %251 = arith.mulf %250, %249 : vector<3x8xf32>
    %252 = arith.mulf %245, %245 : vector<3x1xf32>
    %253 = vector.broadcast %252 : vector<3x1xf32> to vector<3x8xf32>
    %254 = arith.mulf %253, %246 : vector<3x8xf32>
    %255 = arith.addf %251, %254 : vector<3x8xf32>
    %256 = vector.broadcast %240 : vector<1x8xf32> to vector<3x8xf32>
    %257 = arith.addf %255, %256 : vector<3x8xf32>
    %cst_87 = arith.constant 0.000000e+00 : f32
    %258 = vector.broadcast %cst_87 : f32 to vector<3x8xf32>
    %259 = arith.maximumf %257, %258 : vector<3x8xf32>
    %260 = vector.extract_strided_slice %5 {offsets = [0, 4], sizes = [8, 1], strides = [1, 1]} : vector<8x6xf32> to vector<8x1xf32>
    %261 = vector.extract_strided_slice %5 {offsets = [0, 5], sizes = [8, 1], strides = [1, 1]} : vector<8x6xf32> to vector<8x1xf32>
    %262 = vector.extract_strided_slice %6 {offsets = [0, 2], sizes = [1, 1], strides = [1, 1]} : vector<1x3xf32> to vector<1x1xf32>
    %cst_88 = arith.constant dense<0.000000e+00> : vector<3x1xf32>
    %263 = tpu.matmul %259, %260, %cst_88 {dimension_numbers = #tpu.dot_dimension_numbers<[1], [0], [0], [1], [0, 0, 1, 1], [], []>} : vector<3x8xf32>, vector<8x1xf32>, vector<3x1xf32> -> vector<3x1xf32>
    %cst_89 = arith.constant dense<0.000000e+00> : vector<3x1xf32>
    %264 = tpu.matmul %238, %263, %cst_89 {dimension_numbers = #tpu.dot_dimension_numbers<[1], [0], [0], [1], [0, 0, 1, 1], [], []>} : vector<3x3xf32>, vector<3x1xf32>, vector<3x1xf32> -> vector<3x1xf32>
    %cst_90 = arith.constant dense<0.000000e+00> : vector<3x1xf32>
    %265 = tpu.matmul %259, %261, %cst_90 {dimension_numbers = #tpu.dot_dimension_numbers<[1], [0], [0], [1], [0, 0, 1, 1], [], []>} : vector<3x8xf32>, vector<8x1xf32>, vector<3x1xf32> -> vector<3x1xf32>
    %266 = arith.addf %264, %265 : vector<3x1xf32>
    %267 = vector.broadcast %262 : vector<1x1xf32> to vector<3x1xf32>
    %268 = arith.addf %266, %267 : vector<3x1xf32>
    %269 = math.tanh %268 : vector<3x1xf32>
    %270 = tpu.iota {dimensions = array<i32: 0>} : vector<3x1xi32>
    %271 = tpu.iota {dimensions = array<i32: 1>} : vector<1x3xi32>
    %cst_91 = arith.constant dense<0xFF800000> : vector<1xf32>
    %272 = vector.multi_reduction <maximumf>, %269, %cst_91 [0] : vector<3x1xf32> to vector<1xf32>
    %273 = vector.shape_cast %272 : vector<1xf32> to vector<1x1xf32>
    %274 = vector.broadcast %273 : vector<1x1xf32> to vector<3x1xf32>
    %275 = arith.cmpf oge, %269, %274 : vector<3x1xf32>
    %c3_i32 = arith.constant 3 : i32
    %276 = vector.broadcast %c3_i32 : i32 to vector<3x1xi32>
    %277 = arith.select %275, %270, %276 : vector<3x1xi1>, vector<3x1xi32>
    %cst_92 = arith.constant dense<2147483647> : vector<1xi32>
    %278 = vector.multi_reduction <minsi>, %277, %cst_92 [0] : vector<3x1xi32> to vector<1xi32>
    %279 = vector.shape_cast %278 : vector<1xi32> to vector<1x1xi32>
    %280 = vector.broadcast %279 : vector<1x1xi32> to vector<1x3xi32>
    %281 = arith.cmpi eq, %271, %280 : vector<1x3xi32>
    %282 = arith.extui %281 : vector<1x3xi1> to vector<1x3xi32>
    %283 = arith.sitofp %282 : vector<1x3xi32> to vector<1x3xf32>
    %284 = vector.broadcast %279 : vector<1x1xi32> to vector<3x1xi32>
    %285 = arith.cmpi eq, %270, %284 : vector<3x1xi32>
    %cst_93 = arith.constant -2.000000e+00 : f32
    %286 = vector.broadcast %cst_93 : f32 to vector<3x1xf32>
    %287 = arith.select %285, %286, %269 : vector<3x1xi1>, vector<3x1xf32>
    %cst_94 = arith.constant dense<0xFF800000> : vector<1xf32>
    %288 = vector.multi_reduction <maximumf>, %287, %cst_94 [0] : vector<3x1xf32> to vector<1xf32>
    %289 = vector.shape_cast %288 : vector<1xf32> to vector<1x1xf32>
    %290 = vector.broadcast %289 : vector<1x1xf32> to vector<3x1xf32>
    %291 = arith.cmpf oge, %287, %290 : vector<3x1xf32>
    %c3_i32_95 = arith.constant 3 : i32
    %292 = vector.broadcast %c3_i32_95 : i32 to vector<3x1xi32>
    %293 = arith.select %291, %270, %292 : vector<3x1xi1>, vector<3x1xi32>
    %cst_96 = arith.constant dense<2147483647> : vector<1xi32>
    %294 = vector.multi_reduction <minsi>, %293, %cst_96 [0] : vector<3x1xi32> to vector<1xi32>
    %295 = vector.shape_cast %294 : vector<1xi32> to vector<1x1xi32>
    %296 = vector.broadcast %295 : vector<1x1xi32> to vector<1x3xi32>
    %297 = arith.cmpi eq, %271, %296 : vector<1x3xi32>
    %298 = arith.extui %297 : vector<1x3xi1> to vector<1x3xi32>
    %299 = arith.sitofp %298 : vector<1x3xi32> to vector<1x3xf32>
    %300 = tpu.concatenate %283, %299 in 0 : vector<1x3xf32>, vector<1x3xf32> -> vector<2x3xf32>
    %301 = vector.broadcast %269 : vector<3x1xf32> to vector<3x8xf32>
    %302 = arith.mulf %259, %301 : vector<3x8xf32>
    %cst_97 = arith.constant dense<0.000000e+00> : vector<2x8xf32>
    %303 = tpu.matmul %300, %302, %cst_97 {dimension_numbers = #tpu.dot_dimension_numbers<[1], [0], [0], [1], [0, 0, 1, 1], [], []>} : vector<2x3xf32>, vector<3x8xf32>, vector<2x8xf32> -> vector<2x8xf32>
    %cst_98 = arith.constant dense<0xFF800000> : vector<8xf32>
    %304 = vector.multi_reduction <maximumf>, %303, %cst_98 [0] : vector<2x8xf32> to vector<8xf32>
    %305 = vector.shape_cast %304 : vector<8xf32> to vector<1x8xf32>
    %cst_99 = arith.constant dense<0.000000e+00> : vector<8xf32>
    %306 = vector.multi_reduction <add>, %303, %cst_99 [0] : vector<2x8xf32> to vector<8xf32>
    %307 = vector.shape_cast %306 : vector<8xf32> to vector<1x8xf32>
    %cst_100 = arith.constant 2.000000e+00 : f32
    %308 = vector.broadcast %cst_100 : f32 to vector<1x8xf32>
    %309 = arith.divf %307, %308 : vector<1x8xf32>
    %310 = tpu.concatenate %139, %143, %230, %234, %305, %309 in 1 : vector<1x8xf32>, vector<1x8xf32>, vector<1x8xf32>, vector<1x8xf32>, vector<1x8xf32>, vector<1x8xf32> -> vector<1x48xf32>
    %c0_101 = arith.constant 0 : index
    %c0_102 = arith.constant 0 : index
    %c0_103 = arith.constant 0 : index
    %311 = vector.load %arg10[%c0_101, %c0_102, %c0_103] : memref<1x1x48xf32, #tpu.memory_space<vmem>>, vector<1x1x48xf32>
    %312 = vector.shape_cast %311 : vector<1x1x48xf32> to vector<1x48xf32>
    %313 = vector.shape_cast %310 : vector<1x48xf32> to vector<1x1x48xf32>
    tpu.vector_store %arg10[%c0_101, %c0_102, %c0_103], %313 {strides = array<i32>} : memref<1x1x48xf32, #tpu.memory_space<vmem>>, vector<1x1x48xf32>,
    return
  }
  func.func @transform_0(%arg0: i32) -> (i32, i32, i32) {
    %c0_i32 = arith.constant 0 : i32
    %c0_i32_0 = arith.constant 0 : i32
    %c0_i32_1 = arith.constant 0 : i32
    return %arg0, %c0_i32, %c0_i32_0 : i32, i32, i32
  }
  func.func @transform_1(%arg0: i32) -> (i32, i32, i32) {
    %c0_i32 = arith.constant 0 : i32
    %c0_i32_0 = arith.constant 0 : i32
    %c0_i32_1 = arith.constant 0 : i32
    return %arg0, %c0_i32, %c0_i32_0 : i32, i32, i32
  }
  func.func @transform_2(%arg0: i32) -> (i32, i32, i32) {
    %c0_i32 = arith.constant 0 : i32
    %c0_i32_0 = arith.constant 0 : i32
    %c0_i32_1 = arith.constant 0 : i32
    return %arg0, %c0_i32, %c0_i32_0 : i32, i32, i32
  }
  func.func @transform_3(%arg0: i32) -> (i32, i32) {
    %c0_i32 = arith.constant 0 : i32
    %c0_i32_0 = arith.constant 0 : i32
    %c0_i32_1 = arith.constant 0 : i32
    return %c0_i32, %c0_i32_0 : i32, i32
  }
  func.func @transform_4(%arg0: i32) -> (i32, i32) {
    %c0_i32 = arith.constant 0 : i32
    %c0_i32_0 = arith.constant 0 : i32
    %c0_i32_1 = arith.constant 0 : i32
    return %c0_i32, %c0_i32_0 : i32, i32
  }
  func.func @transform_5(%arg0: i32) -> (i32, i32) {
    %c0_i32 = arith.constant 0 : i32
    %c0_i32_0 = arith.constant 0 : i32
    %c0_i32_1 = arith.constant 0 : i32
    return %c0_i32, %c0_i32_0 : i32, i32
  }
  func.func @transform_6(%arg0: i32) -> (i32, i32) {
    %c0_i32 = arith.constant 0 : i32
    %c0_i32_0 = arith.constant 0 : i32
    %c0_i32_1 = arith.constant 0 : i32
    return %c0_i32, %c0_i32_0 : i32, i32
  }
  func.func @transform_7(%arg0: i32) -> (i32, i32) {
    %c0_i32 = arith.constant 0 : i32
    %c0_i32_0 = arith.constant 0 : i32
    %c0_i32_1 = arith.constant 0 : i32
    return %c0_i32, %c0_i32_0 : i32, i32
  }
  func.func @transform_8(%arg0: i32) -> (i32, i32) {
    %c0_i32 = arith.constant 0 : i32
    %c0_i32_0 = arith.constant 0 : i32
    %c0_i32_1 = arith.constant 0 : i32
    return %c0_i32, %c0_i32_0 : i32, i32
  }
  func.func @transform_9(%arg0: i32) -> (i32, i32, i32) {
    %c0_i32 = arith.constant 0 : i32
    %c0_i32_0 = arith.constant 0 : i32
    %c0_i32_1 = arith.constant 0 : i32
    return %arg0, %c0_i32, %c0_i32_0 : i32, i32, i32
  }
}

</mosaic_0001>

<bundles_post_ra>
// kernel: net_se_graph_forward.3
= control target key start
LH: loop header
LB: loop body
LE: loop exit
PB: predicated region body
PF: predicated region fallthrough
CT: control target
= control target key end

     0   :  { %s2178_s0 = inlined_call_operand.vmem [shape: f32[4,48], index: 0, kind: input, shape index: {}]   ;;  %s2179_s1 = inlined_call_operand.vmem [shape: f32[6,6], index: 1, kind: input, shape index: {}]   ;;  %s2180_s2 = inlined_call_operand.vmem [shape: f32[6,48,16], index: 2, kind: input, shape index: {}]   ;;  %s2181_s3 = inlined_call_operand.vmem [shape: f32[48,16], index: 3, kind: input, shape index: {}]   ;;  %s2182_s4 = inlined_call_operand.vmem [shape: s32[6,1], index: 4, kind: input, shape index: {}]   ;;  %s2183_s5 = inlined_call_operand.vmem [shape: s32[1,6], index: 5, kind: input, shape index: {}]   ;;  %s2184_s6 = inlined_call_operand.vmem [shape: s32[12,1], index: 6, kind: input, shape index: {}]   ;;  %s2185_s7 = inlined_call_operand.vmem [shape: s32[12,1], index: 7, kind: input, shape index: {}]   ;;  %s2186_s8 = inlined_call_operand.vmem [shape: f32[48,16], index: 8, kind: input, shape index: {}]   ;;  %s2187_s9 = inlined_call_operand.vmem [shape: f32[1,16], index: 9, kind: input, shape index: {}]   ;;  %s2188_s10 = inlined_call_operand.vmem [shape: f32[16,16], index: 10, kind: input, shape index: {}]   ;;  %s2189_s11 = inlined_call_operand.vmem [shape: f32[1,16], index: 11, kind: input, shape index: {}]   ;;  %s2190_s12 = inlined_call_operand.vmem [shape: f32[16,16], index: 12, kind: input, shape index: {}]   ;;  %s2191_s13 = inlined_call_operand.vmem [shape: f32[1,16], index: 13, kind: input, shape index: {}]   ;;  %s2192_s14 = inlined_call_operand.hbm [shape: f32[1,1], index: 14, kind: output, shape index: {0}]   ;;  %s2193_s15 = inlined_call_operand.vmem [shape: f32[12,1], index: 15, kind: output, shape index: {1}]   ;;  %s2194_s16 = inlined_call_operand.hbm [shape: f32[6,16], index: 16, kind: output, shape index: {2}]  }
   0x1   :  { %2195 = sst [smem:[#allocation8_spill]] %s2178_s0 }
   0x2   :  { %22 = vsyncpa [#allocation3], 0  ;;  %v54_v0 = vld [vmem:[%s2182_s4] sm:$0x3f]  ;;  %v1745_v1 = vmov 0   ;;  %v1746_v2 = vmov 0.0  }
   0x3   :  { %1681 = vset.pattern.permute.xlu0 %v1745_v1  ;;  %1517 = vmatprep.subr.mxu0 %v1746_v2  ;;  %s2196_s25 = sld [smem:[#allocation8_spill]]  ;;  %vm74_vm0 = vcmask 1043456   ;;  %v159_v4 = vld [vmem:[%s2180_s2 + $0x28] sm:$0xff]  ;;  %v1858_v5 = vld [vmem:[%s2179_s1] sm:$0x3f]  ;;  %vm1747_vm1 = vmmov 0  }
   0x4   :  { %65 = vperm.xlu0 %1681, %v54_v0   ;;  %1519 = vmatprep.mubr.msk.f32.mxu0 %vm1747_vm1, %v1746_v2  ;;  %v158_v6 = vld [vmem:[%s2180_s2 + $0x20] sm:$0xff] }
   0x5   :  { %1522 = vmatprep.subr.mxu1 %v1746_v2 }
   0x9   :  { %v1848_v3 = vld [vmem:[%s2196_s25] sm:$0xf] }
   0xa   :  { %1518 = vmatpush3.msk.msra.mxu0 %vm74_vm0, %v1848_v3 }
   0xb   :  { %23 = vsyncpa [#allocation5], 0  ;;  %1537 = vmatprep.subr.mxu0 %v1746_v2  ;;  %1523 = vmatpush3.msra.mxu1 %v159_v4  ;;  %v157_v7 = vld [vmem:[%s2180_s2 + $0x18] sm:$0xff]  ;;  %v156_v8 = vld [vmem:[%s2180_s2 + $0x10] sm:$0xff]  ;;  %v60_v11 = vlaneseq  ;;  %vm70_vm2 = vcmask 31744   ;;  %v1748_v21 = vmov 1  }
   0xc   :  { %1524 = vmatprep.subr.mxu1 %v1746_v2  ;;  %1534 = vmatprep.mubr.msk.f32.mxu1 %vm1747_vm1, %v1746_v2  ;;  %v155_v9 = vld [vmem:[%s2180_s2 + $0x8] sm:$0xff]  ;;  %v154_v10 = vld [vmem:[%s2180_s2] sm:$0xff]  ;;  %v151_v17 = vld [vmem:[%s2181_s3 + $0x18] sm:$0xff]  ;;  %v1749_v22 = vmov 3   ;;  %v1750_v23 = vmov 2   ;;  %v1751_v24 = vmov 4  }
   0xd   :  { %236 = vperm.xlu0 %1681, %v1858_v5   ;;  %1525 = vmatpush3.msra.mxu1 %v158_v6  ;;  %v1889_v12 = vand.u32 127, %v60_v11  ;;  %v153_v14 = vld [vmem:[%s2181_s3 + $0x28] sm:$0xff]  ;;  %v152_v16 = vld [vmem:[%s2181_s3 + $0x20] sm:$0xff]  ;;  %v150_v18 = vld [vmem:[%s2181_s3 + $0x10] sm:$0xff]  ;;  %v1752_v25 = vmov 5   ;;  %vm160_vm4 = vcmask 392192  }
   0xe   :  { %1526 = vmatprep.subr.mxu1 %v1746_v2  ;;  %v149_v19 = vld [vmem:[%s2181_s3 + $0x8] sm:$0xff]  ;;  %v148_v20 = vld [vmem:[%s2181_s3] sm:$0xff]  ;;  %1682 = vset.pattern.permute.xlu1 %v1748_v21  ;;  %v1391_v26 = vld [vmem:[%s2180_s2 + $0x58] sm:$0xff]  ;;  %vm736_vm6 = vcmask 1045504   ;;  %vm732_vm7 = vcmask 48128   ;;  %vm1095_vm12 = vcmask 130048  }
   0xf   :  { %1527 = vmatpush3.msra.mxu1 %v157_v7  ;;  %388 = vperm.xlu1 %1682, %v1858_v5   ;;  %v1398_v27 = vld [vmem:[%s2180_s2 + $0x88] sm:$0xff]  ;;  %v1390_v29 = vld [vmem:[%s2180_s2 + $0x50] sm:$0xff]  ;;  %v1397_v30 = vld [vmem:[%s2180_s2 + $0x80] sm:$0xff]  ;;  %vm1280_vm13 = vcmask 128000   ;;  %vm1272_vm14 = vcmask 125952  }
  0x10   :  { %1528 = vmatprep.subr.mxu1 %v1746_v2  ;;  %v1389_v32 = vld [vmem:[%s2180_s2 + $0x48] sm:$0xff]  ;;  %v1396_v33 = vld [vmem:[%s2180_s2 + $0x78] sm:$0xff]  ;;  %v1388_v34 = vld [vmem:[%s2180_s2 + $0x40] sm:$0xff] }
  0x11   :  { %1529 = vmatpush3.msra.mxu1 %v156_v8  ;;  %1684 = vset.pattern.permute.xlu0 %v1749_v22  ;;  %v1395_v35 = vld [vmem:[%s2180_s2 + $0x70] sm:$0xff]  ;;  %v1387_v36 = vld [vmem:[%s2180_s2 + $0x38] sm:$0xff]  ;;  %v1394_v37 = vld [vmem:[%s2180_s2 + $0x68] sm:$0xff] }
  0x12   :  { %1530 = vmatprep.subr.mxu1 %v1746_v2  ;;  %554 = vperm.xlu0 %1684, %v1858_v5   ;;  %v1386_v38 = vld [vmem:[%s2180_s2 + $0x30] sm:$0xff]  ;;  %v1393_v39 = vld [vmem:[%s2180_s2 + $0x60] sm:$0xff]  ;;  %v1405_v40 = vld [vmem:[%s2180_s2 + $0xb8] sm:$0xff] }
  0x13   :  { %1531 = vmatpush3.msra.mxu1 %v155_v9  ;;  %1683 = vset.pattern.permute.xlu1 %v1750_v23  ;;  %v1412_v41 = vld [vmem:[%s2180_s2 + $0xe8] sm:$0xff]  ;;  %v1404_v42 = vld [vmem:[%s2180_s2 + $0xb0] sm:$0xff]  ;;  %v1411_v43 = vld [vmem:[%s2180_s2 + $0xe0] sm:$0xff] }
  0x14   :  { %1532 = vmatprep.subr.mxu1 %v1746_v2  ;;  %471 = vperm.xlu1 %1683, %v1858_v5   ;;  %v1403_v44 = vld [vmem:[%s2180_s2 + $0xa8] sm:$0xff]  ;;  %v1410_v45 = vld [vmem:[%s2180_s2 + $0xd8] sm:$0xff]  ;;  %v1402_v46 = vld [vmem:[%s2180_s2 + $0xa0] sm:$0xff] }
  0x15   :  { %1533 = vmatpush3.msra.mxu1 %v154_v10  ;;  %v1409_v47 = vld [vmem:[%s2180_s2 + $0xd0] sm:$0xff]  ;;  %v1401_v48 = vld [vmem:[%s2180_s2 + $0x98] sm:$0xff]  ;;  %v1408_v49 = vld [vmem:[%s2180_s2 + $0xc8] sm:$0xff] }
  0x16   :  { %1552 = vmatprep.subr.mxu1 %v1746_v2  ;;  %1687 = vset.pattern.permute.xlu0 %v1745_v1  ;;  %v1400_v50 = vld [vmem:[%s2180_s2 + $0x90] sm:$0xff]  ;;  %v1407_v51 = vld [vmem:[%s2180_s2 + $0xc0] sm:$0xff]  ;;  %v1419_v52 = vld [vmem:[%s2180_s2 + $0x118] sm:$0xff] }
  0x17   :  { %v1418_v53 = vld [vmem:[%s2180_s2 + $0x110] sm:$0xff]  ;;  %v1417_v54 = vld [vmem:[%s2180_s2 + $0x108] sm:$0xff]  ;;  %v1416_v55 = vld [vmem:[%s2180_s2 + $0x100] sm:$0xff] }
  0x18   :  { %1685 = vset.pattern.permute.xlu1 %v1751_v24  ;;  %v1415_v56 = vld [vmem:[%s2180_s2 + $0xf8] sm:$0xff]  ;;  %v1414_v57 = vld [vmem:[%s2180_s2 + $0xf0] sm:$0xff]  ;;  %v57_v58 = vld [vmem:[%s2184_s6 + $0x8] sm:$0xf] }
  0x19   :  { %637 = vperm.xlu1 %1685, %v1858_v5   ;;  %v56_v59 = vld [vmem:[%s2184_s6] sm:$0xff]  ;;  %v59_v61 = vld [vmem:[%s2185_s7 + $0x8] sm:$0xf] }
  0x1a   :  { %898 = vperm.xlu0 %1687, %v56_v59   ;;  %v58_v60 = vld [vmem:[%s2185_s7] sm:$0xff] }
  0x1d   :  { %1686 = vset.pattern.permute.xlu1 %v1752_v25 }
  0x1e   :  { %720 = vperm.xlu1 %1686, %v1858_v5   ;;  %913 = vperm.xlu0 %1687, %v59_v61  }
  0x22   :  { %1688 = vset.pattern.permute.xlu1 %v1745_v1 }
  0x23   :  { %901 = vperm.xlu1 %1688, %v57_v58   ;;  %v1178_v58 = vld [vmem:[%s2190_s12 + $0x8] sm:$0xff] }
  0x27   :  { %910 = vperm.xlu1 %1688, %v58_v60  }
  0x7f   :  { %v66_v13 = vpop.permute.xlu0 %65 }
  0x80   :  { %vm67_vm3 = vcmp.eq.s32.totalorder %v66_v13, %v1889_v12 }
  0x81   :  { %v1381_v15 = vsel %vm67_vm3, 1.0, %v1746_v2 }
  0x82   :  { %1520 = vmatmul.mubr.msk.f32.vlgmr.msra.gmra.mxu0 %vm70_vm2, %v1381_v15 }
  0x83   :  { %1538 = vmatpush3.msra.mxu0 %v153_v14  ;;  %1549 = vmatprep.mubr.msk.f32.mxu0 %vm1747_vm1, %v1746_v2 }
  0x84   :  { %1539 = vmatprep.subr.mxu0 %v1746_v2 }
  0x85   :  { %1540 = vmatpush3.msra.mxu0 %v152_v16 }
  0x86   :  { %1541 = vmatprep.subr.mxu0 %v1746_v2 }
  0x87   :  { %1542 = vmatpush3.msra.mxu0 %v151_v17 }
  0x88   :  { %1543 = vmatprep.subr.mxu0 %v1746_v2  ;;  %v237_v8 = vpop.permute.xlu0 %236 }
  0x89   :  { %1544 = vmatpush3.msra.mxu0 %v150_v18 }
  0x8a   :  { %1545 = vmatprep.subr.mxu0 %v1746_v2  ;;  %v389_v9 = vpop.permute.xlu1 %388 }
  0x8b   :  { %1546 = vmatpush3.msra.mxu0 %v149_v19 }
  0x8c   :  { %1547 = vmatprep.subr.mxu0 %v1746_v2 }
  0x8d   :  { %1548 = vmatpush3.msra.mxu0 %v148_v20  ;;  %v555_v20 = vpop.permute.xlu0 %554 }
  0x8e   :  { %1567 = vmatprep.subr.mxu0 %v1746_v2 }
  0x8f   :  { %v472_v19 = vpop.permute.xlu1 %471 }
  0x94   :  { %v638_v24 = vpop.permute.xlu1 %637 }
 0x142   :  { %v1933_v28 = vpop.f32.mrf.mxu0 }
 0x143   :  { %1535 = vmatmul.mubr.msk.f32.vlgmr.msra.gmra.mxu1 %vm160_vm4, %v1933_v28  ;;  %1550 = vmatmul.mubr.msk.f32.vlgmr.msra.gmra.mxu0 %vm160_vm4, %v1933_v28 }
 0x144   :  { %1553 = vmatpush3.msra.mxu1 %v1391_v26  ;;  %1568 = vmatpush3.msra.mxu0 %v1398_v27  ;;  %v1521_v31 = vpop.f32.mrf.mxu0  ;;  %v2087_v26 = vshrl.u32 %v60_v11, 7  ;;  %v815_v11 = vld [vmem:[%s2186_s8 + $0x28] sm:$0xff] }
 0x145   :  { %1554 = vmatprep.subr.mxu1 %v1746_v2  ;;  %1569 = vmatprep.subr.mxu0 %v1746_v2 }
 0x146   :  { %1555 = vmatpush3.msra.mxu1 %v1390_v29  ;;  %1570 = vmatpush3.msra.mxu0 %v1397_v30  ;;  %v721_v29 = vpop.permute.xlu1 %720 }
 0x147   :  { %1556 = vmatprep.subr.mxu1 %v1746_v2  ;;  %1571 = vmatprep.subr.mxu0 %v1746_v2 }
 0x148   :  { %1557 = vmatpush3.msra.mxu1 %v1389_v32  ;;  %1572 = vmatpush3.msra.mxu0 %v1396_v33 }
 0x149   :  { %1558 = vmatprep.subr.mxu1 %v1746_v2  ;;  %1573 = vmatprep.subr.mxu0 %v1746_v2 }
 0x14a   :  { %1559 = vmatpush3.msra.mxu1 %v1388_v34  ;;  %1574 = vmatpush3.msra.mxu0 %v1395_v35 }
 0x14b   :  { %1560 = vmatprep.subr.mxu1 %v1746_v2  ;;  %1575 = vmatprep.subr.mxu0 %v1746_v2 }
 0x14c   :  { %1561 = vmatpush3.msra.mxu1 %v1387_v36  ;;  %1576 = vmatpush3.msra.mxu0 %v1394_v37  ;;  %v814_v37 = vld [vmem:[%s2186_s8 + $0x20] sm:$0xff] }
 0x14d   :  { %1562 = vmatprep.subr.mxu1 %v1746_v2  ;;  %1577 = vmatprep.subr.mxu0 %v1746_v2 }
 0x14e   :  { %1563 = vmatpush3.msra.mxu1 %v1386_v38  ;;  %1564 = vmatprep.mubr.msk.f32.mxu1 %vm1747_vm1, %v1746_v2  ;;  %v813_v38 = vld [vmem:[%s2186_s8 + $0x18] sm:$0xff] }
 0x14f   :  { %1578 = vmatpush3.msra.mxu0 %v1393_v39  ;;  %1579 = vmatprep.mubr.msk.f32.mxu0 %vm1747_vm1, %v1746_v2  ;;  %v812_v39 = vld [vmem:[%s2186_s8 + $0x10] sm:$0xff] }
 0x150   :  { %1565 = vmatmul.mubr.msk.f32.vlgmr.msra.gmra.mxu1 %vm160_vm4, %v1933_v28  ;;  %1580 = vmatmul.mubr.msk.f32.vlgmr.msra.gmra.mxu0 %vm160_vm4, %v1933_v28 }
 0x151   :  { %1582 = vmatprep.subr.mxu1 %v1746_v2  ;;  %1597 = vmatprep.subr.mxu0 %v1746_v2 }
 0x152   :  { %1583 = vmatpush3.msra.mxu1 %v1405_v40  ;;  %1598 = vmatpush3.msra.mxu0 %v1412_v41  ;;  %v811_v40 = vld [vmem:[%s2186_s8 + $0x8] sm:$0xff]  ;;  %v810_v41 = vld [vmem:[%s2186_s8] sm:$0xff] }
 0x153   :  { %1584 = vmatprep.subr.mxu1 %v1746_v2  ;;  %1599 = vmatprep.subr.mxu0 %v1746_v2 }
 0x154   :  { %1585 = vmatpush3.msra.mxu1 %v1404_v42  ;;  %1600 = vmatpush3.msra.mxu0 %v1411_v43  ;;  %v899_v42 = vpop.permute.xlu0 %898 }
 0x155   :  { %1586 = vmatprep.subr.mxu1 %v1746_v2  ;;  %1601 = vmatprep.subr.mxu0 %v1746_v2  ;;  %vm903_vm8 = vcmp.eq.s32.totalorder %v899_v42, %v1889_v12 }
 0x156   :  { %1587 = vmatpush3.msra.mxu1 %v1403_v44  ;;  %1602 = vmatpush3.msra.mxu0 %v1410_v45  ;;  %v1427_v43 = vsel %vm903_vm8, 1.0, %v1746_v2 }
 0x157   :  { %1588 = vmatprep.subr.mxu1 %v1746_v2  ;;  %1603 = vmatprep.subr.mxu0 %v1746_v2 }
 0x158   :  { %1589 = vmatpush3.msra.mxu1 %v1402_v46  ;;  %1604 = vmatpush3.msra.mxu0 %v1409_v47  ;;  %v902_v46 = vpop.permute.xlu1 %901 }
 0x159   :  { %1590 = vmatprep.subr.mxu1 %v1746_v2  ;;  %1605 = vmatprep.subr.mxu0 %v1746_v2  ;;  %vm904_vm9 = vcmp.eq.s32.totalorder %v902_v46, %v1889_v12 }
 0x15a   :  { %1591 = vmatpush3.msra.mxu1 %v1401_v48  ;;  %1606 = vmatpush3.msra.mxu0 %v1408_v49  ;;  %v1426_v48 = vld [vmem:[%s2187_s9] ss:$0 sm:$0xff] }
 0x15b   :  { %1592 = vmatprep.subr.mxu1 %v1746_v2  ;;  %1607 = vmatprep.subr.mxu0 %v1746_v2 }
 0x15c   :  { %1593 = vmatpush3.msra.mxu1 %v1400_v50  ;;  %1594 = vmatprep.mubr.msk.f32.mxu1 %vm1747_vm1, %v1746_v2 }
 0x15d   :  { %1608 = vmatpush3.msra.mxu0 %v1407_v51  ;;  %1609 = vmatprep.mubr.msk.f32.mxu0 %vm1747_vm1, %v1746_v2 }
 0x15e   :  { %1595 = vmatmul.mubr.msk.f32.vlgmr.msra.gmra.mxu1 %vm160_vm4, %v1933_v28  ;;  %1610 = vmatmul.mubr.msk.f32.vlgmr.msra.gmra.mxu0 %vm160_vm4, %v1933_v28 }
 0x15f   :  { %1612 = vmatprep.subr.mxu1 %v1746_v2  ;;  %1624 = vmatprep.mubr.msk.f32.mxu1 %vm1747_vm1, %v1746_v2 }
 0x160   :  { %1613 = vmatpush3.msra.mxu1 %v1419_v52  ;;  %1627 = vmatprep.subr.mxu0 %v1746_v2 }
 0x161   :  { %1614 = vmatprep.subr.mxu1 %v1746_v2  ;;  %1629 = vmatprep.mubr.msk.f32.mxu0 %vm1747_vm1, %v1746_v2 }
 0x162   :  { %1615 = vmatpush3.msra.mxu1 %v1418_v53  ;;  %v1428_v53 = vsel %vm904_vm9, 1.0, %v1746_v2 }
 0x163   :  { %1616 = vmatprep.subr.mxu1 %v1746_v2 }
 0x164   :  { %1617 = vmatpush3.msra.mxu1 %v1417_v54  ;;  %v914_v54 = vpop.permute.xlu0 %913 }
 0x165   :  { %1618 = vmatprep.subr.mxu1 %v1746_v2  ;;  %vm916_vm11 = vcmp.eq.s32.totalorder %v914_v54, %v1889_v12 }
 0x166   :  { %1619 = vmatpush3.msra.mxu1 %v1416_v55 }
 0x167   :  { %1620 = vmatprep.subr.mxu1 %v1746_v2 }
 0x168   :  { %1621 = vmatpush3.msra.mxu1 %v1415_v56  ;;  %v1430_v56 = vsel %vm916_vm11, 1.0, %v1746_v2 }
 0x169   :  { %1622 = vmatprep.subr.mxu1 %v1746_v2 }
 0x16a   :  { %1623 = vmatpush3.msra.mxu1 %v1414_v57  ;;  %v1087_v57 = vld [vmem:[%s2188_s10 + $0x8] sm:$0xff] }
 0x16b   :  { %1625 = vmatmul.mubr.msk.f32.vlgmr.msra.gmra.mxu1 %vm160_vm4, %v1933_v28  ;;  %v1421_v28 = vld [vmem:[%s2183_s5] ss:$0 sm:$0xff] }
 0x16c   :  { %vm729_vm5 = vcmp.eq.s32.totalorder %v2087_v26, %v1421_v28  ;;  %1649 = vmatprep.mubr.msk.f32.mxu1 %vm70_vm2, %v1427_v43 }
 0x16d   :  { %v1422_v36 = vsel %vm729_vm5, 1.0, %v1746_v2 }
 0x203   :  { %v230_v62 = vpop.f32.mrf.mxu1  ;;  %v306_v63 = vpop.f32.mrf.mxu0 }
 0x204   :  { %v239_v10 = vmul.f32 %v237_v8, %v230_v62 }
 0x205   :  { %v1536_v0 = vpop.f32.mrf.mxu1  ;;  %v1551_v1 = vpop.f32.mrf.mxu0 }
 0x206   :  { %v307_v16 = vadd.f32 %v306_v63, %v239_v10  ;;  %v1437_v0 = vld [vmem:[%s2189_s11] ss:$0 sm:$0xff]  ;;  %s1753_s11 = smov [#allocation4]  }
 0x207   :  { %s1367_s29 = sshll.u32 %s1753_s11, 4  ;;  %s1368_s29 = int_to_ptr.vmem [resolvable:$true] %s1367_s29 }
 0x208   :  { %p1706_p1 = scmp.lt.s32.totalorder %s1368_s29, %s1368_s29 }
 0x210   :  { %v383_v4 = vpop.f32.mrf.mxu1  ;;  %v466_v5 = vpop.f32.mrf.mxu0 }
 0x211   :  { %v391_v13 = vmul.f32 %v389_v9, %v383_v4  ;;  %v474_v22 = vmul.f32 %v472_v19, %v466_v5  ;;  %v1440_v4 = vld [vmem:[%s2191_s13] ss:$0 sm:$0xff]  ;;  %s1701_s13 = scalar_lea.vmem %s1368_s29, 128 }
 0x212   :  { %v1566_v6 = vpop.f32.mrf.mxu1  ;;  %v1581_v7 = vpop.f32.mrf.mxu0  ;;  %p1702_p0 = scmp.ne.s32.totalorder %s1368_s29, %s1701_s13  ;;  %p1707_p2 = scmp.lt.s32.totalorder %s1701_s13, %s1701_s13 }
 0x213   :  { %v392_v21 = vadd.f32 %v391_v13, %v307_v16 }
 0x214   :  { %p1708_p3 = por %p1707_p2, %p1706_p1 }
 0x215   :  { %v475_v25 = vadd.f32 %v474_v22, %v392_v21 }
 0x216   :  { %p1709_p4 = pnand %p1708_p3, %p1702_p0 }
 0x21e   :  { %v549_v14 = vpop.f32.mrf.mxu1  ;;  %v632_v15 = vpop.f32.mrf.mxu0 }
 0x21f   :  { %v557_v23 = vmul.f32 %v555_v20, %v549_v14  ;;  %v640_v30 = vmul.f32 %v638_v24, %v632_v15 }
 0x220   :  { %v1596_v17 = vpop.f32.mrf.mxu1  ;;  %v1611_v18 = vpop.f32.mrf.mxu0 }
 0x221   :  { %v558_v27 = vadd.f32 %v557_v23, %v475_v25 }
 0x223   :  { %v641_v32 = vadd.f32 %v640_v30, %v558_v27 }
 0x22b   :  { %v715_v31 = vpop.f32.mrf.mxu1 }
 0x22c   :  { %v723_v33 = vmul.f32 %v721_v29, %v715_v31 }
 0x22d   :  { %v1626_v34 = vpop.f32.mrf.mxu1 }
 0x22e   :  { %v724_v35 = vadd.f32 %v723_v33, %v641_v32 }
 0x230   :  { %1628 = vmatpush3.msk.msra.mxu0 %vm736_vm6, %v724_v35 }
 0x231   :  { %1630 = vmatmul.mubr.msk.f32.vlgmr.msra.gmra.mxu0 %vm732_vm7, %v1422_v36  ;;  %1632 = vmatprep.subr.mxu0 %v1746_v2 }
 0x232   :  { %1633 = vmatpush3.msra.mxu0 %v815_v11  ;;  %1644 = vmatprep.mubr.msk.f32.mxu0 %vm1747_vm1, %v1746_v2 }
 0x233   :  { %1634 = vmatprep.subr.mxu0 %v1746_v2 }
 0x234   :  { %1635 = vmatpush3.msra.mxu0 %v814_v37 }
 0x235   :  { %1636 = vmatprep.subr.mxu0 %v1746_v2 }
 0x236   :  { %1637 = vmatpush3.msra.mxu0 %v813_v38 }
 0x237   :  { %1638 = vmatprep.subr.mxu0 %v1746_v2 }
 0x238   :  { %1639 = vmatpush3.msra.mxu0 %v812_v39 }
 0x239   :  { %1640 = vmatprep.subr.mxu0 %v1746_v2 }
 0x23a   :  { %1641 = vmatpush3.msra.mxu0 %v811_v40 }
 0x23b   :  { %1642 = vmatprep.subr.mxu0 %v1746_v2 }
 0x23c   :  { %1643 = vmatpush3.msra.mxu0 %v810_v41 }
 0x23d   :  { %1645 = vmatmul.mubr.msk.f32.vlgmr.msra.gmra.mxu0 %vm160_vm4, %v1848_v3  ;;  %v911_v3 = vpop.permute.xlu1 %910  ;;  %1657 = vmatprep.subr.mxu0 %v1087_v57 }
 0x23e   :  { %vm915_vm10 = vcmp.eq.s32.totalorder %v911_v3, %v1889_v12  ;;  %1658 = vmatpush3.msra.mxu0 %v1087_v57  ;;  %v1086_v12 = vld [vmem:[%s2188_s10] sm:$0xff] }
 0x23f   :  { %v1429_v55 = vsel %vm915_vm10, 1.0, %v1746_v2  ;;  %1659 = vmatprep.subr.mxu0 %v1086_v12  ;;  %v1177_v2 = vld [vmem:[%s2190_s12] sm:$0xff] }
 0x240   :  { %1660 = vmatpush3.msra.mxu0 %v1086_v12 }
 0x2f1   :  { %v806_v44 = vpop.f32.mrf.mxu0 }
 0x2f3   :  { %v1631_v45 = vpop.f32.mrf.mxu0 }
 0x2fd   :  { %v884_v47 = vpop.f32.mrf.mxu0 }
 0x2fe   :  { %v885_v49 = vadd.f32 %v884_v47, %v806_v44 }
 0x2ff   :  { %v1646_v50 = vpop.f32.mrf.mxu0 }
 0x300   :  { %v895_v51 = vadd.f32 %v1426_v48, %v885_v49 }
 0x302   :  { %v896_v52 = vmax.f32 %v895_v51, 0.0 }
 0x304   :  { %1647 = vmatprep.subr.msk.mxu1 %vm74_vm0, %v896_v52 }
 0x305   :  { %1648 = vmatpush3.msk.msra.mxu1 %vm74_vm0, %v896_v52 }
 0x306   :  { %1650 = vmatmul.mubr.msk.f32.vlgmr.msra.gmra.mxu1 %vm70_vm2, %v1428_v53  ;;  %1652 = vmatprep.subr.msk.mxu1 %vm74_vm0, %v896_v52 }
 0x307   :  { %1653 = vmatpush3.msk.msra.mxu1 %vm74_vm0, %v896_v52  ;;  %1654 = vmatprep.mubr.msk.f32.mxu1 %vm70_vm2, %v1429_v55 }
 0x308   :  { %1664 = vmatprep.subr.mxu1 %v1178_v58 }
 0x30a   :  { %1655 = vmatmul.mubr.msk.f32.vlgmr.msra.gmra.mxu1 %vm70_vm2, %v1430_v56 }
 0x30b   :  { %1665 = vmatpush3.msra.mxu1 %v1178_v58 }
 0x30c   :  { %1666 = vmatprep.subr.mxu1 %v1177_v2 }
 0x30d   :  { %1667 = vmatpush3.msra.mxu1 %v1177_v2 }
 0x3c6   :  { %v1651_v59 = vpop.f32.mrf.mxu1 }
 0x3c8   :  { %v996_v60 = vpop.f32.mrf.mxu1 }
 0x3c9   :  { %1661 = vmatprep.mubr.msk.f32.mxu0 %vm1095_vm12, %v996_v60 }
 0x3ca   :  { %v1656_v61 = vpop.f32.mrf.mxu1  ;;  %1662 = vmatmul.mubr.msk.f32.vlgmr.msra.gmra.mxu0 %vm1095_vm12, %v1651_v59 }
 0x3cc   :  { %v1077_v62 = vpop.f32.mrf.mxu1 }
 0x3cd   :  { %1668 = vmatprep.mubr.msk.f32.mxu1 %vm1095_vm12, %v1077_v62 }
 0x3ce   :  { %1669 = vmatmul.mubr.msk.f32.vlgmr.msra.gmra.mxu1 %vm1095_vm12, %v1656_v61 }
 0x48a   :  { %v1663_v63 = vpop.f32.mrf.mxu0 }
 0x48b   :  { %v1174_v7 = vadd.f32 %v1663_v63, %v1437_v0 }
 0x48c   :  { %v1168_v1 = vpop.f32.mrf.mxu0 }
 0x48d   :  { %v1169_v5 = vadd.f32 %v1437_v0, %v1168_v1 }
 0x48e   :  { %v1670_v6 = vpop.f32.mrf.mxu1 }
 0x48f   :  { %v1264_v8 = vadd.f32 %v1670_v6, %v1440_v4  ;;  %1281 = vst.msk [vmem:[#allocation4] sm:$0x3f] %vm1280_vm13, %v1169_v5 }
 0x490   :  { %v1258_v9 = vpop.f32.mrf.mxu1 }
 0x491   :  { %v1259_v10 = vadd.f32 %v1440_v4, %v1258_v9  ;;  %v1268_v13 = vmul.f32 %v1264_v8, %v1174_v7 }
 0x493   :  { %v1273_v14 = vsel %vm1272_vm14, %v1268_v13, 0.0  ;;  %v1267_v15 = vmul.f32 %v1259_v10, %v1169_v5 }
 0x494   :  { %1274 = vadd.xlane.f32.xlu0 %v1273_v14 }
 0x495   :  { %v1269_v16 = vsel %vm1095_vm12, %v1267_v15, 0.0 }
 0x496   :  { %1270 = vadd.xlane.f32.xlu1 %v1269_v16 }
 0x497   :  { %1712 = shalt.err (!%p1709_p4)
}
 0x498   :  { %1370 = dma.vmem_to_hbm [thread:$0]  %s1368_s29, 128, %s2194_s16, [#allocation5]   ;;  %vm1278_vm15 = vcmask 3072   ;;  %vm1276_vm1 = vcmask 7168   ;;  %vm1283_vm2 = vcmp.lt.s32.totalorder %v2087_v26, 6 }
 0x51d   :  { %v1275_v17 = vpop.xlane.xlu0 %1274 }
 0x51e   :  { %1279 = vst.msk [vmem:[%s2193_s15 + $0x8] sm:$0xf] %vm1278_vm15, %v1275_v17  ;;  %v1320_v18 = vand.u32 2147483647, %v1275_v17  ;;  %v1318_v11 = vmax.f32 %v1275_v17, 0.0 }
 0x51f   :  { %v1271_v19 = vpop.xlane.xlu1 %1270 }
 0x520   :  { %v1322_v20 = vsub.f32 0.0, %v1320_v18  ;;  %1277 = vst.msk [vmem:[%s2193_s15] sm:$0xff] %vm1276_vm1, %v1271_v19  ;;  %v1285_v21 = vsub.f32 0.0, %v1271_v19  ;;  %v1319_v22 = vand.u32 2147483647, %v1271_v19  ;;  %v1317_v40 = vmax.f32 %v1271_v19, 0.0 }
 0x521   :  { %s1754_s15 = smov [#allocation2]  }
 0x522   :  { %v1325_v23 = vmul.f32 1.442695, %v1322_v20  ;;  %v1289_v24 = vand.u32 2147483647, %v1285_v21  ;;  %v1321_v25 = vsub.f32 0.0, %v1319_v22  ;;  %v1287_v43 = vmax.f32 %v1285_v21, 0.0 }
 0x523   :  { %s1355_s16 = sshll.u32 %s1754_s15, 4  ;;  %s1356_s16 = int_to_ptr.vmem [resolvable:$true] %s1355_s16 }
 0x524   :  { %1689 = vpow2.f32 %v1325_v23  ;;  %v1291_v27 = vsub.f32 0.0, %v1289_v24  ;;  %v1323_v28 = vmul.f32 1.442695, %v1321_v25  ;;  %s1721_s18 = scalar_lea.vmem %s1356_s16, 16  ;;  %s1725_s19 = scalar_lea.vmem %s1356_s16, 32 }
 0x525   :  { %p1722_p5 = scmp.ne.s32.totalorder %s1356_s16, %s1721_s18  ;;  %p1726_p6 = scmp.lt.s32.totalorder %s1356_s16, %s1356_s16 }
 0x526   :  { %v1293_v29 = vmul.f32 1.442695, %v1291_v27  ;;  %1691 = vpow2.f32 %v1323_v28  ;;  %p1727_p7 = scmp.lt.s32.totalorder %s1725_s19, %s1721_s18 }
 0x528   :  { %1693 = vpow2.f32 %v1293_v29  ;;  %p1728_p8 = por %p1727_p7, %p1726_p6 }
 0x52a   :  { %p1729_p9 = pnand %p1728_p8, %p1722_p5 }
 0x531   :  { %v1690_v30 = vpop.eup %1689 }
 0x532   :  { %v1328_v31 = vadd.f32 1.0, %v1690_v30 }
 0x533   :  { %v1692_v32 = vpop.eup %1691 }
 0x534   :  { %1695 = vlog2.f32 %v1328_v31  ;;  %v1327_v33 = vadd.f32 1.0, %v1692_v32 }
 0x535   :  { %v1694_v34 = vpop.eup %1693 }
 0x536   :  { %v1297_v35 = vadd.f32 1.0, %v1694_v34  ;;  %1697 = vlog2.f32 %v1327_v33 }
 0x538   :  { %1699 = vlog2.f32 %v1297_v35 }
 0x541   :  { %v1696_v36 = vpop.eup %1695 }
 0x542   :  { %v1332_v37 = vmul.f32 0.6931472, %v1696_v36 }
 0x543   :  { %v1698_v38 = vpop.eup %1697 }
 0x544   :  { %v1334_v39 = vadd.f32 %v1332_v37, %v1318_v11  ;;  %v1330_v41 = vmul.f32 0.6931472, %v1698_v38 }
 0x545   :  { %v1700_v42 = vpop.eup %1699 }
 0x546   :  { %v1300_v44 = vmul.f32 0.6931472, %v1700_v42  ;;  %v1333_v45 = vadd.f32 %v1330_v41, %v1317_v40  ;;  %v1337_v46 = vsel %vm74_vm0, %v1334_v39, 0.0  ;;  %vm1347_vm0 = vcmask 0  }
 0x548   :  { %v1303_v47 = vadd.f32 %v1300_v44, %v1287_v43  ;;  %v1335_v48 = vsel %vm1283_vm2, 0.0, %v1333_v45 }
 0x549   :  { %v1338_v49 = vadd.f32 %v1337_v46, %v1335_v48 }
 0x54a   :  { %v1305_v50 = vsel %vm1283_vm2, %v1303_v47, 0.0 }
 0x54b   :  { %v1309_v51 = vrot.slane %v1305_v50, 4  ;;  %v1339_v3 = vrot.slane %v1338_v49, 4 }
 0x54d   :  { %v1310_v52 = vadd.f32 %v1309_v51, %v1305_v50  ;;  %v1340_v53 = vadd.f32 %v1339_v3, %v1338_v49 }
 0x54f   :  { %v1311_v54 = vrot.slane %v1310_v52, 2  ;;  %v1341_v55 = vrot.slane %v1340_v53, 2 }
 0x551   :  { %v1312_v56 = vadd.f32 %v1311_v54, %v1310_v52  ;;  %v1342_v57 = vadd.f32 %v1341_v55, %v1340_v53 }
 0x553   :  { %v1313_v12 = vrot.slane %v1312_v56, 1  ;;  %v1343_v58 = vrot.slane %v1342_v57, 1 }
 0x555   :  { %v1314_v26 = vadd.f32 %v1313_v12, %v1312_v56  ;;  %v1344_v2 = vadd.f32 %v1343_v58, %v1342_v57 }
 0x557   :  { %v1316_v59 = vmul.f32 0.16666667, %v1314_v26  ;;  %v1345_v60 = vmul.f32 0.16666667, %v1344_v2 }
 0x559   :  { %v1346_v61 = vadd.f32 %v1345_v60, %v1316_v59 }
 0x55b   :  { %1348 = vst.msk [vmem:[#allocation2] sm:$0x1] %vm1347_vm0, %v1346_v61 }
 0x55c   :  { %1732 = shalt.err (!%p1729_p9)
}
 0x55d   :  { %1358 = dma.vmem_to_hbm [thread:$0]  %s1356_s16, 16, %s2192_s14, [#allocation3]  }
 0x55e   :  { %1741 = dma.done.wait [#allocation3], 16  }
 0x55f   :  { %1742 = vsyncadd [#allocation3], 4294967280 }
 0x560   :  { %1743 = dma.done.wait [#allocation5], 128  }
 0x561   :  { %1744 = vsyncadd [#allocation5], 4294967168 }
 0x562   :  { %1379 = vsyncpa [#allocation3], 1 }
 0x563   :  { %1380 = vsyncpa [#allocation5], 1 }

// kernel: net_se_graph_forward.2
= control target key start
LH: loop header
LB: loop body
LE: loop exit
PB: predicated region body
PF: predicated region fallthrough
CT: control target
= control target key end

     0   :  { %s3366_s30 = smov 0   ;;  %s3736_s0 = inlined_call_operand.vmem [shape: f32[4,12,8], index: 0, kind: input, shape index: {}]   ;;  %s3737_s1 = inlined_call_operand.vmem [shape: f32[4,12,12], index: 1, kind: input, shape index: {}]   ;;  %s3738_s2 = inlined_call_operand.vmem [shape: f32[4,12,12], index: 2, kind: input, shape index: {}]   ;;  %s3739_s3 = inlined_call_operand.vmem [shape: f32[8,8], index: 3, kind: input, shape index: {}]   ;;  %s3740_s4 = inlined_call_operand.vmem [shape: f32[8,8], index: 4, kind: input, shape index: {}]   ;;  %s3741_s5 = inlined_call_operand.vmem [shape: f32[8,8], index: 5, kind: input, shape index: {}]   ;;  %s3742_s6 = inlined_call_operand.vmem [shape: f32[3,8], index: 6, kind: input, shape index: {}]   ;;  %s3743_s7 = inlined_call_operand.vmem [shape: f32[8,6], index: 7, kind: input, shape index: {}]   ;;  %s3744_s8 = inlined_call_operand.vmem [shape: f32[1,3], index: 8, kind: input, shape index: {}]   ;;  %s3745_s9 = inlined_call_operand.vmem [shape: f32[4,1,48], index: 9, kind: output, shape index: {}]  }
   0x1 LB: > { %s2976_s10 = sadd.s32 4294967295, %s3301_s30   ;;  %p2980_p0 = scmp.ge.s32.totalorder %s3301_s30, 1  ;;  %s3301_s30 = sphi %s3366_s30, %s19_s30  }
   0x2   : > { %p307_p1 = scmp.lt.s32.totalorder %s3301_s30, 5 }
   0x4   : > { %p308_p2 = pnand %p2980_p0, %p307_p1 }
   0x5   : > { %p351_p3 = scmp.lt.s32.totalorder (!%p308_p2), %s2976_s10, 3  ;;  %s3303_s22 = smov (!%p308_p2), 127  }
   0x6   : > { %311 = sbr.rel (%p308_p2) target bundleno = 4189 (0x105d), region = 56  ;;  %s3308_s14 = smov (!%p308_p2), 125  }
   0x7   : > { %s3309_s17 = smov (!%p308_p2), 8   ;;  %s3310_s20 = smov (!%p308_p2), 124  }
   0x8   : > { %s3311_s21 = smov (!%p308_p2), 123   ;;  %s3312_s24 = smov (!%p308_p2), 16  }
   0x9   : > { %s3313_s25 = smov (!%p308_p2), 24   ;;  %s3314_s26 = smov (!%p308_p2), 32  }
   0xb   : > { %v378_v0 = vld [vmem:[%s3739_s3] sm:$0xff]  ;;  %s3747_s10 = smov (!%p351_p3, %s2976_s10), 3  ;;  %vm391_vm0 = vcmask 64512   ;;  %vm383_vm1 = vcmask 93184   ;;  %vm379_vm2 = vcmask 97280   ;;  %vm481_vm3 = vcmask 1043456  }
   0xc   : > { %3114 = vmatprep.subr.mxu0 %v378_v0  ;;  %s3380_s13 = sshll.u32 %s3747_s10, 4  ;;  %v3404_v7 = vld [vmem:[%s3743_s7] sm:$0xff]  ;;  %v568_v19 = vlaneseq  ;;  %v3304_v42 = vmov 0   ;;  %vm835_vm4 = vcmask 7168   ;;  %vm837_vm5 = vcmask 3072   ;;  %s368_s11 = scalar_lea.vmem %s3745_s9, %s3747_s10 }
   0xd   : > { %3115 = vmatpush3.msra.mxu0 %v378_v0  ;;  %s355_s16 = scalar_lea.vmem %s3736_s0, %s3380_s13  ;;  %s360_s19 = scalar_lea.vmem %s3737_s1, %s3380_s13  ;;  %658 = vrot.lane.b32.xlu1 %v3404_v7, %s3303_s22  ;;  %v3421_v24 = vld [vmem:[%s3742_s6] sm:$0x7] }
   0xe   : > { %v376_v1 = vld [vmem:[%s355_s16] sm:$0xff]  ;;  %v377_v2 = vld [vmem:[%s355_s16 + $0x8] sm:$0xf]  ;;  %3126 = vmatprep.subr.mxu0 %v3404_v7  ;;  %v3415_v20 = vshrl.u32 %v568_v19, 7  ;;  %s365_s27 = scalar_lea.vmem %s3738_s2, %s3380_s13  ;;  %3275 = vset.pattern.permute.xlu1 %v3304_v42  ;;  %s3307_s13 = smov 126  }
   0xf   : > { %v3390_v3 = vld [vmem:[%s360_s19 + $0x8] sm:$0xf]  ;;  %3116 = vmatprep.mubr.msk.f32.mxu0 %vm391_vm0, %v376_v1  ;;  %v3394_v5 = vld [vmem:[%s360_s19] sm:$0xff]  ;;  %3276 = vset.pattern.permute.xlu0 %v3304_v42 }
  0x10   : > { %v384_v4 = vsel %vm383_vm1, %v3390_v3, 0.0  ;;  %3117 = vmatmul.mubr.msk.f32.vlgmr.msra.gmra.mxu0 %vm391_vm0, %v377_v2  ;;  %v380_v6 = vsel %vm379_vm2, %v3394_v5, 0.0  ;;  %3123 = vmatprep.mubr.msk.f32.mxu1 %vm379_vm2, %v3394_v5  ;;  %v570_v22 = vsub.s32 0, %v3415_v20  ;;  %v3440_v38 = vld [vmem:[%s365_s27] sm:$0xff]  ;;  %v3446_v41 = vld [vmem:[%s365_s27 + $0x8] sm:$0xf] }
  0x11   : > { %385 = vadd.xlane.f32.xlu0 %v384_v4  ;;  %3127 = vmatpush3.msra.mxu0 %v3404_v7  ;;  %v3453_v44 = vld [vmem:[%s3744_s8] ss:$0 sm:$0xff]  ;;  %v3466_v62 = vadd.s32 8, %v3415_v20  ;;  %s3315_s27 = smov 40  }
  0x12   : > { %v571_v28 = vrot.slane %v3421_v24, %v570_v22 }
  0x15   : > { %381 = vadd.xlane.f32.xlu0 %v380_v6 }
  0x7f   : > { %v659_v18 = vpop.permute.xlu1 %658 }
  0x9a   : > { %v386_v8 = vpop.xlane.xlu0 %385 }
  0x9b   : > { %v388_v10 = vadd.f32 1.0, %v386_v8 }
  0x9d   : > { %3277 = vrsqrt.f32 %v388_v10 }
  0x9e   : > { %v382_v9 = vpop.xlane.xlu0 %381 }
  0x9f   : > { %v387_v11 = vadd.f32 1.0, %v382_v9 }
  0xa1   : > { %3279 = vrsqrt.f32 %v387_v11 }
  0xaa   : > { %v3278_v12 = vpop.eup %3277 }
  0xab   : > { %v563_v21 = vmul.f32 %v3278_v12, %v3278_v12 }
  0xae   : > { %v3280_v15 = vpop.eup %3279 }
  0xaf   : > { %v562_v23 = vmul.f32 %v3280_v15, %v3280_v15 }
  0xd0   : > { %v3118_v13 = vpop.f32.mrf.mxu0 }
  0xd1   : > { %v474_v14 = vmul.f32 %v3278_v12, %v3118_v13  ;;  %v565_v26 = vmul.f32 %v3118_v13, %v563_v21 }
  0xd2   : > { %v464_v16 = vpop.f32.mrf.mxu0 }
  0xd3   : > { %v473_v17 = vmul.f32 %v3280_v15, %v464_v16  ;;  %3119 = vmatprep.subr.msk.mxu1 %vm481_vm3, %v474_v14  ;;  %v564_v30 = vmul.f32 %v562_v23, %v464_v16 }
  0xd4   : > { %3120 = vmatpush3.msk.msra.mxu1 %vm481_vm3, %v474_v14 }
  0xd5   : > { %3121 = vmatprep.subr.mxu1 %v473_v17 }
  0xd6   : > { %3122 = vmatpush3.msra.mxu1 %v473_v17 }
  0xd7   : > { %3124 = vmatmul.mubr.msk.f32.vlgmr.msra.gmra.mxu1 %vm379_vm2, %v3390_v3  ;;  %3131 = vmatprep.subr.mxu1 %v659_v18 }
  0xd8   : > { %3132 = vmatpush3.msra.mxu1 %v659_v18 }
 0x197   : > { %v3125_v25 = vpop.f32.mrf.mxu1 }
 0x198   : > { %v561_v27 = vmul.f32 %v3278_v12, %v3125_v25  ;;  %v3305_v12 = vmov 0.0  }
 0x199   : > { %v551_v29 = vpop.f32.mrf.mxu1  ;;  %3143 = vmatprep.subr.mxu1 %v3305_v12 }
 0x19a   : > { %v567_v31 = vadd.f32 %v565_v26, %v561_v27  ;;  %v560_v32 = vmul.f32 %v3280_v15, %v551_v29 }
 0x19c   : > { %v566_v33 = vadd.f32 %v564_v30, %v560_v32  ;;  %v573_v34 = vadd.f32 %v571_v28, %v567_v31 }
 0x19e   : > { %v572_v35 = vadd.f32 %v571_v28, %v566_v33  ;;  %v3426_v37 = vmax.f32 %v573_v34, 0.0 }
 0x1a0   : > { %v3424_v36 = vmax.f32 %v572_v35, 0.0 }
 0x1a2   : > { %3128 = vmatprep.mubr.msk.f32.mxu0 %vm391_vm0, %v3424_v36  ;;  %3133 = vmatprep.mubr.msk.f32.mxu1 %vm391_vm0, %v3424_v36 }
 0x1a3   : > { %3129 = vmatmul.mubr.msk.f32.vlgmr.msra.gmra.mxu0 %vm391_vm0, %v3426_v37  ;;  %3134 = vmatmul.mubr.msk.f32.vlgmr.msra.gmra.mxu1 %vm391_vm0, %v3426_v37 }
 0x1a4   : > { %3140 = vmatprep.mubr.msk.f32.mxu0 %vm379_vm2, %v3440_v38 }
 0x263   : > { %v3130_v39 = vpop.f32.mrf.mxu0  ;;  %v3135_v43 = vpop.f32.mrf.mxu1 }
 0x264   : > { %3136 = vmatprep.subr.msk.mxu0 %vm481_vm3, %v3130_v39 }
 0x265   : > { %v648_v40 = vpop.f32.mrf.mxu0  ;;  %3137 = vmatpush3.msk.msra.mxu0 %vm481_vm3, %v3130_v39  ;;  %v727_v47 = vpop.f32.mrf.mxu1 }
 0x266   : > { %3138 = vmatprep.subr.mxu0 %v648_v40 }
 0x267   : > { %3139 = vmatpush3.msra.mxu0 %v648_v40 }
 0x268   : > { %3141 = vmatmul.mubr.msk.f32.vlgmr.msra.gmra.mxu0 %vm379_vm2, %v3446_v41  ;;  %3150 = vmatprep.subr.mxu0 %v3305_v12 }
 0x269   : > { %3151 = vmatpush3.msk.msra.mxu0 %vm481_vm3, %v3390_v3 }
 0x26a   : > { %3152 = vmatprep.subr.mxu0 %v3305_v12 }
 0x26b   : > { %3153 = vmatpush3.msra.mxu0 %v3394_v5 }
 0x26c   : > { %3162 = vmatprep.subr.mxu0 %v3305_v12 }
 0x328   : > { %v3142_v45 = vpop.f32.mrf.mxu0 }
 0x329   : > { %v817_v46 = vadd.f32 %v3142_v45, %v3135_v43 }
 0x32a   : > { %v811_v48 = vpop.f32.mrf.mxu0 }
 0x32b   : > { %v827_v49 = vadd.f32 %v3453_v44, %v817_v46  ;;  %v812_v50 = vadd.f32 %v811_v48, %v727_v47 }
 0x32d   : > { %3281 = vtanh.f32 %v827_v49  ;;  %v826_v51 = vadd.f32 %v3453_v44, %v812_v50 }
 0x32f   : > { %3283 = vtanh.f32 %v826_v51 }
 0x33a   : > { %v3457_v52 = vpop.eup %3281 }
 0x33b   : > { %v838_v55 = vsel %vm837_vm5, %v3457_v52, -inf }
 0x33c   : > { %v3459_v53 = vpop.eup %3283 }
 0x33d   : > { %v836_v54 = vsel %vm835_vm4, %v3459_v53, -inf }
 0x33e   : > { %v839_v56 = vmax.f32 %v836_v54, %v838_v55 }
 0x340   : > { %v840_v57 = vrot.slane %v839_v56, 4 }
 0x342   : > { %v841_v58 = vmax.f32 %v839_v56, %v840_v57 }
 0x344   : > { %v842_v59 = vrot.slane %v841_v58, 2 }
 0x346   : > { %v843_v60 = vmax.f32 %v841_v58, %v842_v59 }
 0x348   : > { %v844_v61 = vrot.slane %v843_v60, 1 }
 0x34a   : > { %v845_v63 = vmax.f32 %v843_v60, %v844_v61 }
 0x34c   : > { %vm846_vm6 = vcmp.ge.f32.partialorder %v3459_v53, %v845_v63  ;;  %vm847_vm7 = vcmp.ge.f32.partialorder %v3457_v52, %v845_v63 }
 0x34d   : > { %v848_v0 = vsel %vm846_vm6, %v3415_v20, 12  ;;  %v849_v1 = vsel %vm847_vm7, %v3466_v62, 12 }
 0x34e   : > { %v850_v2 = vsel %vm835_vm4, %v848_v0, 2147483647  ;;  %v851_v4 = vsel %vm837_vm5, %v849_v1, 2147483647 }
 0x34f   : > { %vm852_vm8 = vcmp.lt.s32.totalorder %v850_v2, %v851_v4 }
 0x350   : > { %v853_v6 = vsel %vm852_vm8, %v850_v2, %v851_v4 }
 0x351   : > { %v854_v8 = vrot.slane %v853_v6, 4 }
 0x353   : > { %vm855_vm9 = vcmp.lt.s32.totalorder %v853_v6, %v854_v8 }
 0x354   : > { %v856_v9 = vsel %vm855_vm9, %v853_v6, %v854_v8 }
 0x355   : > { %v857_v10 = vrot.slane %v856_v9, 2 }
 0x357   : > { %vm858_vm10 = vcmp.lt.s32.totalorder %v856_v9, %v857_v10 }
 0x358   : > { %v859_v11 = vsel %vm858_vm10, %v856_v9, %v857_v10 }
 0x359   : > { %v860_v13 = vrot.slane %v859_v11, 1 }
 0x35b   : > { %vm861_vm11 = vcmp.lt.s32.totalorder %v859_v11, %v860_v13 }
 0x35c   : > { %v862_v14 = vsel %vm861_vm11, %v859_v11, %v860_v13 }
 0x35d   : > { %864 = vperm.xlu1 %3275, %v862_v14   ;;  %vm869_vm12 = vcmp.eq.s32.totalorder %v3415_v20, %v862_v14  ;;  %vm870_vm13 = vcmp.eq.s32.totalorder %v3466_v62, %v862_v14 }
 0x35e   : > { %v871_v15 = vsel %vm869_vm12, -2.0, %v3459_v53  ;;  %v872_v16 = vsel %vm870_vm13, -2.0, %v3457_v52 }
 0x35f   : > { %v873_v17 = vsel %vm835_vm4, %v871_v15, -inf  ;;  %v874_v3 = vsel %vm837_vm5, %v872_v16, -inf }
 0x360   : > { %v875_v18 = vmax.f32 %v873_v17, %v874_v3 }
 0x362   : > { %v876_v21 = vrot.slane %v875_v18, 4 }
 0x364   : > { %v877_v22 = vmax.f32 %v875_v18, %v876_v21 }
 0x366   : > { %v878_v5 = vrot.slane %v877_v22, 2 }
 0x368   : > { %v879_v23 = vmax.f32 %v877_v22, %v878_v5 }
 0x36a   : > { %v880_v25 = vrot.slane %v879_v23, 1 }
 0x36c   : > { %v881_v26 = vmax.f32 %v879_v23, %v880_v25 }
 0x36e   : > { %vm882_vm14 = vcmp.ge.f32.partialorder %v871_v15, %v881_v26  ;;  %vm883_vm15 = vcmp.ge.f32.partialorder %v872_v16, %v881_v26 }
 0x36f   : > { %v884_v27 = vsel %vm882_vm14, %v3415_v20, 12  ;;  %v885_v28 = vsel %vm883_vm15, %v3466_v62, 12 }
 0x370   : > { %v886_v29 = vsel %vm835_vm4, %v884_v27, 2147483647  ;;  %v887_v30 = vsel %vm837_vm5, %v885_v28, 2147483647 }
 0x371   : > { %vm888_vm1 = vcmp.lt.s32.totalorder %v886_v29, %v887_v30 }
 0x372   : > { %v889_v31 = vsel %vm888_vm1, %v886_v29, %v887_v30 }
 0x373   : > { %v890_v32 = vrot.slane %v889_v31, 4 }
 0x375   : > { %vm891_vm6 = vcmp.lt.s32.totalorder %v889_v31, %v890_v32 }
 0x376   : > { %v892_v33 = vsel %vm891_vm6, %v889_v31, %v890_v32 }
 0x377   : > { %v893_v34 = vrot.slane %v892_v33, 2 }
 0x379   : > { %vm894_vm7 = vcmp.lt.s32.totalorder %v892_v33, %v893_v34 }
 0x37a   : > { %v895_v35 = vsel %vm894_vm7, %v892_v33, %v893_v34 }
 0x37b   : > { %v896_v39 = vrot.slane %v895_v35, 1 }
 0x37d   : > { %vm897_vm8 = vcmp.lt.s32.totalorder %v895_v35, %v896_v39 }
 0x37e   : > { %v898_v40 = vsel %vm897_vm8, %v895_v35, %v896_v39 }
 0x37f   : > { %900 = vperm.xlu0 %3276, %v898_v40   ;;  %vm905_vm9 = vcmp.eq.s32.totalorder %v3415_v20, %v898_v40  ;;  %vm906_vm10 = vcmp.eq.s32.totalorder %v3466_v62, %v898_v40 }
 0x380   : > { %v907_v42 = vsel %vm905_vm9, -2.0, %v871_v15  ;;  %v908_v43 = vsel %vm906_vm10, -2.0, %v872_v16 }
 0x381   : > { %v909_v45 = vsel %vm835_vm4, %v907_v42, -inf  ;;  %v910_v46 = vsel %vm837_vm5, %v908_v43, -inf }
 0x382   : > { %v911_v47 = vmax.f32 %v909_v45, %v910_v46 }
 0x383   : > { %1622 = vrot.lane.b32.xlu0 %v3404_v7, %s3307_s13 }
 0x384   : > { %v912_v48 = vrot.slane %v911_v47, 4 }
 0x386   : > { %v913_v49 = vmax.f32 %v911_v47, %v912_v48 }
 0x387   : > { %1698 = vrot.lane.b32.xlu0 %v3404_v7, %s3308_s14 }
 0x388   : > { %v914_v50 = vrot.slane %v913_v49, 2 }
 0x38a   : > { %v915_v51 = vmax.f32 %v913_v49, %v914_v50 }
 0x38b   : > { %1847 = vrot.lane.b32.xlu0 %v3453_v44, %s3303_s22 }
 0x38c   : > { %v916_v54 = vrot.slane %v915_v51, 1 }
 0x38e   : > { %v917_v55 = vmax.f32 %v915_v51, %v916_v54 }
 0x390   : > { %vm918_vm11 = vcmp.ge.f32.partialorder %v907_v42, %v917_v55  ;;  %vm919_vm12 = vcmp.ge.f32.partialorder %v908_v43, %v917_v55 }
 0x391   : > { %v920_v56 = vsel %vm918_vm11, %v3415_v20, 12  ;;  %v921_v57 = vsel %vm919_vm12, %v3466_v62, 12 }
 0x392   : > { %v922_v58 = vsel %vm835_vm4, %v920_v56, 2147483647  ;;  %v923_v59 = vsel %vm837_vm5, %v921_v57, 2147483647 }
 0x393   : > { %vm924_vm13 = vcmp.lt.s32.totalorder %v922_v58, %v923_v59 }
 0x394   : > { %v925_v60 = vsel %vm924_vm13, %v922_v58, %v923_v59 }
 0x395   : > { %v926_v61 = vrot.slane %v925_v60, 4 }
 0x397   : > { %vm927_vm14 = vcmp.lt.s32.totalorder %v925_v60, %v926_v61 }
 0x398   : > { %v928_v63 = vsel %vm927_vm14, %v925_v60, %v926_v61 }
 0x399   : > { %v929_v0 = vrot.slane %v928_v63, 2 }
 0x39b   : > { %vm930_vm15 = vcmp.lt.s32.totalorder %v928_v63, %v929_v0 }
 0x39c   : > { %v931_v1 = vsel %vm930_vm15, %v928_v63, %v929_v0 }
 0x39d   : > { %v932_v2 = vrot.slane %v931_v1, 1 }
 0x39f   : > { %vm933_vm1 = vcmp.lt.s32.totalorder %v931_v1, %v932_v2 }
 0x3a0   : > { %v934_v4 = vsel %vm933_vm1, %v931_v1, %v932_v2 }
 0x3a1   : > { %936 = vperm.xlu1 %3275, %v934_v4   ;;  %vm941_vm6 = vcmp.eq.s32.totalorder %v3415_v20, %v934_v4  ;;  %vm942_vm7 = vcmp.eq.s32.totalorder %v3466_v62, %v934_v4 }
 0x3a2   : > { %v943_v6 = vsel %vm941_vm6, -2.0, %v907_v42  ;;  %v944_v8 = vsel %vm942_vm7, -2.0, %v908_v43 }
 0x3a3   : > { %v945_v9 = vsel %vm835_vm4, %v943_v6, -inf  ;;  %v946_v10 = vsel %vm837_vm5, %v944_v8, -inf }
 0x3a4   : > { %v947_v11 = vmax.f32 %v945_v9, %v946_v10 }
 0x3a6   : > { %v948_v13 = vrot.slane %v947_v11, 4 }
 0x3a8   : > { %v949_v14 = vmax.f32 %v947_v11, %v948_v13 }
 0x3aa   : > { %v950_v15 = vrot.slane %v949_v14, 2 }
 0x3ac   : > { %v951_v16 = vmax.f32 %v949_v14, %v950_v15 }
 0x3ae   : > { %v952_v17 = vrot.slane %v951_v16, 1 }
 0x3b0   : > { %v953_v3 = vmax.f32 %v951_v16, %v952_v17 }
 0x3b2   : > { %vm954_vm8 = vcmp.ge.f32.partialorder %v943_v6, %v953_v3  ;;  %vm955_vm9 = vcmp.ge.f32.partialorder %v944_v8, %v953_v3 }
 0x3b3   : > { %v956_v18 = vsel %vm954_vm8, %v3415_v20, 12  ;;  %v957_v21 = vsel %vm955_vm9, %v3466_v62, 12 }
 0x3b4   : > { %v958_v22 = vsel %vm835_vm4, %v956_v18, 2147483647  ;;  %v959_v5 = vsel %vm837_vm5, %v957_v21, 2147483647 }
 0x3b5   : > { %vm960_vm10 = vcmp.lt.s32.totalorder %v958_v22, %v959_v5 }
 0x3b6   : > { %v961_v23 = vsel %vm960_vm10, %v958_v22, %v959_v5 }
 0x3b7   : > { %v962_v25 = vrot.slane %v961_v23, 4 }
 0x3b9   : > { %vm963_vm11 = vcmp.lt.s32.totalorder %v961_v23, %v962_v25 }
 0x3ba   : > { %v964_v26 = vsel %vm963_vm11, %v961_v23, %v962_v25 }
 0x3bb   : > { %v965_v27 = vrot.slane %v964_v26, 2 }
 0x3bd   : > { %vm966_vm12 = vcmp.lt.s32.totalorder %v964_v26, %v965_v27 }
 0x3be   : > { %v967_v28 = vsel %vm966_vm12, %v964_v26, %v965_v27  ;;  %v3530_v27 = vand.u32 127, %v568_v19 }
 0x3bf   : > { %v968_v29 = vrot.slane %v967_v28, 1 }
 0x3c1   : > { %vm969_vm13 = vcmp.lt.s32.totalorder %v967_v28, %v968_v29 }
 0x3c2   : > { %v970_v30 = vsel %vm969_vm13, %v967_v28, %v968_v29 }
 0x3c3   : > { %972 = vperm.xlu1 %3275, %v970_v30   ;;  %vm977_vm14 = vcmp.eq.s32.totalorder %v3415_v20, %v970_v30  ;;  %vm978_vm15 = vcmp.eq.s32.totalorder %v3466_v62, %v970_v30 }
 0x3c4   : > { %v979_v31 = vsel %vm977_vm14, -2.0, %v943_v6  ;;  %v980_v32 = vsel %vm978_vm15, -2.0, %v944_v8 }
 0x3c5   : > { %v981_v33 = vsel %vm835_vm4, %v979_v31, -inf  ;;  %v982_v34 = vsel %vm837_vm5, %v980_v32, -inf }
 0x3c6   : > { %v983_v35 = vmax.f32 %v981_v33, %v982_v34 }
 0x3c8   : > { %v984_v39 = vrot.slane %v983_v35, 4 }
 0x3ca   : > { %v985_v40 = vmax.f32 %v983_v35, %v984_v39 }
 0x3cc   : > { %v986_v42 = vrot.slane %v985_v40, 2 }
 0x3ce   : > { %v987_v43 = vmax.f32 %v985_v40, %v986_v42 }
 0x3d0   : > { %v988_v45 = vrot.slane %v987_v43, 1 }
 0x3d2   : > { %v989_v46 = vmax.f32 %v987_v43, %v988_v45 }
 0x3d4   : > { %vm990_vm1 = vcmp.ge.f32.partialorder %v979_v31, %v989_v46  ;;  %vm991_vm6 = vcmp.ge.f32.partialorder %v980_v32, %v989_v46 }
 0x3d5   : > { %v992_v47 = vsel %vm990_vm1, %v3415_v20, 12  ;;  %v993_v48 = vsel %vm991_vm6, %v3466_v62, 12 }
 0x3d6   : > { %v994_v49 = vsel %vm835_vm4, %v992_v47, 2147483647  ;;  %v995_v50 = vsel %vm837_vm5, %v993_v48, 2147483647 }
 0x3d7   : > { %vm996_vm7 = vcmp.lt.s32.totalorder %v994_v49, %v995_v50 }
 0x3d8   : > { %v997_v51 = vsel %vm996_vm7, %v994_v49, %v995_v50  ;;  %v865_v5 = vpop.permute.xlu1 %864 }
 0x3d9   : > { %v998_v54 = vrot.slane %v997_v51, 4 }
 0x3db   : > { %vm999_vm8 = vcmp.lt.s32.totalorder %v997_v51, %v998_v54 }
 0x3dc   : > { %v1000_v55 = vsel %vm999_vm8, %v997_v51, %v998_v54  ;;  %vm3306_vm8 = vmmov 0  }
 0x3dd   : > { %v1001_v56 = vrot.slane %v1000_v55, 2  ;;  %3154 = vmatprep.mubr.msk.f32.mxu0 %vm3306_vm8, %v3305_v12  ;;  %3147 = vmatprep.mubr.msk.f32.mxu1 %vm3306_vm8, %v3305_v12 }
 0x3df   : > { %vm1002_vm9 = vcmp.lt.s32.totalorder %v1000_v55, %v1001_v56 }
 0x3e0   : > { %v1003_v57 = vsel %vm1002_vm9, %v1000_v55, %v1001_v56  ;;  %vm866_vm9 = vcmp.eq.s32.totalorder %v3530_v27, %v865_v5 }
 0x3e1   : > { %v1004_v58 = vrot.slane %v1003_v57, 1  ;;  %v3000_v19 = vsel %vm866_vm9, 1.0, %v3305_v12 }
 0x3e3   : > { %vm1005_vm10 = vcmp.lt.s32.totalorder %v1003_v57, %v1004_v58 }
 0x3e4   : > { %v1006_v59 = vsel %vm1005_vm10, %v1003_v57, %v1004_v58 }
 0x3e5   : > { %1008 = vperm.xlu1 %3275, %v1006_v59   ;;  %vm1013_vm11 = vcmp.eq.s32.totalorder %v3415_v20, %v1006_v59  ;;  %vm1014_vm12 = vcmp.eq.s32.totalorder %v3466_v62, %v1006_v59 }
 0x3e6   : > { %v1015_v60 = vsel %vm1013_vm11, -2.0, %v979_v31  ;;  %v1016_v61 = vsel %vm1014_vm12, -2.0, %v980_v32  ;;  %vm1049_vm11 = vcmask 1040384  }
 0x3e7   : > { %v1017_v63 = vsel %vm835_vm4, %v1015_v60, -inf  ;;  %v1018_v0 = vsel %vm837_vm5, %v1016_v61, -inf }
 0x3e8   : > { %v1019_v1 = vmax.f32 %v1017_v63, %v1018_v0 }
 0x3ea   : > { %v1020_v2 = vrot.slane %v1019_v1, 4 }
 0x3ec   : > { %v1021_v4 = vmax.f32 %v1019_v1, %v1020_v2 }
 0x3ee   : > { %v1022_v6 = vrot.slane %v1021_v4, 2 }
 0x3f0   : > { %v1023_v8 = vmax.f32 %v1021_v4, %v1022_v6  ;;  %v1618_v4 = vsub.s32 1, %v3415_v20 }
 0x3f2   : > { %v1024_v9 = vrot.slane %v1023_v8, 1 }
 0x3f4   : > { %v1025_v10 = vmax.f32 %v1023_v8, %v1024_v9 }
 0x3f6   : > { %vm1026_vm13 = vcmp.ge.f32.partialorder %v1015_v60, %v1025_v10  ;;  %vm1027_vm14 = vcmp.ge.f32.partialorder %v1016_v61, %v1025_v10  ;;  %v1619_v10 = vrot.slane %v3421_v24, %v1618_v4 }
 0x3f7   : > { %v1028_v11 = vsel %vm1026_vm13, %v3415_v20, 12  ;;  %v1029_v13 = vsel %vm1027_vm14, %v3466_v62, 12  ;;  %vm1051_vm13 = vcmask 1041408   ;;  %vm1053_vm14 = vcmask 1042432  }
 0x3f8   : > { %v1030_v14 = vsel %vm835_vm4, %v1028_v11, 2147483647  ;;  %v1031_v15 = vsel %vm837_vm5, %v1029_v13, 2147483647 }
 0x3f9   : > { %vm1032_vm15 = vcmp.lt.s32.totalorder %v1030_v14, %v1031_v15 }
 0x3fa   : > { %v1033_v16 = vsel %vm1032_vm15, %v1030_v14, %v1031_v15  ;;  %v901_v26 = vpop.permute.xlu0 %900  ;;  %vm1056_vm15 = vcmask 1044480  }
 0x3fb   : > { %v1034_v17 = vrot.slane %v1033_v16, 4  ;;  %vm902_vm4 = vcmp.eq.s32.totalorder %v3530_v27, %v901_v26 }
 0x3fd   : > { %vm1035_vm1 = vcmp.lt.s32.totalorder %v1033_v16, %v1034_v17 }
 0x3fe   : > { %v1036_v3 = vsel %vm1035_vm1, %v1033_v16, %v1034_v17  ;;  %v1623_v7 = vpop.permute.xlu0 %1622 }
 0x3ff   : > { %v1037_v18 = vrot.slane %v1036_v3, 2 }
 0x401   : > { %vm1038_vm6 = vcmp.lt.s32.totalorder %v1036_v3, %v1037_v18 }
 0x402   : > { %v1039_v21 = vsel %vm1038_vm6, %v1036_v3, %v1037_v18  ;;  %vm1454_vm6 = vcmask 46080   ;;  %v1699_v1 = vpop.permute.xlu0 %1698 }
 0x403   : > { %v1040_v22 = vrot.slane %v1039_v21, 1 }
 0x405   : > { %vm1041_vm7 = vcmp.lt.s32.totalorder %v1039_v21, %v1040_v22 }
 0x406   : > { %v1042_v62 = vsel %vm1041_vm7, %v1039_v21, %v1040_v22  ;;  %vm1534_vm7 = vcmask 48128   ;;  %v1848_v21 = vpop.permute.xlu0 %1847 }
 0x407   : > { %1044 = vperm.xlu1 %3275, %v1042_v62  }
 0x40b   : > { %1065 = vperm.xlu1 %3275, %v3457_v52   ;;  %v3001_v52 = vsel %vm902_vm4, 1.0, %v3305_v12  ;;  %vm1852_vm4 = vcmask 5120  }
 0x40c   : > { %v1050_v30 = vsel %vm1049_vm11, %v3000_v19, %v3001_v52 }
 0x40f   : > { %1060 = vperm.xlu1 %3275, %v3459_v53  }
 0x41c   : > { %v937_v23 = vpop.permute.xlu1 %936 }
 0x41d   : > { %vm938_vm5 = vcmp.eq.s32.totalorder %v3530_v27, %v937_v23 }
 0x41e   : > { %v3002_v53 = vsel %vm938_vm5, 1.0, %v3305_v12 }
 0x41f   : > { %v1052_v32 = vsel %vm1051_vm13, %v1050_v30, %v3002_v53 }
 0x43e   : > { %v973_v25 = vpop.permute.xlu1 %972 }
 0x43f   : > { %vm974_vm10 = vcmp.eq.s32.totalorder %v3530_v27, %v973_v25 }
 0x440   : > { %v3003_v29 = vsel %vm974_vm10, 1.0, %v3305_v12 }
 0x441   : > { %v1054_v34 = vsel %vm1053_vm14, %v1052_v32, %v3003_v29 }
 0x460   : > { %v1009_v28 = vpop.permute.xlu1 %1008 }
 0x461   : > { %vm1010_vm12 = vcmp.eq.s32.totalorder %v3530_v27, %v1009_v28 }
 0x462   : > { %v3004_v31 = vsel %vm1010_vm12, 1.0, %v3305_v12 }
 0x463   : > { %v1055_v35 = vsel %vm481_vm3, %v1054_v34, %v3004_v31 }
 0x482   : > { %v1045_v33 = vpop.permute.xlu1 %1044 }
 0x483   : > { %vm1046_vm1 = vcmp.eq.s32.totalorder %v3530_v27, %v1045_v33 }
 0x484   : > { %v3005_v39 = vsel %vm1046_vm1, 1.0, %v3305_v12 }
 0x485   : > { %v1057_v40 = vsel %vm1056_vm15, %v1055_v35, %v3005_v39 }
 0x486   : > { %3155 = vmatmul.mubr.msk.f32.vlgmr.msra.gmra.mxu0 %vm379_vm2, %v1057_v40  ;;  %v1066_v42 = vpop.permute.xlu1 %1065 }
 0x487   : > { %v1069_v43 = vmul.f32 %v1066_v42, %v3426_v37  ;;  %3163 = vmatpush3.msk.msra.mxu0 %vm481_vm3, %v3446_v41  ;;  %3166 = vmatprep.mubr.msk.f32.mxu0 %vm3306_vm8, %v3305_v12 }
 0x488   : > { %3164 = vmatprep.subr.mxu0 %v3305_v12 }
 0x489   : > { %3144 = vmatpush3.msk.msra.mxu1 %vm481_vm3, %v1069_v43  ;;  %3165 = vmatpush3.msra.mxu0 %v3440_v38  ;;  %vm1146_vm3 = vcmask 62464  }
 0x48a   : > { %3167 = vmatmul.mubr.msk.f32.vlgmr.msra.gmra.mxu0 %vm379_vm2, %v1057_v40  ;;  %v1061_v45 = vpop.permute.xlu1 %1060  ;;  %3145 = vmatprep.subr.mxu1 %v3305_v12 }
 0x48b   : > { %v1068_v46 = vmul.f32 %v1061_v45, %v3424_v36  ;;  %3174 = vmatprep.subr.mxu0 %v3305_v12  ;;  %3176 = vmatprep.mubr.msk.f32.mxu0 %vm3306_vm8, %v3305_v12  ;;  %v1453_v36 = vld [vmem:[%s3740_s4] sm:$0xff] }
 0x48c   : > { %3175 = vmatpush3.msra.mxu0 %v1453_v36 }
 0x48d   : > { %3146 = vmatpush3.msra.mxu1 %v1068_v46  ;;  %3184 = vmatprep.subr.mxu0 %v3305_v12 }
 0x48e   : > { %3148 = vmatmul.mubr.msk.f32.vlgmr.msra.gmra.mxu1 %vm379_vm2, %v1057_v40  ;;  %3157 = vmatprep.subr.mxu1 %v3305_v12 }
 0x48f   : > { %3158 = vmatpush3.xpose.msk.msra.mxu1 %vm379_vm2, %v1057_v40  ;;  %3159 = vmatprep.mubr.msk.f32.mxu1 %vm3306_vm8, %v3305_v12 }
 0x490   : > { %3169 = vmatprep.subr.mxu1 %v3305_v12 }
 0x546   : > { %v1231_v37 = vpop.f32.mrf.mxu0 }
 0x547   : > { %3160 = vmatmul.mubr.msk.f32.vlgmr.msra.gmra.mxu1 %vm379_vm2, %v1231_v37 }
 0x548   : > { %3170 = vmatpush3.xpose.msk.msra.mxu1 %vm379_vm2, %v1057_v40  ;;  %v3156_v38 = vpop.f32.mrf.mxu0  ;;  %3171 = vmatprep.mubr.msk.f32.mxu1 %vm3306_vm8, %v3305_v12 }
 0x549   : > { %3179 = vmatprep.subr.mxu1 %v3305_v12 }
 0x54a   : > { %v1376_v41 = vpop.f32.mrf.mxu0 }
 0x54b   : > { %3172 = vmatmul.mubr.msk.f32.vlgmr.msra.gmra.mxu1 %vm379_vm2, %v1376_v41  ;;  %vm1538_vm2 = vcmask 1045504  }
 0x54c   : > { %v3168_v47 = vpop.f32.mrf.mxu0  ;;  %3181 = vmatprep.mubr.msk.f32.mxu1 %vm3306_vm8, %v3305_v12 }
 0x54e   : > { %v3581_v48 = vpop.f32.mrf.mxu1 }
 0x54f   : > { %v3585_v49 = vsel %vm1146_vm3, %v3581_v48, -inf  ;;  %3177 = vmatmul.mubr.msk.f32.vlgmr.msra.gmra.mxu0 %vm391_vm0, %v3581_v48 }
 0x550   : > { %v3149_v50 = vpop.f32.mrf.mxu1  ;;  %3186 = vmatprep.mubr.msk.f32.mxu0 %vm3306_vm8, %v3305_v12  ;;  %3185 = vmatpush3.msra.mxu0 %v1623_v7 }
 0x551   : > { %3194 = vmatprep.subr.mxu0 %v3305_v12 }
 0x607   : > { %v1304_v51 = vpop.f32.mrf.mxu1 }
 0x608   : > { %v1455_v54 = vsel %vm1454_vm6, %v1304_v51, 0.0 }
 0x609   : > { %1456 = vadd.xlane.f32.xlu1 %v1455_v54  ;;  %v3161_v55 = vpop.f32.mrf.mxu1 }
 0x60b   : > { %v3591_v56 = vpop.f32.mrf.mxu1 }
 0x60d   : > { %v3173_v57 = vpop.f32.mrf.mxu1 }
 0x60f   : > { %v1529_v58 = vpop.f32.mrf.mxu0 }
 0x611   : > { %v3178_v59 = vpop.f32.mrf.mxu0 }
 0x692   : > { %v1457_v60 = vpop.xlane.xlu1 %1456 }
 0x693   : > { %v1458_v61 = vadd.f32 1.0, %v1457_v60 }
 0x695   : > { %3285 = vrsqrt.f32 %v1458_v61 }
 0x6a2   : > { %v3286_v63 = vpop.eup %3285 }
 0x6a3   : > { %v1533_v0 = vmul.f32 %v3286_v63, %v1529_v58  ;;  %v1613_v2 = vmul.f32 %v3286_v63, %v3286_v63 }
 0x6a5   : > { %3180 = vmatpush3.msk.msra.mxu1 %vm1538_vm2, %v1533_v0  ;;  %v1614_v9 = vmul.f32 %v1613_v2, %v1529_v58 }
 0x6a6   : > { %3182 = vmatmul.mubr.msk.f32.vlgmr.msra.gmra.mxu1 %vm1534_vm7, %v1304_v51  ;;  %3189 = vmatprep.subr.mxu1 %v3305_v12 }
 0x6a7   : > { %3191 = vmatprep.mubr.msk.f32.mxu1 %vm3306_vm8, %v3305_v12  ;;  %3190 = vmatpush3.msra.mxu1 %v1699_v1 }
 0x6a8   : > { %3199 = vmatprep.subr.mxu1 %v3305_v12 }
 0x766   : > { %v1608_v6 = vpop.f32.mrf.mxu1 }
 0x767   : > { %v1612_v8 = vmul.f32 %v3286_v63, %v1608_v6 }
 0x768   : > { %v3183_v11 = vpop.f32.mrf.mxu1 }
 0x769   : > { %v1615_v13 = vadd.f32 %v1614_v9, %v1612_v8 }
 0x76b   : > { %v1620_v14 = vadd.f32 %v1619_v10, %v1615_v13 }
 0x76d   : > { %v3607_v15 = vmax.f32 %v1620_v14, 0.0 }
 0x76f   : > { %3187 = vmatmul.mubr.msk.f32.vlgmr.msra.gmra.mxu0 %vm391_vm0, %v3607_v15  ;;  %3192 = vmatmul.mubr.msk.f32.vlgmr.msra.gmra.mxu1 %vm391_vm0, %v3607_v15 }
 0x770   : > { %3196 = vmatprep.mubr.msk.f32.mxu0 %vm3306_vm8, %v3305_v12  ;;  %3201 = vmatprep.mubr.msk.f32.mxu1 %vm3306_vm8, %v3305_v12 }
 0x82f   : > { %v1694_v16 = vpop.f32.mrf.mxu0  ;;  %v1767_v17 = vpop.f32.mrf.mxu1 }
 0x830   : > { %3195 = vmatpush3.msk.msra.mxu0 %vm1538_vm2, %v1694_v16 }
 0x831   : > { %v3188_v24 = vpop.f32.mrf.mxu0  ;;  %v3193_v3 = vpop.f32.mrf.mxu1  ;;  %3197 = vmatmul.mubr.msk.f32.vlgmr.msra.gmra.mxu0 %vm1534_vm7, %v3591_v56  ;;  %3204 = vmatprep.subr.mxu0 %v3305_v12 }
 0x832   : > { %3205 = vmatpush3.msk.msra.mxu0 %vm1538_vm2, %v1304_v51  ;;  %3206 = vmatprep.mubr.msk.f32.mxu0 %vm3306_vm8, %v3305_v12 }
 0x833   : > { %3214 = vmatprep.subr.mxu0 %v3305_v12 }
 0x8f1   : > { %v1843_v18 = vpop.f32.mrf.mxu0 }
 0x8f2   : > { %v1844_v22 = vadd.f32 %v1843_v18, %v1767_v17 }
 0x8f3   : > { %v3198_v62 = vpop.f32.mrf.mxu0 }
 0x8f4   : > { %v1850_v5 = vadd.f32 %v1848_v21, %v1844_v22 }
 0x8f6   : > { %3287 = vtanh.f32 %v1850_v5 }
 0x903   : > { %v3288_v23 = vpop.eup %3287 }
 0x904   : > { %v1853_v25 = vsel %vm1852_vm4, %v3288_v23, -inf }
 0x905   : > { %v1854_v26 = vrot.slane %v1853_v25, 4 }
 0x907   : > { %v1855_v28 = vmax.f32 %v1853_v25, %v1854_v26  ;;  %v2323_v25 = vld [vmem:[%s3741_s5] sm:$0xff] }
 0x909   : > { %v1856_v52 = vrot.slane %v1855_v28, 2 }
 0x90b   : > { %v1857_v53 = vmax.f32 %v1855_v28, %v1856_v52 }
 0x90d   : > { %v1858_v19 = vrot.slane %v1857_v53, 1 }
 0x90f   : > { %v1859_v29 = vmax.f32 %v1857_v53, %v1858_v19 }
 0x911   : > { %vm1860_vm5 = vcmp.ge.f32.partialorder %v3288_v23, %v1859_v29  ;;  %v1154_v29 = vsel %vm1146_vm3, %v3581_v48, 0.0  ;;  %v3293_v48 = vld [vmem:[%s3743_s7] sm:$0xff]  ;;  %vm2404_vm3 = vcmask 23552  }
 0x912   : > { %v1861_v30 = vsel %vm1860_vm5, %v3415_v20, 6 }
 0x913   : > { %v1862_v31 = vsel %vm1852_vm4, %v1861_v30, 2147483647  ;;  %v1155_v30 = vrot.slane %v1154_v29, 4 }
 0x914   : > { %v1863_v32 = vrot.slane %v1862_v31, 4 }
 0x916   : > { %vm1864_vm9 = vcmp.lt.s32.totalorder %v1862_v31, %v1863_v32 }
 0x917   : > { %v1865_v33 = vsel %vm1864_vm9, %v1862_v31, %v1863_v32 }
 0x918   : > { %v1866_v34 = vrot.slane %v1865_v33, 2 }
 0x91a   : > { %vm1867_vm10 = vcmp.lt.s32.totalorder %v1865_v33, %v1866_v34 }
 0x91b   : > { %v1868_v35 = vsel %vm1867_vm10, %v1865_v33, %v1866_v34  ;;  %v1156_v34 = vadd.f32 %v1155_v30, %v1154_v29 }
 0x91c   : > { %v1869_v39 = vrot.slane %v1868_v35, 1 }
 0x91e   : > { %vm1870_vm12 = vcmp.lt.s32.totalorder %v1868_v35, %v1869_v39 }
 0x91f   : > { %v1871_v40 = vsel %vm1870_vm12, %v1868_v35, %v1869_v39 }
 0x920   : > { %1873 = vperm.xlu0 %3276, %v1871_v40   ;;  %vm1878_vm15 = vcmp.eq.s32.totalorder %v3415_v20, %v1871_v40 }
 0x921   : > { %v1879_v42 = vsel %vm1878_vm15, -2.0, %v3288_v23 }
 0x922   : > { %v1880_v43 = vsel %vm1852_vm4, %v1879_v42, -inf }
 0x923   : > { %v1881_v45 = vrot.slane %v1880_v43, 4 }
 0x925   : > { %v1882_v46 = vmax.f32 %v1880_v43, %v1881_v45 }
 0x927   : > { %v1883_v36 = vrot.slane %v1882_v46, 2 }
 0x929   : > { %v1884_v37 = vmax.f32 %v1882_v46, %v1883_v36 }
 0x92b   : > { %v1885_v38 = vrot.slane %v1884_v37, 1 }
 0x92d   : > { %v1886_v41 = vmax.f32 %v1884_v37, %v1885_v38 }
 0x92f   : > { %vm1887_vm1 = vcmp.ge.f32.partialorder %v1879_v42, %v1886_v41 }
 0x930   : > { %v1888_v47 = vsel %vm1887_vm1, %v3415_v20, 6 }
 0x931   : > { %v1889_v50 = vsel %vm1852_vm4, %v1888_v47, 2147483647 }
 0x932   : > { %v1890_v51 = vrot.slane %v1889_v50, 4 }
 0x934   : > { %vm1891_vm6 = vcmp.lt.s32.totalorder %v1889_v50, %v1890_v51 }
 0x935   : > { %v1892_v54 = vsel %vm1891_vm6, %v1889_v50, %v1890_v51 }
 0x936   : > { %v1893_v55 = vrot.slane %v1892_v54, 2 }
 0x938   : > { %vm1894_vm5 = vcmp.lt.s32.totalorder %v1892_v54, %v1893_v55 }
 0x939   : > { %v1895_v57 = vsel %vm1894_vm5, %v1892_v54, %v1893_v55  ;;  %v2487_v55 = vsub.s32 2, %v3415_v20 }
 0x93a   : > { %v1896_v58 = vrot.slane %v1895_v57, 1 }
 0x93c   : > { %vm1897_vm9 = vcmp.lt.s32.totalorder %v1895_v57, %v1896_v58 }
 0x93d   : > { %v1898_v59 = vsel %vm1897_vm9, %v1895_v57, %v1896_v58 }
 0x93e   : > { %1900 = vperm.xlu0 %3276, %v1898_v59   ;;  %vm1905_vm10 = vcmp.eq.s32.totalorder %v3415_v20, %v1898_v59 }
 0x93f   : > { %v1906_v60 = vsel %vm1905_vm10, -2.0, %v1879_v42  ;;  %v1157_v42 = vrot.slane %v1156_v34, 2 }
 0x940   : > { %v1907_v61 = vsel %vm1852_vm4, %v1906_v60, -inf }
 0x941   : > { %v1908_v63 = vrot.slane %v1907_v61, 4  ;;  %v1158_v45 = vadd.f32 %v1157_v42, %v1156_v34 }
 0x942   : > { %1936 = vperm.xlu0 %3276, %v3288_v23  }
 0x943   : > { %v1909_v0 = vmax.f32 %v1907_v61, %v1908_v63  ;;  %v1159_v46 = vrot.slane %v1158_v45, 1 }
 0x945   : > { %v1910_v7 = vrot.slane %v1909_v0, 2  ;;  %v1160_v36 = vadd.f32 %v1159_v46, %v1158_v45 }
 0x947   : > { %v1911_v1 = vmax.f32 %v1909_v0, %v1910_v7  ;;  %v1162_v37 = vmul.f32 0.16666667, %v1160_v36 }
 0x949   : > { %v1912_v2 = vrot.slane %v1911_v1, 1 }
 0x94b   : > { %v1913_v4 = vmax.f32 %v1911_v1, %v1912_v2 }
 0x94d   : > { %vm1914_vm12 = vcmp.ge.f32.partialorder %v1906_v60, %v1913_v4  ;;  %v3294_v60 = vld [vmem:[%s3742_s6] sm:$0x7] }
 0x94e   : > { %v1915_v6 = vsel %vm1914_vm12, %v3415_v20, 6  ;;  %v2488_v61 = vrot.slane %v3294_v60, %v2487_v55 }
 0x94f   : > { %v1916_v8 = vsel %vm1852_vm4, %v1915_v6, 2147483647 }
 0x950   : > { %v1917_v9 = vrot.slane %v1916_v8, 4 }
 0x952   : > { %vm1918_vm15 = vcmp.lt.s32.totalorder %v1916_v8, %v1917_v9 }
 0x953   : > { %v1919_v10 = vsel %vm1918_vm15, %v1916_v8, %v1917_v9 }
 0x954   : > { %v1920_v11 = vrot.slane %v1919_v10, 2 }
 0x956   : > { %vm1921_vm1 = vcmp.lt.s32.totalorder %v1919_v10, %v1920_v11 }
 0x957   : > { %v1922_v13 = vsel %vm1921_vm1, %v1919_v10, %v1920_v11  ;;  %vm2016_vm1 = vcmask 59392  }
 0x958   : > { %v1923_v14 = vrot.slane %v1922_v13, 1 }
 0x95a   : > { %vm1924_vm6 = vcmp.lt.s32.totalorder %v1922_v13, %v1923_v14 }
 0x95b   : > { %v1925_v16 = vsel %vm1924_vm6, %v1922_v13, %v1923_v14 }
 0x95c   : > { %1927 = vperm.xlu1 %3275, %v1925_v16  }
 0x960   : > { %2491 = vrot.lane.b32.xlu1 %v3293_v48, %s3310_s20 }
 0x964   : > { %2567 = vrot.lane.b32.xlu1 %v3293_v48, %s3311_s21 }
 0x968   : > { %2716 = vrot.lane.b32.xlu1 %v3453_v44, %s3307_s13 }
 0x99b   : > { %v1874_v17 = vpop.permute.xlu0 %1873 }
 0x99c   : > { %vm1875_vm5 = vcmp.eq.s32.totalorder %v3530_v27, %v1874_v17 }
 0x99d   : > { %v3023_v62 = vsel %vm1875_vm5, 1.0, %v3305_v12 }
 0x9b9   : > { %v1901_v24 = vpop.permute.xlu0 %1900 }
 0x9ba   : > { %vm1902_vm4 = vcmp.eq.s32.totalorder %v3530_v27, %v1901_v24 }
 0x9bb   : > { %v3024_v21 = vsel %vm1902_vm4, 1.0, %v3305_v12 }
 0x9bc   : > { %v1932_v5 = vsel %vm1049_vm11, %v3023_v62, %v3024_v21 }
 0x9bd   : > { %v1937_v3 = vpop.permute.xlu0 %1936 }
 0x9be   : > { %v1939_v18 = vmul.f32 %v1937_v3, %v3607_v15 }
 0x9c0   : > { %3200 = vmatpush3.msk.msra.mxu1 %vm1538_vm2, %v1939_v18 }
 0x9c1   : > { %3209 = vmatprep.subr.mxu1 %v3305_v12 }
 0x9d7   : > { %v1928_v22 = vpop.permute.xlu1 %1927 }
 0x9d8   : > { %vm1929_vm9 = vcmp.eq.s32.totalorder %v3530_v27, %v1928_v22 }
 0x9d9   : > { %v3025_v23 = vsel %vm1929_vm9, 1.0, %v3305_v12 }
 0x9da   : > { %v1933_v15 = vsel %vm1051_vm13, %v1932_v5, %v3025_v23  ;;  %vm2324_vm13 = vcmask 18432  }
 0x9db   : > { %3202 = vmatmul.mubr.msk.f32.vlgmr.msra.gmra.mxu1 %vm1534_vm7, %v1933_v15  ;;  %3207 = vmatmul.mubr.msk.f32.vlgmr.msra.gmra.mxu0 %vm1534_vm7, %v1933_v15  ;;  %v2492_v51 = vpop.permute.xlu1 %2491 }
 0x9dc   : > { %3210 = vmatpush3.xpose.msk.msra.mxu1 %vm1534_vm7, %v1933_v15  ;;  %3215 = vmatpush3.msk.msra.mxu0 %vm1538_vm2, %v3591_v56  ;;  %vm2721_vm2 = vcmask 2048  }
 0x9dd   : > { %3216 = vmatprep.mubr.msk.f32.mxu0 %vm3306_vm8, %v3305_v12  ;;  %3224 = vmatprep.subr.mxu0 %v3305_v12 }
 0x9de   : > { %3211 = vmatprep.mubr.msk.f32.mxu1 %vm3306_vm8, %v3305_v12  ;;  %3219 = vmatprep.subr.mxu1 %v3305_v12 }
 0x9df   : > { %3217 = vmatmul.mubr.msk.f32.vlgmr.msra.gmra.mxu0 %vm1534_vm7, %v1933_v15  ;;  %v2568_v44 = vpop.permute.xlu1 %2567 }
 0x9e0   : > { %3226 = vmatprep.mubr.msk.f32.mxu0 %vm3306_vm8, %v3305_v12  ;;  %3225 = vmatpush3.msra.mxu0 %v2323_v25 }
 0x9e1   : > { %3234 = vmatprep.subr.mxu0 %v3305_v12 }
 0x9e3   : > { %v2717_v10 = vpop.permute.xlu1 %2716 }
 0xa9b   : > { %v3665_v56 = vpop.f32.mrf.mxu1  ;;  %v2101_v26 = vpop.f32.mrf.mxu0 }
 0xa9c   : > { %3212 = vmatmul.mubr.msk.f32.vlgmr.msra.gmra.mxu1 %vm1534_vm7, %v2101_v26  ;;  %3227 = vmatmul.mubr.msk.f32.vlgmr.msra.gmra.mxu0 %vm391_vm0, %v3665_v56 }
 0xa9d   : > { %3220 = vmatpush3.xpose.msk.msra.mxu1 %vm1534_vm7, %v1933_v15  ;;  %v3203_v28 = vpop.f32.mrf.mxu1  ;;  %v3208_v52 = vpop.f32.mrf.mxu0  ;;  %3221 = vmatprep.mubr.msk.f32.mxu1 %vm3306_vm8, %v3305_v12 }
 0xa9e   : > { %3229 = vmatprep.subr.mxu1 %v3305_v12  ;;  %3236 = vmatprep.mubr.msk.f32.mxu0 %vm3306_vm8, %v3305_v12 }
 0xa9f   : > { %v2246_v53 = vpop.f32.mrf.mxu0  ;;  %3235 = vmatpush3.msra.mxu0 %v2492_v51 }
 0xaa0   : > { %3222 = vmatmul.mubr.msk.f32.vlgmr.msra.gmra.mxu1 %vm1534_vm7, %v2246_v53  ;;  %3244 = vmatprep.subr.mxu0 %v3305_v12 }
 0xaa1   : > { %v3218_v19 = vpop.f32.mrf.mxu0  ;;  %3231 = vmatprep.mubr.msk.f32.mxu1 %vm3306_vm8, %v3305_v12 }
 0xb5c   : > { %v2174_v31 = vpop.f32.mrf.mxu1  ;;  %v2399_v32 = vpop.f32.mrf.mxu0 }
 0xb5d   : > { %v2325_v33 = vsel %vm2324_vm13, %v2174_v31, 0.0 }
 0xb5e   : > { %v3228_v35 = vpop.f32.mrf.mxu0  ;;  %2326 = vadd.xlane.f32.xlu0 %v2325_v33  ;;  %v3213_v39 = vpop.f32.mrf.mxu1 }
 0xb5f   : > { %v2017_v35 = vsel %vm2016_vm1, %v3665_v56, -inf  ;;  %v2024_v39 = vsel %vm2016_vm1, %v3665_v56, 0.0 }
 0xb60   : > { %v2319_v40 = vpop.f32.mrf.mxu1  ;;  %v2018_v42 = vrot.slane %v2017_v35, 4 }
 0xb62   : > { %v3223_v43 = vpop.f32.mrf.mxu1 }
 0xb63   : > { %v2025_v43 = vrot.slane %v2024_v39, 4 }
 0xb65   : > { %v2026_v48 = vadd.f32 %v2025_v43, %v2024_v39 }
 0xb74   : > { %2875 = vrot.lane.b32.xlu0 %v1162_v37, %s3309_s17  ;;  %v2019_v37 = vmax.f32 %v2017_v35, %v2018_v42 }
 0xbe7   : > { %v2327_v38 = vpop.xlane.xlu0 %2326 }
 0xbe8   : > { %v2328_v41 = vadd.f32 1.0, %v2327_v38 }
 0xbea   : > { %3289 = vrsqrt.f32 %v2328_v41 }
 0xbf7   : > { %v3290_v47 = vpop.eup %3289 }
 0xbf8   : > { %v2403_v50 = vmul.f32 %v3290_v47, %v2399_v32  ;;  %v2482_v54 = vmul.f32 %v3290_v47, %v3290_v47 }
 0xbfa   : > { %3230 = vmatpush3.msk.msra.mxu1 %vm1053_vm14, %v2403_v50  ;;  %v2483_v59 = vmul.f32 %v2482_v54, %v2399_v32  ;;  %v2027_v50 = vrot.slane %v2026_v48, 2 }
 0xbfb   : > { %3232 = vmatmul.mubr.msk.f32.vlgmr.msra.gmra.mxu1 %vm2404_vm3, %v2174_v31  ;;  %3239 = vmatprep.subr.mxu1 %v3305_v12 }
 0xbfc   : > { %3241 = vmatprep.mubr.msk.f32.mxu1 %vm3306_vm8, %v3305_v12  ;;  %3240 = vmatpush3.msra.mxu1 %v2568_v44  ;;  %v2028_v54 = vadd.f32 %v2027_v50, %v2026_v48 }
 0xbfd   : > { %3249 = vmatprep.subr.mxu1 %v3305_v12 }
 0xcbb   : > { %v2477_v57 = vpop.f32.mrf.mxu1 }
 0xcbc   : > { %v2481_v58 = vmul.f32 %v3290_v47, %v2477_v57  ;;  %v2020_v47 = vrot.slane %v2019_v37, 2 }
 0xcbd   : > { %v3233_v63 = vpop.f32.mrf.mxu1 }
 0xcbe   : > { %v2484_v0 = vadd.f32 %v2483_v59, %v2481_v58  ;;  %v2021_v56 = vmax.f32 %v2019_v37, %v2020_v47 }
 0xcc0   : > { %v2489_v7 = vadd.f32 %v2488_v61, %v2484_v0  ;;  %v2022_v57 = vrot.slane %v2021_v56, 1 }
 0xcc2   : > { %v3697_v1 = vmax.f32 %v2489_v7, 0.0  ;;  %v2023_v58 = vmax.f32 %v2021_v56, %v2022_v57 }
 0xcc4   : > { %3237 = vmatmul.mubr.msk.f32.vlgmr.msra.gmra.mxu0 %vm391_vm0, %v3697_v1  ;;  %3242 = vmatmul.mubr.msk.f32.vlgmr.msra.gmra.mxu1 %vm391_vm0, %v3697_v1 }
 0xcc5   : > { %3246 = vmatprep.mubr.msk.f32.mxu0 %vm3306_vm8, %v3305_v12  ;;  %3251 = vmatprep.mubr.msk.f32.mxu1 %vm3306_vm8, %v3305_v12 }
 0xd84   : > { %v2563_v2 = vpop.f32.mrf.mxu0  ;;  %v2636_v4 = vpop.f32.mrf.mxu1 }
 0xd85   : > { %3245 = vmatpush3.msk.msra.mxu0 %vm1053_vm14, %v2563_v2 }
 0xd86   : > { %v3238_v6 = vpop.f32.mrf.mxu0  ;;  %v3243_v8 = vpop.f32.mrf.mxu1  ;;  %3247 = vmatmul.mubr.msk.f32.vlgmr.msra.gmra.mxu0 %vm2404_vm3, %v2319_v40 }
 0xe46   : > { %v2712_v9 = vpop.f32.mrf.mxu0 }
 0xe47   : > { %v2713_v11 = vadd.f32 %v2712_v9, %v2636_v4 }
 0xe48   : > { %v3248_v13 = vpop.f32.mrf.mxu0 }
 0xe49   : > { %v2719_v14 = vadd.f32 %v2717_v10, %v2713_v11 }
 0xe4b   : > { %3291 = vtanh.f32 %v2719_v14 }
 0xe58   : > { %v3292_v16 = vpop.eup %3291 }
 0xe59   : > { %v2722_v17 = vsel %vm2721_vm2, %v3292_v16, -inf }
 0xe5a   : > { %v2723_v24 = vrot.slane %v2722_v17, 4 }
 0xe5c   : > { %v2724_v3 = vmax.f32 %v2722_v17, %v2723_v24 }
 0xe5e   : > { %v2725_v18 = vrot.slane %v2724_v3, 2 }
 0xe60   : > { %v2726_v21 = vmax.f32 %v2724_v3, %v2725_v18 }
 0xe62   : > { %v2727_v22 = vrot.slane %v2726_v21, 1 }
 0xe64   : > { %v2728_v62 = vmax.f32 %v2726_v21, %v2727_v22 }
 0xe66   : > { %vm2729_vm8 = vcmp.ge.f32.partialorder %v3292_v16, %v2728_v62 }
 0xe67   : > { %v2730_v5 = vsel %vm2729_vm8, %v3415_v20, 3  ;;  %vm2857_vm8 = vcmask 58368  }
 0xe68   : > { %v2731_v23 = vsel %vm2721_vm2, %v2730_v5, 2147483647  ;;  %v1148_v5 = vrot.slane %v3585_v49, 4 }
 0xe69   : > { %v2732_v15 = vrot.slane %v2731_v23, 4 }
 0xe6b   : > { %vm2733_vm7 = vcmp.lt.s32.totalorder %v2731_v23, %v2732_v15 }
 0xe6c   : > { %v2734_v25 = vsel %vm2733_vm7, %v2731_v23, %v2732_v15  ;;  %v1149_v23 = vmax.f32 %v3585_v49, %v1148_v5  ;;  %vm2901_vm7 = vcmask 326656  }
 0xe6d   : > { %v2735_v26 = vrot.slane %v2734_v25, 2 }
 0xe6e   : > { %v1150_v15 = vrot.slane %v1149_v23, 2 }
 0xe6f   : > { %vm2736_vm10 = vcmp.lt.s32.totalorder %v2734_v25, %v2735_v26 }
 0xe70   : > { %v2737_v28 = vsel %vm2736_vm10, %v2734_v25, %v2735_v26  ;;  %v1151_v26 = vmax.f32 %v1149_v23, %v1150_v15  ;;  %vm2903_vm10 = vcmask 385024  }
 0xe71   : > { %v2738_v52 = vrot.slane %v2737_v28, 1 }
 0xe73   : > { %vm2739_vm12 = vcmp.lt.s32.totalorder %v2737_v28, %v2738_v52 }
 0xe74   : > { %v2740_v53 = vsel %vm2739_vm12, %v2737_v28, %v2738_v52  ;;  %v1152_v28 = vrot.slane %v1151_v26, 1 }
 0xe75   : > { %2742 = vperm.xlu1 %3275, %v2740_v53   ;;  %vm2747_vm15 = vcmp.eq.s32.totalorder %v3415_v20, %v2740_v53  ;;  %v2876_v53 = vpop.permute.xlu0 %2875 }
 0xe76   : > { %v2748_v19 = vsel %vm2747_vm15, -2.0, %v3292_v16 }
 0xe77   : > { %v2749_v29 = vsel %vm2721_vm2, %v2748_v19, -inf }
 0xe78   : > { %v2750_v30 = vrot.slane %v2749_v29, 4 }
 0xe7a   : > { %v2751_v31 = vmax.f32 %v2749_v29, %v2750_v30 }
 0xe7c   : > { %v2752_v32 = vrot.slane %v2751_v31, 2 }
 0xe7e   : > { %v2753_v33 = vmax.f32 %v2751_v31, %v2752_v32 }
 0xe80   : > { %v2754_v34 = vrot.slane %v2753_v33, 1 }
 0xe82   : > { %v2755_v40 = vmax.f32 %v2753_v33, %v2754_v34 }
 0xe84   : > { %vm2756_vm6 = vcmp.ge.f32.partialorder %v2748_v19, %v2755_v40  ;;  %v1153_v19 = vmax.f32 %v1151_v26, %v1152_v28 }
 0xe85   : > { %v2757_v45 = vsel %vm2756_vm6, %v3415_v20, 3  ;;  %v2029_v20 = vrot.slane %v2028_v54, 1 }
 0xe86   : > { %v2758_v46 = vsel %vm2721_vm2, %v2757_v45, 2147483647  ;;  %v2894_v30 = vsel %vm391_vm0, %v1153_v19, %v2876_v53 }
 0xe87   : > { %v2759_v36 = vrot.slane %v2758_v46, 4  ;;  %v2030_v59 = vadd.f32 %v2029_v20, %v2028_v54 }
 0xe89   : > { %vm2760_vm4 = vcmp.lt.s32.totalorder %v2758_v46, %v2759_v36  ;;  %v2032_v60 = vmul.f32 0.33333334, %v2030_v59 }
 0xe8a   : > { %v2761_v38 = vsel %vm2760_vm4, %v2758_v46, %v2759_v36 }
 0xe8b   : > { %v2762_v41 = vrot.slane %v2761_v38, 2 }
 0xe8d   : > { %vm2763_vm5 = vcmp.lt.s32.totalorder %v2761_v38, %v2762_v41 }
 0xe8e   : > { %v2764_v51 = vsel %vm2763_vm5, %v2761_v38, %v2762_v41 }
 0xe8f   : > { %v2765_v44 = vrot.slane %v2764_v51, 1 }
 0xe91   : > { %vm2766_vm9 = vcmp.lt.s32.totalorder %v2764_v51, %v2765_v44 }
 0xe92   : > { %v2767_v55 = vsel %vm2766_vm9, %v2764_v51, %v2765_v44 }
 0xe93   : > { %2769 = vperm.xlu1 %3275, %v2767_v55  }
 0xe97   : > { %2777 = vperm.xlu1 %3275, %v3292_v16  }
 0xe9b   : > { %2879 = vrot.lane.b32.xlu1 %v2023_v58, %s3312_s24 }
 0xe9f   : > { %2883 = vrot.lane.b32.xlu1 %v2032_v60, %s3313_s25 }
 0xef0   : > { %v2743_v61 = vpop.permute.xlu1 %2742 }
 0xef1   : > { %vm2744_vm2 = vcmp.eq.s32.totalorder %v3530_v27, %v2743_v61 }
 0xef2   : > { %v3043_v4 = vsel %vm2744_vm2, 1.0, %v3305_v12 }
 0xf0e   : > { %v2770_v63 = vpop.permute.xlu1 %2769 }
 0xf0f   : > { %vm2771_vm13 = vcmp.eq.s32.totalorder %v3530_v27, %v2770_v63 }
 0xf10   : > { %v3044_v0 = vsel %vm2771_vm13, 1.0, %v3305_v12 }
 0xf11   : > { %v2774_v6 = vsel %vm1049_vm11, %v3043_v4, %v3044_v0  ;;  %vm2895_vm11 = vcmask 130048  }
 0xf12   : > { %v2778_v7 = vpop.permute.xlu1 %2777 }
 0xf13   : > { %v2780_v2 = vmul.f32 %v2778_v7, %v3697_v1 }
 0xf15   : > { %3250 = vmatpush3.msk.msra.mxu1 %vm1053_vm14, %v2780_v2  ;;  %vm2897_vm14 = vcmask 195584  }
 0xf16   : > { %3252 = vmatmul.mubr.msk.f32.vlgmr.msra.gmra.mxu1 %vm2404_vm3, %v2774_v6  ;;  %v2880_v25 = vpop.permute.xlu1 %2879  ;;  %vm2899_vm3 = vcmask 261120  }
 0xf17   : > { %v2896_v31 = vsel %vm2895_vm11, %v2894_v30, %v2880_v25 }
 0xf1a   : > { %v2884_v52 = vpop.permute.xlu1 %2883 }
 0xf1b   : > { %v2898_v32 = vsel %vm2897_vm14, %v2896_v31, %v2884_v52 }
 0xfd6   : > { %v2853_v8 = vpop.f32.mrf.mxu1 }
 0xfd7   : > { %v2858_v9 = vsel %vm2857_vm8, %v2853_v8, -inf  ;;  %v2865_v10 = vsel %vm2857_vm8, %v2853_v8, 0.0 }
 0xfd8   : > { %v2859_v11 = vrot.slane %v2858_v9, 4  ;;  %v2866_v13 = vrot.slane %v2865_v10, 4  ;;  %v3253_v27 = vpop.f32.mrf.mxu1 }
 0xfda   : > { %v2860_v14 = vmax.f32 %v2858_v9, %v2859_v11  ;;  %v2867_v16 = vadd.f32 %v2866_v13, %v2865_v10 }
 0xfdc   : > { %v2861_v17 = vrot.slane %v2860_v14, 2  ;;  %v2868_v24 = vrot.slane %v2867_v16, 2 }
 0xfde   : > { %v2862_v1 = vmax.f32 %v2860_v14, %v2861_v17  ;;  %v2869_v3 = vadd.f32 %v2868_v24, %v2867_v16 }
 0xfe0   : > { %v2863_v12 = vrot.slane %v2862_v1, 1  ;;  %v2870_v18 = vrot.slane %v2869_v3, 1 }
 0xfe2   : > { %v2864_v21 = vmax.f32 %v2862_v1, %v2863_v12  ;;  %v2871_v22 = vadd.f32 %v2870_v18, %v2869_v3 }
 0xfe4   : > { %2887 = vrot.lane.b32.xlu1 %v2864_v21, %s3314_s26  ;;  %v2873_v62 = vmul.f32 0.5, %v2871_v22 }
 0xfe8   : > { %2891 = vrot.lane.b32.xlu1 %v2873_v62, %s3315_s27 }
0x1056   : > { %v2888_v29 = vpop.permute.xlu1 %2887 }
0x1057   : > { %v2900_v49 = vsel %vm2899_vm3, %v2898_v32, %v2888_v29 }
0x105a   : > { %v2892_v33 = vpop.permute.xlu1 %2891 }
0x105b   : > { %v2902_v34 = vsel %vm2901_vm7, %v2900_v49, %v2892_v33 }
0x105c   : > { %2904 = vst.msk [vmem:[%s368_s11] sm:$0x1] %vm2903_vm10, %v2902_v34 }
0x105d PF: > { %s19_s30 = sadd.s32 1, %s3301_s30  }
0x105e   : > { %p16_p4 = scmp.ge.s32.totalorder %s19_s30, 6  }
0x1060   :  { %18 = sbr.rel (!%p16_p4) target bundleno = 1 (0x1), region = 92 }

</bundles_post_ra>
